<compile_context>
chip_gen: v6e
topology: v6e:2x2x1
jax: 0.10.0
libtpu: 0.0.40
codegen_flags: <defaults>
</compile_context>

<pallas_src>
import functools

import jax
import jax.numpy as jnp
from jax import lax
from jax.experimental import pallas as pl
from jax.experimental.pallas import tpu as pltpu

KERNEL_SIZE = 7
PAD = 3  # padding = 3 for kernel_size = 7 (matches the PyTorch module)


def _sublane_pack(dtype):
    """Second-to-last-dim block granularity for a given dtype."""
    itemsize = jnp.dtype(dtype).itemsize
    if itemsize >= 4:
        return 8
    if itemsize == 2:
        return 16
    return 32


def _auto_c_tile(C, HW, dtype, target_bytes=2 * 1024 * 1024):
    """VMEM-budget-driven channel tile: ~target_bytes per (double-buffered) block."""
    base = _sublane_pack(dtype)
    itemsize = jnp.dtype(dtype).itemsize
    cap = (target_bytes // max(1, HW * itemsize)) // base * base
    cap = max(cap, base)
    if C <= cap:
        return C   # single tile; block dim equals the full array dim (layout-legal)
    return cap     # multiple of `base` -> layout-legal


def spatial_attention_kernel(H, W, c_rem, inv_c, w_ref, x_ref, o_ref,
                             sum_ref, max_ref, pad_ref):
    """Grid = (B, num_channel_tiles); channel axis is the (last) reduction axis.

    w_ref   : (2*K*K,) f32        flattened conv weights, SMEM scalar reads
    x_ref   : (1, c_tile, H*W)    lane-dense input channel tile, VMEM
    o_ref   : (1, 1, H, W)        output attention map (written on last tile)
    sum_ref : (1, H*W) f32        running channel-sum accumulator
    max_ref : (1, H*W) f32        running channel-max accumulator
    pad_ref : (2, Hp, Wp) f32     zero-padded [mean, max] maps for the conv
    """
    K = KERNEL_SIZE
    kc = pl.program_id(1)
    nk = pl.num_programs(1)

    # --- init accumulators on the first channel tile --------------------------
    @pl.when(kc == 0)
    def _():
        sum_ref[...] = jnp.zeros_like(sum_ref)
        max_ref[...] = jnp.full_like(max_ref, -jnp.inf)

    # --- accumulate this channel tile (lane-dense) -----------------------------
    xt = x_ref[0]                                        # (c_tile, H*W), native dtype

    # Sum in f32.  Zero-padded tail channels contribute 0 -> no masking needed.
    sum_ref[...] += jnp.sum(xt.astype(jnp.float32), axis=0, keepdims=True)

    # Max in native dtype (no full-tile f32 upcast); mask the zero-padded
    # channels with -inf on the ragged last tile only (static Python branch).
    if c_rem:
        n_valid = jnp.where(kc == nk - 1, c_rem, xt.shape[0])
        ch = lax.broadcasted_iota(jnp.int32, xt.shape, 0)
        xt_for_max = jnp.where(ch < n_valid, xt, jnp.full_like(xt, -jnp.inf))
    else:
        xt_for_max = xt
    tile_max = jnp.max(xt_for_max, axis=0, keepdims=True).astype(jnp.float32)
    max_ref[...] = jnp.maximum(max_ref[...], tile_max)

    # --- last channel tile: build padded maps, 7x7 conv, sigmoid ---------------
    @pl.when(kc == nk - 1)
    def _():
        # Zero border reproduces Conv2d's zero padding of the concatenated
        # [avg, max] feature map (interior = mean / max over channels).
        pad_ref[...] = jnp.zeros_like(pad_ref)
        s_flat = sum_ref[...] * inv_c                    # (1, H*W) channel mean
        m_flat = max_ref[...]
        for r in range(H):                               # once per batch element
            pad_ref[0, PAD + r:PAD + r + 1, PAD:PAD + W] = s_flat[:, r * W:r * W + W]
            pad_ref[1, PAD + r:PAD + r + 1, PAD:PAD + W] = m_flat[:, r * W:r * W + W]

        sum_map = pad_ref[0]                             # (Hp, Wp)
        max_map = pad_ref[1]

        # Hoist all 98 SMEM scalar weight reads out of the MAC loop.
        w = [w_ref[i] for i in range(2 * K * K)]
        # Hoist the kw lane-shifted views out of the kh loop: 14 lane slices
        # total; only cheap sublane slices remain inside the unrolled MACs.
        s_shift = [sum_map[:, kw:kw + W] for kw in range(K)]
        m_shift = [max_map[:, kw:kw + W] for kw in range(K)]

        acc = jnp.zeros((H, W), jnp.float32)             # stays in vregs
        for kh in range(K):
            for kw in range(K):
                acc = acc + w[kh * K + kw] * s_shift[kw][kh:kh + H, :]
                acc = acc + w[K * K + kh * K + kw] * m_shift[kw][kh:kh + H, :]

        o_ref[...] = jax.nn.sigmoid(acc).reshape(1, 1, H, W).astype(o_ref.dtype)


def spatial_attention(x, weight, *, c_tile=None):
    """x: (B, C, H, W) NCHW, weight: (2, K, K) -> (B, 1, H, W)."""
    B, C, H, W = x.shape
    K = KERNEL_SIZE
    HW = H * W
    Hp, Wp = H + 2 * PAD, W + 2 * PAD
    itemsize = jnp.dtype(x.dtype).itemsize
    base = _sublane_pack(x.dtype)

    if c_tile is None:
        c_tile = _auto_c_tile(C, HW, x.dtype)
    if c_tile < C and c_tile % base != 0:
        raise ValueError(f"c_tile={c_tile} must be a multiple of {base} (or >= C={C})")

    nk = pl.cdiv(C, c_tile)
    c_rem = C % c_tile
    C_pad = nk * c_tile

    # Lane-dense view of the input; zero-pad ragged channels (exact for the
    # sum branch; the max branch masks them in-kernel).
    x3 = x.reshape(B, C, HW)
    if C_pad != C:
        x3 = jnp.pad(x3, ((0, 0), (0, C_pad - C), (0, 0)))

    w_flat = weight.astype(jnp.float32).reshape(2 * K * K)  # 1-D -> minimal SMEM pad

    # Explicit VMEM budget: double-buffered input block + scratch + slack,
    # kept comfortably under v7x's 64 MiB physical VMEM.
    block_bytes = c_tile * HW * itemsize
    vmem_limit = int(max(16 << 20, min(48 << 20, 2 * block_bytes + (6 << 20))))

    kernel = functools.partial(spatial_attention_kernel, H, W, c_rem, 1.0 / C)

    # TODO(synk): when B == 1 on v7x, split the channel-reduction axis across
    # the two TensorCores (per-core partial sum/max + cross-core combine).
    return pl.pallas_call(
        kernel,
        out_shape=jax.ShapeDtypeStruct((B, 1, H, W), x.dtype),
        grid=(B, nk),
        in_specs=[
            # Conv weights: 98 scalars in SMEM, whole array every step.
            pl.BlockSpec(memory_space=pltpu.MemorySpace.SMEM),
            # Lane-dense input: one channel tile of one batch element per step.
            pl.BlockSpec((1, c_tile, HW), lambda b, k: (b, k, 0)),
        ],
        out_specs=pl.BlockSpec((1, 1, H, W), lambda b, k: (b, 0, 0, 0)),
        scratch_shapes=[
            pltpu.VMEM((1, HW), jnp.float32),       # running channel sum
            pltpu.VMEM((1, HW), jnp.float32),       # running channel max
            pltpu.VMEM((2, Hp, Wp), jnp.float32),   # zero-padded [mean, max] maps
        ],
        compiler_params=pltpu.CompilerParams(
            dimension_semantics=("parallel", "arbitrary"),
            vmem_limit_bytes=vmem_limit),
    )(w_flat, x3)


def reference_forward(x, weight):
    """Pure-JAX reference matching the PyTorch forward exactly."""
    avg = jnp.mean(x, axis=1, keepdims=True)
    mx = jnp.max(x, axis=1, keepdims=True)
    feat = jnp.concatenate([avg, mx], axis=1)                # (B, 2, H, W)
    w = weight.reshape(1, 2, KERNEL_SIZE, KERNEL_SIZE)       # OIHW
    y = lax.conv_general_dilated(
        feat, w, window_strides=(1, 1),
        padding=[(PAD, PAD), (PAD, PAD)],
        dimension_numbers=("NCHW", "OIHW", "NCHW"))
    return jax.nn.sigmoid(y)


if __name__ == "__main__":
    key = jax.random.PRNGKey(0)
    kx, kw_key, kx2 = jax.random.split(key, 3)

    B, C, H, W = 2, 4, 16, 16
    x = jax.random.normal(kx, (B, C, H, W), dtype=jnp.float32)

    # Deterministic conv weight init (PyTorch default: kaiming-uniform bound
    # = 1/sqrt(fan_in), fan_in = 2 * 7 * 7).
    fan_in = 2 * KERNEL_SIZE * KERNEL_SIZE
    bound = 1.0 / (fan_in ** 0.5)
    weight = jax.random.uniform(
        kw_key, (2, KERNEL_SIZE, KERNEL_SIZE),
        minval=-bound, maxval=bound, dtype=jnp.float32)

    # 1) Auto-tiled path: whole C fits in one lane-dense tile.
    out = jax.block_until_ready(spatial_attention(x, weight))
    ref = reference_forward(x, weight)
    assert out.shape == (B, 1, H, W), out.shape
    assert jnp.allclose(out, ref, atol=1e-5, rtol=1e-5), (
        float(jnp.max(jnp.abs(out - ref))))

    # 2) Multi-tile channel reduction with a ragged tail: C=20, c_tile=8 ->
    #    3 tiles; last tile masks 4 zero-padded channels in the max branch.
    C2 = 20
    x2 = jax.random.normal(kx2, (B, C2, H, W), dtype=jnp.float32)
    out2 = jax.block_until_ready(spatial_attention(x2, weight, c_tile=8))
    ref2 = reference_forward(x2, weight)
    assert out2.shape == (B, 1, H, W), out2.shape
    assert jnp.allclose(out2, ref2, atol=1e-5, rtol=1e-5), (
        float(jnp.max(jnp.abs(out2 - ref2))))

    print("KERNEL_OK")
</pallas_src>

<mosaic_0001>
module attributes {stable_mosaic.version = 11 : i64} {
  func.func @spatial_attention_kernel(%arg0: i32, %arg1: i32, %arg2: memref<98xf32, #tpu.memory_space<smem>>, %arg3: memref<1x4x256xf32, #tpu.memory_space<vmem>>, %arg4: memref<1x1x16x16xf32, #tpu.memory_space<vmem>>, %arg5: memref<1x256xf32, #tpu.memory_space<vmem>>, %arg6: memref<1x256xf32, #tpu.memory_space<vmem>>, %arg7: memref<2x22x22xf32, #tpu.memory_space<vmem>>) attributes {dimension_semantics = [#tpu.dimension_semantics<parallel>, #tpu.dimension_semantics<arbitrary>], iteration_bounds = array<i64: 2, 1>, scalar_prefetch = 0 : i64, scratch_operands = 3 : i64, tpu.core_type = #tpu.core_type<tc>, window_params = [{transform_indices = @transform_0, window_bounds = array<i64: 98>}, {transform_indices = @transform_1, window_bounds = array<i64: 1, 4, 256>}, {transform_indices = @transform_2, window_bounds = array<i64: 1, 1, 16, 16>}]} {
    %c0_i32 = arith.constant 0 : i32
    %0 = arith.cmpi eq, %arg1, %c0_i32 : i32
    %1 = arith.extui %0 : i1 to i32
    %c0_i32_0 = arith.constant 0 : i32
    %2 = arith.cmpi ne, %1, %c0_i32_0 : i32
    scf.if %2 {
      %cst_14 = arith.constant 0.000000e+00 : f32
      %18 = vector.broadcast %cst_14 : f32 to vector<1x256xf32>
      %c0_15 = arith.constant 0 : index
      %c0_16 = arith.constant 0 : index
      %19 = vector.load %arg5[%c0_15, %c0_16] : memref<1x256xf32, #tpu.memory_space<vmem>>, vector<1x256xf32>
      tpu.vector_store %arg5[%c0_15, %c0_16], %18 {strides = array<i32>} : memref<1x256xf32, #tpu.memory_space<vmem>>, vector<1x256xf32>,
      %cst_17 = arith.constant 0xFF800000 : f32
      %20 = vector.broadcast %cst_17 : f32 to vector<1x256xf32>
      %c0_18 = arith.constant 0 : index
      %c0_19 = arith.constant 0 : index
      %21 = vector.load %arg6[%c0_18, %c0_19] : memref<1x256xf32, #tpu.memory_space<vmem>>, vector<1x256xf32>
      tpu.vector_store %arg6[%c0_18, %c0_19], %20 {strides = array<i32>} : memref<1x256xf32, #tpu.memory_space<vmem>>, vector<1x256xf32>,
    } else {
    }
    %c0 = arith.constant 0 : index
    %c0_1 = arith.constant 0 : index
    %c0_2 = arith.constant 0 : index
    %3 = vector.load %arg3[%c0, %c0_1, %c0_2] : memref<1x4x256xf32, #tpu.memory_space<vmem>>, vector<1x4x256xf32>
    %4 = vector.shape_cast %3 : vector<1x4x256xf32> to vector<4x256xf32>
    %c0_3 = arith.constant 0 : index
    %c0_4 = arith.constant 0 : index
    %5 = vector.load %arg5[%c0_3, %c0_4] : memref<1x256xf32, #tpu.memory_space<vmem>>, vector<1x256xf32>
    %cst = arith.constant dense<0.000000e+00> : vector<256xf32>
    %6 = vector.multi_reduction <add>, %4, %cst [0] : vector<4x256xf32> to vector<256xf32>
    %7 = vector.shape_cast %6 : vector<256xf32> to vector<1x256xf32>
    %8 = arith.addf %5, %7 : vector<1x256xf32>
    %c0_5 = arith.constant 0 : index
    %c0_6 = arith.constant 0 : index
    %9 = vector.load %arg5[%c0_5, %c0_6] : memref<1x256xf32, #tpu.memory_space<vmem>>, vector<1x256xf32>
    tpu.vector_store %arg5[%c0_5, %c0_6], %8 {strides = array<i32>} : memref<1x256xf32, #tpu.memory_space<vmem>>, vector<1x256xf32>,
    %cst_7 = arith.constant dense<0xFF800000> : vector<256xf32>
    %10 = vector.multi_reduction <maximumf>, %4, %cst_7 [0] : vector<4x256xf32> to vector<256xf32>
    %11 = vector.shape_cast %10 : vector<256xf32> to vector<1x256xf32>
    %c0_8 = arith.constant 0 : index
    %c0_9 = arith.constant 0 : index
    %12 = vector.load %arg6[%c0_8, %c0_9] : memref<1x256xf32, #tpu.memory_space<vmem>>, vector<1x256xf32>
    %13 = arith.maximumf %12, %11 : vector<1x256xf32>
    %c0_10 = arith.constant 0 : index
    %c0_11 = arith.constant 0 : index
    %14 = vector.load %arg6[%c0_10, %c0_11] : memref<1x256xf32, #tpu.memory_space<vmem>>, vector<1x256xf32>
    tpu.vector_store %arg6[%c0_10, %c0_11], %13 {strides = array<i32>} : memref<1x256xf32, #tpu.memory_space<vmem>>, vector<1x256xf32>,
    %c0_i32_12 = arith.constant 0 : i32
    %15 = arith.cmpi eq, %arg1, %c0_i32_12 : i32
    %16 = arith.extui %15 : i1 to i32
    %c0_i32_13 = arith.constant 0 : i32
    %17 = arith.cmpi ne, %16, %c0_i32_13 : i32
    scf.if %17 {
      %cst_14 = arith.constant 0.000000e+00 : f32
      %18 = vector.broadcast %cst_14 : f32 to vector<2x22x22xf32>
      %c0_15 = arith.constant 0 : index
      %c0_16 = arith.constant 0 : index
      %c0_17 = arith.constant 0 : index
      %19 = vector.load %arg7[%c0_15, %c0_16, %c0_17] : memref<2x22x22xf32, #tpu.memory_space<vmem>>, vector<2x22x22xf32>
      tpu.vector_store %arg7[%c0_15, %c0_16, %c0_17], %18 {strides = array<i32>} : memref<2x22x22xf32, #tpu.memory_space<vmem>>, vector<2x22x22xf32>,
      %c0_18 = arith.constant 0 : index
      %c0_19 = arith.constant 0 : index
      %20 = vector.load %arg5[%c0_18, %c0_19] : memref<1x256xf32, #tpu.memory_space<vmem>>, vector<1x256xf32>
      %cst_20 = arith.constant 2.500000e-01 : f32
      %21 = vector.broadcast %cst_20 : f32 to vector<1x256xf32>
      %22 = arith.mulf %20, %21 : vector<1x256xf32>
      %c0_21 = arith.constant 0 : index
      %c0_22 = arith.constant 0 : index
      %23 = vector.load %arg6[%c0_21, %c0_22] : memref<1x256xf32, #tpu.memory_space<vmem>>, vector<1x256xf32>
      %24 = vector.extract_strided_slice %22 {offsets = [0, 0], sizes = [1, 16], strides = [1, 1]} : vector<1x256xf32> to vector<1x16xf32>
      %c0_23 = arith.constant 0 : index
      %c3 = arith.constant 3 : index
      %c3_24 = arith.constant 3 : index
      %25 = vector.load %arg7[%c0_23, %c3, %c3_24] : memref<2x22x22xf32, #tpu.memory_space<vmem>>, vector<1x1x16xf32>
      %26 = vector.shape_cast %25 : vector<1x1x16xf32> to vector<1x16xf32>
      %27 = vector.shape_cast %24 : vector<1x16xf32> to vector<1x1x16xf32>
      tpu.vector_store %arg7[%c0_23, %c3, %c3_24], %27 {strides = array<i32>} : memref<2x22x22xf32, #tpu.memory_space<vmem>>, vector<1x1x16xf32>,
      %28 = vector.extract_strided_slice %23 {offsets = [0, 0], sizes = [1, 16], strides = [1, 1]} : vector<1x256xf32> to vector<1x16xf32>
      %c1 = arith.constant 1 : index
      %c3_25 = arith.constant 3 : index
      %c3_26 = arith.constant 3 : index
      %29 = vector.load %arg7[%c1, %c3_25, %c3_26] : memref<2x22x22xf32, #tpu.memory_space<vmem>>, vector<1x1x16xf32>
      %30 = vector.shape_cast %29 : vector<1x1x16xf32> to vector<1x16xf32>
      %31 = vector.shape_cast %28 : vector<1x16xf32> to vector<1x1x16xf32>
      tpu.vector_store %arg7[%c1, %c3_25, %c3_26], %31 {strides = array<i32>} : memref<2x22x22xf32, #tpu.memory_space<vmem>>, vector<1x1x16xf32>,
      %32 = vector.extract_strided_slice %22 {offsets = [0, 16], sizes = [1, 16], strides = [1, 1]} : vector<1x256xf32> to vector<1x16xf32>
      %c0_27 = arith.constant 0 : index
      %c4 = arith.constant 4 : index
      %c3_28 = arith.constant 3 : index
      %33 = vector.load %arg7[%c0_27, %c4, %c3_28] : memref<2x22x22xf32, #tpu.memory_space<vmem>>, vector<1x1x16xf32>
      %34 = vector.shape_cast %33 : vector<1x1x16xf32> to vector<1x16xf32>
      %35 = vector.shape_cast %32 : vector<1x16xf32> to vector<1x1x16xf32>
      tpu.vector_store %arg7[%c0_27, %c4, %c3_28], %35 {strides = array<i32>} : memref<2x22x22xf32, #tpu.memory_space<vmem>>, vector<1x1x16xf32>,
      %36 = vector.extract_strided_slice %23 {offsets = [0, 16], sizes = [1, 16], strides = [1, 1]} : vector<1x256xf32> to vector<1x16xf32>
      %c1_29 = arith.constant 1 : index
      %c4_30 = arith.constant 4 : index
      %c3_31 = arith.constant 3 : index
      %37 = vector.load %arg7[%c1_29, %c4_30, %c3_31] : memref<2x22x22xf32, #tpu.memory_space<vmem>>, vector<1x1x16xf32>
      %38 = vector.shape_cast %37 : vector<1x1x16xf32> to vector<1x16xf32>
      %39 = vector.shape_cast %36 : vector<1x16xf32> to vector<1x1x16xf32>
      tpu.vector_store %arg7[%c1_29, %c4_30, %c3_31], %39 {strides = array<i32>} : memref<2x22x22xf32, #tpu.memory_space<vmem>>, vector<1x1x16xf32>,
      %40 = vector.extract_strided_slice %22 {offsets = [0, 32], sizes = [1, 16], strides = [1, 1]} : vector<1x256xf32> to vector<1x16xf32>
      %c0_32 = arith.constant 0 : index
      %c5 = arith.constant 5 : index
      %c3_33 = arith.constant 3 : index
      %41 = vector.load %arg7[%c0_32, %c5, %c3_33] : memref<2x22x22xf32, #tpu.memory_space<vmem>>, vector<1x1x16xf32>
      %42 = vector.shape_cast %41 : vector<1x1x16xf32> to vector<1x16xf32>
      %43 = vector.shape_cast %40 : vector<1x16xf32> to vector<1x1x16xf32>
      tpu.vector_store %arg7[%c0_32, %c5, %c3_33], %43 {strides = array<i32>} : memref<2x22x22xf32, #tpu.memory_space<vmem>>, vector<1x1x16xf32>,
      %44 = vector.extract_strided_slice %23 {offsets = [0, 32], sizes = [1, 16], strides = [1, 1]} : vector<1x256xf32> to vector<1x16xf32>
      %c1_34 = arith.constant 1 : index
      %c5_35 = arith.constant 5 : index
      %c3_36 = arith.constant 3 : index
      %45 = vector.load %arg7[%c1_34, %c5_35, %c3_36] : memref<2x22x22xf32, #tpu.memory_space<vmem>>, vector<1x1x16xf32>
      %46 = vector.shape_cast %45 : vector<1x1x16xf32> to vector<1x16xf32>
      %47 = vector.shape_cast %44 : vector<1x16xf32> to vector<1x1x16xf32>
      tpu.vector_store %arg7[%c1_34, %c5_35, %c3_36], %47 {strides = array<i32>} : memref<2x22x22xf32, #tpu.memory_space<vmem>>, vector<1x1x16xf32>,
      %48 = vector.extract_strided_slice %22 {offsets = [0, 48], sizes = [1, 16], strides = [1, 1]} : vector<1x256xf32> to vector<1x16xf32>
      %c0_37 = arith.constant 0 : index
      %c6 = arith.constant 6 : index
      %c3_38 = arith.constant 3 : index
      %49 = vector.load %arg7[%c0_37, %c6, %c3_38] : memref<2x22x22xf32, #tpu.memory_space<vmem>>, vector<1x1x16xf32>
      %50 = vector.shape_cast %49 : vector<1x1x16xf32> to vector<1x16xf32>
      %51 = vector.shape_cast %48 : vector<1x16xf32> to vector<1x1x16xf32>
      tpu.vector_store %arg7[%c0_37, %c6, %c3_38], %51 {strides = array<i32>} : memref<2x22x22xf32, #tpu.memory_space<vmem>>, vector<1x1x16xf32>,
      %52 = vector.extract_strided_slice %23 {offsets = [0, 48], sizes = [1, 16], strides = [1, 1]} : vector<1x256xf32> to vector<1x16xf32>
      %c1_39 = arith.constant 1 : index
      %c6_40 = arith.constant 6 : index
      %c3_41 = arith.constant 3 : index
      %53 = vector.load %arg7[%c1_39, %c6_40, %c3_41] : memref<2x22x22xf32, #tpu.memory_space<vmem>>, vector<1x1x16xf32>
      %54 = vector.shape_cast %53 : vector<1x1x16xf32> to vector<1x16xf32>
      %55 = vector.shape_cast %52 : vector<1x16xf32> to vector<1x1x16xf32>
      tpu.vector_store %arg7[%c1_39, %c6_40, %c3_41], %55 {strides = array<i32>} : memref<2x22x22xf32, #tpu.memory_space<vmem>>, vector<1x1x16xf32>,
      %56 = vector.extract_strided_slice %22 {offsets = [0, 64], sizes = [1, 16], strides = [1, 1]} : vector<1x256xf32> to vector<1x16xf32>
      %c0_42 = arith.constant 0 : index
      %c7 = arith.constant 7 : index
      %c3_43 = arith.constant 3 : index
      %57 = vector.load %arg7[%c0_42, %c7, %c3_43] : memref<2x22x22xf32, #tpu.memory_space<vmem>>, vector<1x1x16xf32>
      %58 = vector.shape_cast %57 : vector<1x1x16xf32> to vector<1x16xf32>
      %59 = vector.shape_cast %56 : vector<1x16xf32> to vector<1x1x16xf32>
      tpu.vector_store %arg7[%c0_42, %c7, %c3_43], %59 {strides = array<i32>} : memref<2x22x22xf32, #tpu.memory_space<vmem>>, vector<1x1x16xf32>,
      %60 = vector.extract_strided_slice %23 {offsets = [0, 64], sizes = [1, 16], strides = [1, 1]} : vector<1x256xf32> to vector<1x16xf32>
      %c1_44 = arith.constant 1 : index
      %c7_45 = arith.constant 7 : index
      %c3_46 = arith.constant 3 : index
      %61 = vector.load %arg7[%c1_44, %c7_45, %c3_46] : memref<2x22x22xf32, #tpu.memory_space<vmem>>, vector<1x1x16xf32>
      %62 = vector.shape_cast %61 : vector<1x1x16xf32> to vector<1x16xf32>
      %63 = vector.shape_cast %60 : vector<1x16xf32> to vector<1x1x16xf32>
      tpu.vector_store %arg7[%c1_44, %c7_45, %c3_46], %63 {strides = array<i32>} : memref<2x22x22xf32, #tpu.memory_space<vmem>>, vector<1x1x16xf32>,
      %64 = vector.extract_strided_slice %22 {offsets = [0, 80], sizes = [1, 16], strides = [1, 1]} : vector<1x256xf32> to vector<1x16xf32>
      %c0_47 = arith.constant 0 : index
      %c8 = arith.constant 8 : index
      %c3_48 = arith.constant 3 : index
      %65 = vector.load %arg7[%c0_47, %c8, %c3_48] : memref<2x22x22xf32, #tpu.memory_space<vmem>>, vector<1x1x16xf32>
      %66 = vector.shape_cast %65 : vector<1x1x16xf32> to vector<1x16xf32>
      %67 = vector.shape_cast %64 : vector<1x16xf32> to vector<1x1x16xf32>
      tpu.vector_store %arg7[%c0_47, %c8, %c3_48], %67 {strides = array<i32>} : memref<2x22x22xf32, #tpu.memory_space<vmem>>, vector<1x1x16xf32>,
      %68 = vector.extract_strided_slice %23 {offsets = [0, 80], sizes = [1, 16], strides = [1, 1]} : vector<1x256xf32> to vector<1x16xf32>
      %c1_49 = arith.constant 1 : index
      %c8_50 = arith.constant 8 : index
      %c3_51 = arith.constant 3 : index
      %69 = vector.load %arg7[%c1_49, %c8_50, %c3_51] : memref<2x22x22xf32, #tpu.memory_space<vmem>>, vector<1x1x16xf32>
      %70 = vector.shape_cast %69 : vector<1x1x16xf32> to vector<1x16xf32>
      %71 = vector.shape_cast %68 : vector<1x16xf32> to vector<1x1x16xf32>
      tpu.vector_store %arg7[%c1_49, %c8_50, %c3_51], %71 {strides = array<i32>} : memref<2x22x22xf32, #tpu.memory_space<vmem>>, vector<1x1x16xf32>,
      %72 = vector.extract_strided_slice %22 {offsets = [0, 96], sizes = [1, 16], strides = [1, 1]} : vector<1x256xf32> to vector<1x16xf32>
      %c0_52 = arith.constant 0 : index
      %c9 = arith.constant 9 : index
      %c3_53 = arith.constant 3 : index
      %73 = vector.load %arg7[%c0_52, %c9, %c3_53] : memref<2x22x22xf32, #tpu.memory_space<vmem>>, vector<1x1x16xf32>
      %74 = vector.shape_cast %73 : vector<1x1x16xf32> to vector<1x16xf32>
      %75 = vector.shape_cast %72 : vector<1x16xf32> to vector<1x1x16xf32>
      tpu.vector_store %arg7[%c0_52, %c9, %c3_53], %75 {strides = array<i32>} : memref<2x22x22xf32, #tpu.memory_space<vmem>>, vector<1x1x16xf32>,
      %76 = vector.extract_strided_slice %23 {offsets = [0, 96], sizes = [1, 16], strides = [1, 1]} : vector<1x256xf32> to vector<1x16xf32>
      %c1_54 = arith.constant 1 : index
      %c9_55 = arith.constant 9 : index
      %c3_56 = arith.constant 3 : index
      %77 = vector.load %arg7[%c1_54, %c9_55, %c3_56] : memref<2x22x22xf32, #tpu.memory_space<vmem>>, vector<1x1x16xf32>
      %78 = vector.shape_cast %77 : vector<1x1x16xf32> to vector<1x16xf32>
      %79 = vector.shape_cast %76 : vector<1x16xf32> to vector<1x1x16xf32>
      tpu.vector_store %arg7[%c1_54, %c9_55, %c3_56], %79 {strides = array<i32>} : memref<2x22x22xf32, #tpu.memory_space<vmem>>, vector<1x1x16xf32>,
      %80 = vector.extract_strided_slice %22 {offsets = [0, 112], sizes = [1, 16], strides = [1, 1]} : vector<1x256xf32> to vector<1x16xf32>
      %c0_57 = arith.constant 0 : index
      %c10 = arith.constant 10 : index
      %c3_58 = arith.constant 3 : index
      %81 = vector.load %arg7[%c0_57, %c10, %c3_58] : memref<2x22x22xf32, #tpu.memory_space<vmem>>, vector<1x1x16xf32>
      %82 = vector.shape_cast %81 : vector<1x1x16xf32> to vector<1x16xf32>
      %83 = vector.shape_cast %80 : vector<1x16xf32> to vector<1x1x16xf32>
      tpu.vector_store %arg7[%c0_57, %c10, %c3_58], %83 {strides = array<i32>} : memref<2x22x22xf32, #tpu.memory_space<vmem>>, vector<1x1x16xf32>,
      %84 = vector.extract_strided_slice %23 {offsets = [0, 112], sizes = [1, 16], strides = [1, 1]} : vector<1x256xf32> to vector<1x16xf32>
      %c1_59 = arith.constant 1 : index
      %c10_60 = arith.constant 10 : index
      %c3_61 = arith.constant 3 : index
      %85 = vector.load %arg7[%c1_59, %c10_60, %c3_61] : memref<2x22x22xf32, #tpu.memory_space<vmem>>, vector<1x1x16xf32>
      %86 = vector.shape_cast %85 : vector<1x1x16xf32> to vector<1x16xf32>
      %87 = vector.shape_cast %84 : vector<1x16xf32> to vector<1x1x16xf32>
      tpu.vector_store %arg7[%c1_59, %c10_60, %c3_61], %87 {strides = array<i32>} : memref<2x22x22xf32, #tpu.memory_space<vmem>>, vector<1x1x16xf32>,
      %88 = vector.extract_strided_slice %22 {offsets = [0, 128], sizes = [1, 16], strides = [1, 1]} : vector<1x256xf32> to vector<1x16xf32>
      %c0_62 = arith.constant 0 : index
      %c11 = arith.constant 11 : index
      %c3_63 = arith.constant 3 : index
      %89 = vector.load %arg7[%c0_62, %c11, %c3_63] : memref<2x22x22xf32, #tpu.memory_space<vmem>>, vector<1x1x16xf32>
      %90 = vector.shape_cast %89 : vector<1x1x16xf32> to vector<1x16xf32>
      %91 = vector.shape_cast %88 : vector<1x16xf32> to vector<1x1x16xf32>
      tpu.vector_store %arg7[%c0_62, %c11, %c3_63], %91 {strides = array<i32>} : memref<2x22x22xf32, #tpu.memory_space<vmem>>, vector<1x1x16xf32>,
      %92 = vector.extract_strided_slice %23 {offsets = [0, 128], sizes = [1, 16], strides = [1, 1]} : vector<1x256xf32> to vector<1x16xf32>
      %c1_64 = arith.constant 1 : index
      %c11_65 = arith.constant 11 : index
      %c3_66 = arith.constant 3 : index
      %93 = vector.load %arg7[%c1_64, %c11_65, %c3_66] : memref<2x22x22xf32, #tpu.memory_space<vmem>>, vector<1x1x16xf32>
      %94 = vector.shape_cast %93 : vector<1x1x16xf32> to vector<1x16xf32>
      %95 = vector.shape_cast %92 : vector<1x16xf32> to vector<1x1x16xf32>
      tpu.vector_store %arg7[%c1_64, %c11_65, %c3_66], %95 {strides = array<i32>} : memref<2x22x22xf32, #tpu.memory_space<vmem>>, vector<1x1x16xf32>,
      %96 = vector.extract_strided_slice %22 {offsets = [0, 144], sizes = [1, 16], strides = [1, 1]} : vector<1x256xf32> to vector<1x16xf32>
      %c0_67 = arith.constant 0 : index
      %c12 = arith.constant 12 : index
      %c3_68 = arith.constant 3 : index
      %97 = vector.load %arg7[%c0_67, %c12, %c3_68] : memref<2x22x22xf32, #tpu.memory_space<vmem>>, vector<1x1x16xf32>
      %98 = vector.shape_cast %97 : vector<1x1x16xf32> to vector<1x16xf32>
      %99 = vector.shape_cast %96 : vector<1x16xf32> to vector<1x1x16xf32>
      tpu.vector_store %arg7[%c0_67, %c12, %c3_68], %99 {strides = array<i32>} : memref<2x22x22xf32, #tpu.memory_space<vmem>>, vector<1x1x16xf32>,
      %100 = vector.extract_strided_slice %23 {offsets = [0, 144], sizes = [1, 16], strides = [1, 1]} : vector<1x256xf32> to vector<1x16xf32>
      %c1_69 = arith.constant 1 : index
      %c12_70 = arith.constant 12 : index
      %c3_71 = arith.constant 3 : index
      %101 = vector.load %arg7[%c1_69, %c12_70, %c3_71] : memref<2x22x22xf32, #tpu.memory_space<vmem>>, vector<1x1x16xf32>
      %102 = vector.shape_cast %101 : vector<1x1x16xf32> to vector<1x16xf32>
      %103 = vector.shape_cast %100 : vector<1x16xf32> to vector<1x1x16xf32>
      tpu.vector_store %arg7[%c1_69, %c12_70, %c3_71], %103 {strides = array<i32>} : memref<2x22x22xf32, #tpu.memory_space<vmem>>, vector<1x1x16xf32>,
      %104 = vector.extract_strided_slice %22 {offsets = [0, 160], sizes = [1, 16], strides = [1, 1]} : vector<1x256xf32> to vector<1x16xf32>
      %c0_72 = arith.constant 0 : index
      %c13 = arith.constant 13 : index
      %c3_73 = arith.constant 3 : index
      %105 = vector.load %arg7[%c0_72, %c13, %c3_73] : memref<2x22x22xf32, #tpu.memory_space<vmem>>, vector<1x1x16xf32>
      %106 = vector.shape_cast %105 : vector<1x1x16xf32> to vector<1x16xf32>
      %107 = vector.shape_cast %104 : vector<1x16xf32> to vector<1x1x16xf32>
      tpu.vector_store %arg7[%c0_72, %c13, %c3_73], %107 {strides = array<i32>} : memref<2x22x22xf32, #tpu.memory_space<vmem>>, vector<1x1x16xf32>,
      %108 = vector.extract_strided_slice %23 {offsets = [0, 160], sizes = [1, 16], strides = [1, 1]} : vector<1x256xf32> to vector<1x16xf32>
      %c1_74 = arith.constant 1 : index
      %c13_75 = arith.constant 13 : index
      %c3_76 = arith.constant 3 : index
      %109 = vector.load %arg7[%c1_74, %c13_75, %c3_76] : memref<2x22x22xf32, #tpu.memory_space<vmem>>, vector<1x1x16xf32>
      %110 = vector.shape_cast %109 : vector<1x1x16xf32> to vector<1x16xf32>
      %111 = vector.shape_cast %108 : vector<1x16xf32> to vector<1x1x16xf32>
      tpu.vector_store %arg7[%c1_74, %c13_75, %c3_76], %111 {strides = array<i32>} : memref<2x22x22xf32, #tpu.memory_space<vmem>>, vector<1x1x16xf32>,
      %112 = vector.extract_strided_slice %22 {offsets = [0, 176], sizes = [1, 16], strides = [1, 1]} : vector<1x256xf32> to vector<1x16xf32>
      %c0_77 = arith.constant 0 : index
      %c14 = arith.constant 14 : index
      %c3_78 = arith.constant 3 : index
      %113 = vector.load %arg7[%c0_77, %c14, %c3_78] : memref<2x22x22xf32, #tpu.memory_space<vmem>>, vector<1x1x16xf32>
      %114 = vector.shape_cast %113 : vector<1x1x16xf32> to vector<1x16xf32>
      %115 = vector.shape_cast %112 : vector<1x16xf32> to vector<1x1x16xf32>
      tpu.vector_store %arg7[%c0_77, %c14, %c3_78], %115 {strides = array<i32>} : memref<2x22x22xf32, #tpu.memory_space<vmem>>, vector<1x1x16xf32>,
      %116 = vector.extract_strided_slice %23 {offsets = [0, 176], sizes = [1, 16], strides = [1, 1]} : vector<1x256xf32> to vector<1x16xf32>
      %c1_79 = arith.constant 1 : index
      %c14_80 = arith.constant 14 : index
      %c3_81 = arith.constant 3 : index
      %117 = vector.load %arg7[%c1_79, %c14_80, %c3_81] : memref<2x22x22xf32, #tpu.memory_space<vmem>>, vector<1x1x16xf32>
      %118 = vector.shape_cast %117 : vector<1x1x16xf32> to vector<1x16xf32>
      %119 = vector.shape_cast %116 : vector<1x16xf32> to vector<1x1x16xf32>
      tpu.vector_store %arg7[%c1_79, %c14_80, %c3_81], %119 {strides = array<i32>} : memref<2x22x22xf32, #tpu.memory_space<vmem>>, vector<1x1x16xf32>,
      %120 = vector.extract_strided_slice %22 {offsets = [0, 192], sizes = [1, 16], strides = [1, 1]} : vector<1x256xf32> to vector<1x16xf32>
      %c0_82 = arith.constant 0 : index
      %c15 = arith.constant 15 : index
      %c3_83 = arith.constant 3 : index
      %121 = vector.load %arg7[%c0_82, %c15, %c3_83] : memref<2x22x22xf32, #tpu.memory_space<vmem>>, vector<1x1x16xf32>
      %122 = vector.shape_cast %121 : vector<1x1x16xf32> to vector<1x16xf32>
      %123 = vector.shape_cast %120 : vector<1x16xf32> to vector<1x1x16xf32>
      tpu.vector_store %arg7[%c0_82, %c15, %c3_83], %123 {strides = array<i32>} : memref<2x22x22xf32, #tpu.memory_space<vmem>>, vector<1x1x16xf32>,
      %124 = vector.extract_strided_slice %23 {offsets = [0, 192], sizes = [1, 16], strides = [1, 1]} : vector<1x256xf32> to vector<1x16xf32>
      %c1_84 = arith.constant 1 : index
      %c15_85 = arith.constant 15 : index
      %c3_86 = arith.constant 3 : index
      %125 = vector.load %arg7[%c1_84, %c15_85, %c3_86] : memref<2x22x22xf32, #tpu.memory_space<vmem>>, vector<1x1x16xf32>
      %126 = vector.shape_cast %125 : vector<1x1x16xf32> to vector<1x16xf32>
      %127 = vector.shape_cast %124 : vector<1x16xf32> to vector<1x1x16xf32>
      tpu.vector_store %arg7[%c1_84, %c15_85, %c3_86], %127 {strides = array<i32>} : memref<2x22x22xf32, #tpu.memory_space<vmem>>, vector<1x1x16xf32>,
      %128 = vector.extract_strided_slice %22 {offsets = [0, 208], sizes = [1, 16], strides = [1, 1]} : vector<1x256xf32> to vector<1x16xf32>
      %c0_87 = arith.constant 0 : index
      %c16 = arith.constant 16 : index
      %c3_88 = arith.constant 3 : index
      %129 = vector.load %arg7[%c0_87, %c16, %c3_88] : memref<2x22x22xf32, #tpu.memory_space<vmem>>, vector<1x1x16xf32>
      %130 = vector.shape_cast %129 : vector<1x1x16xf32> to vector<1x16xf32>
      %131 = vector.shape_cast %128 : vector<1x16xf32> to vector<1x1x16xf32>
      tpu.vector_store %arg7[%c0_87, %c16, %c3_88], %131 {strides = array<i32>} : memref<2x22x22xf32, #tpu.memory_space<vmem>>, vector<1x1x16xf32>,
      %132 = vector.extract_strided_slice %23 {offsets = [0, 208], sizes = [1, 16], strides = [1, 1]} : vector<1x256xf32> to vector<1x16xf32>
      %c1_89 = arith.constant 1 : index
      %c16_90 = arith.constant 16 : index
      %c3_91 = arith.constant 3 : index
      %133 = vector.load %arg7[%c1_89, %c16_90, %c3_91] : memref<2x22x22xf32, #tpu.memory_space<vmem>>, vector<1x1x16xf32>
      %134 = vector.shape_cast %133 : vector<1x1x16xf32> to vector<1x16xf32>
      %135 = vector.shape_cast %132 : vector<1x16xf32> to vector<1x1x16xf32>
      tpu.vector_store %arg7[%c1_89, %c16_90, %c3_91], %135 {strides = array<i32>} : memref<2x22x22xf32, #tpu.memory_space<vmem>>, vector<1x1x16xf32>,
      %136 = vector.extract_strided_slice %22 {offsets = [0, 224], sizes = [1, 16], strides = [1, 1]} : vector<1x256xf32> to vector<1x16xf32>
      %c0_92 = arith.constant 0 : index
      %c17 = arith.constant 17 : index
      %c3_93 = arith.constant 3 : index
      %137 = vector.load %arg7[%c0_92, %c17, %c3_93] : memref<2x22x22xf32, #tpu.memory_space<vmem>>, vector<1x1x16xf32>
      %138 = vector.shape_cast %137 : vector<1x1x16xf32> to vector<1x16xf32>
      %139 = vector.shape_cast %136 : vector<1x16xf32> to vector<1x1x16xf32>
      tpu.vector_store %arg7[%c0_92, %c17, %c3_93], %139 {strides = array<i32>} : memref<2x22x22xf32, #tpu.memory_space<vmem>>, vector<1x1x16xf32>,
      %140 = vector.extract_strided_slice %23 {offsets = [0, 224], sizes = [1, 16], strides = [1, 1]} : vector<1x256xf32> to vector<1x16xf32>
      %c1_94 = arith.constant 1 : index
      %c17_95 = arith.constant 17 : index
      %c3_96 = arith.constant 3 : index
      %141 = vector.load %arg7[%c1_94, %c17_95, %c3_96] : memref<2x22x22xf32, #tpu.memory_space<vmem>>, vector<1x1x16xf32>
      %142 = vector.shape_cast %141 : vector<1x1x16xf32> to vector<1x16xf32>
      %143 = vector.shape_cast %140 : vector<1x16xf32> to vector<1x1x16xf32>
      tpu.vector_store %arg7[%c1_94, %c17_95, %c3_96], %143 {strides = array<i32>} : memref<2x22x22xf32, #tpu.memory_space<vmem>>, vector<1x1x16xf32>,
      %144 = vector.extract_strided_slice %22 {offsets = [0, 240], sizes = [1, 16], strides = [1, 1]} : vector<1x256xf32> to vector<1x16xf32>
      %c0_97 = arith.constant 0 : index
      %c18 = arith.constant 18 : index
      %c3_98 = arith.constant 3 : index
      %145 = vector.load %arg7[%c0_97, %c18, %c3_98] : memref<2x22x22xf32, #tpu.memory_space<vmem>>, vector<1x1x16xf32>
      %146 = vector.shape_cast %145 : vector<1x1x16xf32> to vector<1x16xf32>
      %147 = vector.shape_cast %144 : vector<1x16xf32> to vector<1x1x16xf32>
      tpu.vector_store %arg7[%c0_97, %c18, %c3_98], %147 {strides = array<i32>} : memref<2x22x22xf32, #tpu.memory_space<vmem>>, vector<1x1x16xf32>,
      %148 = vector.extract_strided_slice %23 {offsets = [0, 240], sizes = [1, 16], strides = [1, 1]} : vector<1x256xf32> to vector<1x16xf32>
      %c1_99 = arith.constant 1 : index
      %c18_100 = arith.constant 18 : index
      %c3_101 = arith.constant 3 : index
      %149 = vector.load %arg7[%c1_99, %c18_100, %c3_101] : memref<2x22x22xf32, #tpu.memory_space<vmem>>, vector<1x1x16xf32>
      %150 = vector.shape_cast %149 : vector<1x1x16xf32> to vector<1x16xf32>
      %151 = vector.shape_cast %148 : vector<1x16xf32> to vector<1x1x16xf32>
      tpu.vector_store %arg7[%c1_99, %c18_100, %c3_101], %151 {strides = array<i32>} : memref<2x22x22xf32, #tpu.memory_space<vmem>>, vector<1x1x16xf32>,
      %c0_102 = arith.constant 0 : index
      %c0_103 = arith.constant 0 : index
      %c0_104 = arith.constant 0 : index
      %152 = vector.load %arg7[%c0_102, %c0_103, %c0_104] : memref<2x22x22xf32, #tpu.memory_space<vmem>>, vector<1x22x22xf32>
      %153 = vector.shape_cast %152 : vector<1x22x22xf32> to vector<22x22xf32>
      %c1_105 = arith.constant 1 : index
      %c0_106 = arith.constant 0 : index
      %c0_107 = arith.constant 0 : index
      %154 = vector.load %arg7[%c1_105, %c0_106, %c0_107] : memref<2x22x22xf32, #tpu.memory_space<vmem>>, vector<1x22x22xf32>
      %155 = vector.shape_cast %154 : vector<1x22x22xf32> to vector<22x22xf32>
      %c0_108 = arith.constant 0 : index
      %156 = memref.load %arg2[%c0_108] : memref<98xf32, #tpu.memory_space<smem>>
      %c1_109 = arith.constant 1 : index
      %157 = memref.load %arg2[%c1_109] : memref<98xf32, #tpu.memory_space<smem>>
      %c2 = arith.constant 2 : index
      %158 = memref.load %arg2[%c2] : memref<98xf32, #tpu.memory_space<smem>>
      %c3_110 = arith.constant 3 : index
      %159 = memref.load %arg2[%c3_110] : memref<98xf32, #tpu.memory_space<smem>>
      %c4_111 = arith.constant 4 : index
      %160 = memref.load %arg2[%c4_111] : memref<98xf32, #tpu.memory_space<smem>>
      %c5_112 = arith.constant 5 : index
      %161 = memref.load %arg2[%c5_112] : memref<98xf32, #tpu.memory_space<smem>>
      %c6_113 = arith.constant 6 : index
      %162 = memref.load %arg2[%c6_113] : memref<98xf32, #tpu.memory_space<smem>>
      %c7_114 = arith.constant 7 : index
      %163 = memref.load %arg2[%c7_114] : memref<98xf32, #tpu.memory_space<smem>>
      %c8_115 = arith.constant 8 : index
      %164 = memref.load %arg2[%c8_115] : memref<98xf32, #tpu.memory_space<smem>>
      %c9_116 = arith.constant 9 : index
      %165 = memref.load %arg2[%c9_116] : memref<98xf32, #tpu.memory_space<smem>>
      %c10_117 = arith.constant 10 : index
      %166 = memref.load %arg2[%c10_117] : memref<98xf32, #tpu.memory_space<smem>>
      %c11_118 = arith.constant 11 : index
      %167 = memref.load %arg2[%c11_118] : memref<98xf32, #tpu.memory_space<smem>>
      %c12_119 = arith.constant 12 : index
      %168 = memref.load %arg2[%c12_119] : memref<98xf32, #tpu.memory_space<smem>>
      %c13_120 = arith.constant 13 : index
      %169 = memref.load %arg2[%c13_120] : memref<98xf32, #tpu.memory_space<smem>>
      %c14_121 = arith.constant 14 : index
      %170 = memref.load %arg2[%c14_121] : memref<98xf32, #tpu.memory_space<smem>>
      %c15_122 = arith.constant 15 : index
      %171 = memref.load %arg2[%c15_122] : memref<98xf32, #tpu.memory_space<smem>>
      %c16_123 = arith.constant 16 : index
      %172 = memref.load %arg2[%c16_123] : memref<98xf32, #tpu.memory_space<smem>>
      %c17_124 = arith.constant 17 : index
      %173 = memref.load %arg2[%c17_124] : memref<98xf32, #tpu.memory_space<smem>>
      %c18_125 = arith.constant 18 : index
      %174 = memref.load %arg2[%c18_125] : memref<98xf32, #tpu.memory_space<smem>>
      %c19 = arith.constant 19 : index
      %175 = memref.load %arg2[%c19] : memref<98xf32, #tpu.memory_space<smem>>
      %c20 = arith.constant 20 : index
      %176 = memref.load %arg2[%c20] : memref<98xf32, #tpu.memory_space<smem>>
      %c21 = arith.constant 21 : index
      %177 = memref.load %arg2[%c21] : memref<98xf32, #tpu.memory_space<smem>>
      %c22 = arith.constant 22 : index
      %178 = memref.load %arg2[%c22] : memref<98xf32, #tpu.memory_space<smem>>
      %c23 = arith.constant 23 : index
      %179 = memref.load %arg2[%c23] : memref<98xf32, #tpu.memory_space<smem>>
      %c24 = arith.constant 24 : index
      %180 = memref.load %arg2[%c24] : memref<98xf32, #tpu.memory_space<smem>>
      %c25 = arith.constant 25 : index
      %181 = memref.load %arg2[%c25] : memref<98xf32, #tpu.memory_space<smem>>
      %c26 = arith.constant 26 : index
      %182 = memref.load %arg2[%c26] : memref<98xf32, #tpu.memory_space<smem>>
      %c27 = arith.constant 27 : index
      %183 = memref.load %arg2[%c27] : memref<98xf32, #tpu.memory_space<smem>>
      %c28 = arith.constant 28 : index
      %184 = memref.load %arg2[%c28] : memref<98xf32, #tpu.memory_space<smem>>
      %c29 = arith.constant 29 : index
      %185 = memref.load %arg2[%c29] : memref<98xf32, #tpu.memory_space<smem>>
      %c30 = arith.constant 30 : index
      %186 = memref.load %arg2[%c30] : memref<98xf32, #tpu.memory_space<smem>>
      %c31 = arith.constant 31 : index
      %187 = memref.load %arg2[%c31] : memref<98xf32, #tpu.memory_space<smem>>
      %c32 = arith.constant 32 : index
      %188 = memref.load %arg2[%c32] : memref<98xf32, #tpu.memory_space<smem>>
      %c33 = arith.constant 33 : index
      %189 = memref.load %arg2[%c33] : memref<98xf32, #tpu.memory_space<smem>>
      %c34 = arith.constant 34 : index
      %190 = memref.load %arg2[%c34] : memref<98xf32, #tpu.memory_space<smem>>
      %c35 = arith.constant 35 : index
      %191 = memref.load %arg2[%c35] : memref<98xf32, #tpu.memory_space<smem>>
      %c36 = arith.constant 36 : index
      %192 = memref.load %arg2[%c36] : memref<98xf32, #tpu.memory_space<smem>>
      %c37 = arith.constant 37 : index
      %193 = memref.load %arg2[%c37] : memref<98xf32, #tpu.memory_space<smem>>
      %c38 = arith.constant 38 : index
      %194 = memref.load %arg2[%c38] : memref<98xf32, #tpu.memory_space<smem>>
      %c39 = arith.constant 39 : index
      %195 = memref.load %arg2[%c39] : memref<98xf32, #tpu.memory_space<smem>>
      %c40 = arith.constant 40 : index
      %196 = memref.load %arg2[%c40] : memref<98xf32, #tpu.memory_space<smem>>
      %c41 = arith.constant 41 : index
      %197 = memref.load %arg2[%c41] : memref<98xf32, #tpu.memory_space<smem>>
      %c42 = arith.constant 42 : index
      %198 = memref.load %arg2[%c42] : memref<98xf32, #tpu.memory_space<smem>>
      %c43 = arith.constant 43 : index
      %199 = memref.load %arg2[%c43] : memref<98xf32, #tpu.memory_space<smem>>
      %c44 = arith.constant 44 : index
      %200 = memref.load %arg2[%c44] : memref<98xf32, #tpu.memory_space<smem>>
      %c45 = arith.constant 45 : index
      %201 = memref.load %arg2[%c45] : memref<98xf32, #tpu.memory_space<smem>>
      %c46 = arith.constant 46 : index
      %202 = memref.load %arg2[%c46] : memref<98xf32, #tpu.memory_space<smem>>
      %c47 = arith.constant 47 : index
      %203 = memref.load %arg2[%c47] : memref<98xf32, #tpu.memory_space<smem>>
      %c48 = arith.constant 48 : index
      %204 = memref.load %arg2[%c48] : memref<98xf32, #tpu.memory_space<smem>>
      %c49 = arith.constant 49 : index
      %205 = memref.load %arg2[%c49] : memref<98xf32, #tpu.memory_space<smem>>
      %c50 = arith.constant 50 : index
      %206 = memref.load %arg2[%c50] : memref<98xf32, #tpu.memory_space<smem>>
      %c51 = arith.constant 51 : index
      %207 = memref.load %arg2[%c51] : memref<98xf32, #tpu.memory_space<smem>>
      %c52 = arith.constant 52 : index
      %208 = memref.load %arg2[%c52] : memref<98xf32, #tpu.memory_space<smem>>
      %c53 = arith.constant 53 : index
      %209 = memref.load %arg2[%c53] : memref<98xf32, #tpu.memory_space<smem>>
      %c54 = arith.constant 54 : index
      %210 = memref.load %arg2[%c54] : memref<98xf32, #tpu.memory_space<smem>>
      %c55 = arith.constant 55 : index
      %211 = memref.load %arg2[%c55] : memref<98xf32, #tpu.memory_space<smem>>
      %c56 = arith.constant 56 : index
      %212 = memref.load %arg2[%c56] : memref<98xf32, #tpu.memory_space<smem>>
      %c57 = arith.constant 57 : index
      %213 = memref.load %arg2[%c57] : memref<98xf32, #tpu.memory_space<smem>>
      %c58 = arith.constant 58 : index
      %214 = memref.load %arg2[%c58] : memref<98xf32, #tpu.memory_space<smem>>
      %c59 = arith.constant 59 : index
      %215 = memref.load %arg2[%c59] : memref<98xf32, #tpu.memory_space<smem>>
      %c60 = arith.constant 60 : index
      %216 = memref.load %arg2[%c60] : memref<98xf32, #tpu.memory_space<smem>>
      %c61 = arith.constant 61 : index
      %217 = memref.load %arg2[%c61] : memref<98xf32, #tpu.memory_space<smem>>
      %c62 = arith.constant 62 : index
      %218 = memref.load %arg2[%c62] : memref<98xf32, #tpu.memory_space<smem>>
      %c63 = arith.constant 63 : index
      %219 = memref.load %arg2[%c63] : memref<98xf32, #tpu.memory_space<smem>>
      %c64 = arith.constant 64 : index
      %220 = memref.load %arg2[%c64] : memref<98xf32, #tpu.memory_space<smem>>
      %c65 = arith.constant 65 : index
      %221 = memref.load %arg2[%c65] : memref<98xf32, #tpu.memory_space<smem>>
      %c66 = arith.constant 66 : index
      %222 = memref.load %arg2[%c66] : memref<98xf32, #tpu.memory_space<smem>>
      %c67 = arith.constant 67 : index
      %223 = memref.load %arg2[%c67] : memref<98xf32, #tpu.memory_space<smem>>
      %c68 = arith.constant 68 : index
      %224 = memref.load %arg2[%c68] : memref<98xf32, #tpu.memory_space<smem>>
      %c69 = arith.constant 69 : index
      %225 = memref.load %arg2[%c69] : memref<98xf32, #tpu.memory_space<smem>>
      %c70 = arith.constant 70 : index
      %226 = memref.load %arg2[%c70] : memref<98xf32, #tpu.memory_space<smem>>
      %c71 = arith.constant 71 : index
      %227 = memref.load %arg2[%c71] : memref<98xf32, #tpu.memory_space<smem>>
      %c72 = arith.constant 72 : index
      %228 = memref.load %arg2[%c72] : memref<98xf32, #tpu.memory_space<smem>>
      %c73 = arith.constant 73 : index
      %229 = memref.load %arg2[%c73] : memref<98xf32, #tpu.memory_space<smem>>
      %c74 = arith.constant 74 : index
      %230 = memref.load %arg2[%c74] : memref<98xf32, #tpu.memory_space<smem>>
      %c75 = arith.constant 75 : index
      %231 = memref.load %arg2[%c75] : memref<98xf32, #tpu.memory_space<smem>>
      %c76 = arith.constant 76 : index
      %232 = memref.load %arg2[%c76] : memref<98xf32, #tpu.memory_space<smem>>
      %c77 = arith.constant 77 : index
      %233 = memref.load %arg2[%c77] : memref<98xf32, #tpu.memory_space<smem>>
      %c78 = arith.constant 78 : index
      %234 = memref.load %arg2[%c78] : memref<98xf32, #tpu.memory_space<smem>>
      %c79 = arith.constant 79 : index
      %235 = memref.load %arg2[%c79] : memref<98xf32, #tpu.memory_space<smem>>
      %c80 = arith.constant 80 : index
      %236 = memref.load %arg2[%c80] : memref<98xf32, #tpu.memory_space<smem>>
      %c81 = arith.constant 81 : index
      %237 = memref.load %arg2[%c81] : memref<98xf32, #tpu.memory_space<smem>>
      %c82 = arith.constant 82 : index
      %238 = memref.load %arg2[%c82] : memref<98xf32, #tpu.memory_space<smem>>
      %c83 = arith.constant 83 : index
      %239 = memref.load %arg2[%c83] : memref<98xf32, #tpu.memory_space<smem>>
      %c84 = arith.constant 84 : index
      %240 = memref.load %arg2[%c84] : memref<98xf32, #tpu.memory_space<smem>>
      %c85 = arith.constant 85 : index
      %241 = memref.load %arg2[%c85] : memref<98xf32, #tpu.memory_space<smem>>
      %c86 = arith.constant 86 : index
      %242 = memref.load %arg2[%c86] : memref<98xf32, #tpu.memory_space<smem>>
      %c87 = arith.constant 87 : index
      %243 = memref.load %arg2[%c87] : memref<98xf32, #tpu.memory_space<smem>>
      %c88 = arith.constant 88 : index
      %244 = memref.load %arg2[%c88] : memref<98xf32, #tpu.memory_space<smem>>
      %c89 = arith.constant 89 : index
      %245 = memref.load %arg2[%c89] : memref<98xf32, #tpu.memory_space<smem>>
      %c90 = arith.constant 90 : index
      %246 = memref.load %arg2[%c90] : memref<98xf32, #tpu.memory_space<smem>>
      %c91 = arith.constant 91 : index
      %247 = memref.load %arg2[%c91] : memref<98xf32, #tpu.memory_space<smem>>
      %c92 = arith.constant 92 : index
      %248 = memref.load %arg2[%c92] : memref<98xf32, #tpu.memory_space<smem>>
      %c93 = arith.constant 93 : index
      %249 = memref.load %arg2[%c93] : memref<98xf32, #tpu.memory_space<smem>>
      %c94 = arith.constant 94 : index
      %250 = memref.load %arg2[%c94] : memref<98xf32, #tpu.memory_space<smem>>
      %c95 = arith.constant 95 : index
      %251 = memref.load %arg2[%c95] : memref<98xf32, #tpu.memory_space<smem>>
      %c96 = arith.constant 96 : index
      %252 = memref.load %arg2[%c96] : memref<98xf32, #tpu.memory_space<smem>>
      %c97 = arith.constant 97 : index
      %253 = memref.load %arg2[%c97] : memref<98xf32, #tpu.memory_space<smem>>
      %254 = vector.extract_strided_slice %153 {offsets = [0, 0], sizes = [22, 16], strides = [1, 1]} : vector<22x22xf32> to vector<22x16xf32>
      %255 = vector.extract_strided_slice %153 {offsets = [0, 1], sizes = [22, 16], strides = [1, 1]} : vector<22x22xf32> to vector<22x16xf32>
      %256 = vector.extract_strided_slice %153 {offsets = [0, 2], sizes = [22, 16], strides = [1, 1]} : vector<22x22xf32> to vector<22x16xf32>
      %257 = vector.extract_strided_slice %153 {offsets = [0, 3], sizes = [22, 16], strides = [1, 1]} : vector<22x22xf32> to vector<22x16xf32>
      %258 = vector.extract_strided_slice %153 {offsets = [0, 4], sizes = [22, 16], strides = [1, 1]} : vector<22x22xf32> to vector<22x16xf32>
      %259 = vector.extract_strided_slice %153 {offsets = [0, 5], sizes = [22, 16], strides = [1, 1]} : vector<22x22xf32> to vector<22x16xf32>
      %260 = vector.extract_strided_slice %153 {offsets = [0, 6], sizes = [22, 16], strides = [1, 1]} : vector<22x22xf32> to vector<22x16xf32>
      %261 = vector.extract_strided_slice %155 {offsets = [0, 0], sizes = [22, 16], strides = [1, 1]} : vector<22x22xf32> to vector<22x16xf32>
      %262 = vector.extract_strided_slice %155 {offsets = [0, 1], sizes = [22, 16], strides = [1, 1]} : vector<22x22xf32> to vector<22x16xf32>
      %263 = vector.extract_strided_slice %155 {offsets = [0, 2], sizes = [22, 16], strides = [1, 1]} : vector<22x22xf32> to vector<22x16xf32>
      %264 = vector.extract_strided_slice %155 {offsets = [0, 3], sizes = [22, 16], strides = [1, 1]} : vector<22x22xf32> to vector<22x16xf32>
      %265 = vector.extract_strided_slice %155 {offsets = [0, 4], sizes = [22, 16], strides = [1, 1]} : vector<22x22xf32> to vector<22x16xf32>
      %266 = vector.extract_strided_slice %155 {offsets = [0, 5], sizes = [22, 16], strides = [1, 1]} : vector<22x22xf32> to vector<22x16xf32>
      %267 = vector.extract_strided_slice %155 {offsets = [0, 6], sizes = [22, 16], strides = [1, 1]} : vector<22x22xf32> to vector<22x16xf32>
      %cst_126 = arith.constant 0.000000e+00 : f32
      %268 = vector.broadcast %cst_126 : f32 to vector<16x16xf32>
      %269 = vector.extract_strided_slice %254 {offsets = [0, 0], sizes = [16, 16], strides = [1, 1]} : vector<22x16xf32> to vector<16x16xf32>
      %270 = vector.broadcast %156 : f32 to vector<16x16xf32>
      %271 = arith.mulf %270, %269 : vector<16x16xf32>
      %272 = arith.addf %268, %271 : vector<16x16xf32>
      %273 = vector.extract_strided_slice %261 {offsets = [0, 0], sizes = [16, 16], strides = [1, 1]} : vector<22x16xf32> to vector<16x16xf32>
      %274 = vector.broadcast %205 : f32 to vector<16x16xf32>
      %275 = arith.mulf %274, %273 : vector<16x16xf32>
      %276 = arith.addf %272, %275 : vector<16x16xf32>
      %277 = vector.extract_strided_slice %255 {offsets = [0, 0], sizes = [16, 16], strides = [1, 1]} : vector<22x16xf32> to vector<16x16xf32>
      %278 = vector.broadcast %157 : f32 to vector<16x16xf32>
      %279 = arith.mulf %278, %277 : vector<16x16xf32>
      %280 = arith.addf %276, %279 : vector<16x16xf32>
      %281 = vector.extract_strided_slice %262 {offsets = [0, 0], sizes = [16, 16], strides = [1, 1]} : vector<22x16xf32> to vector<16x16xf32>
      %282 = vector.broadcast %206 : f32 to vector<16x16xf32>
      %283 = arith.mulf %282, %281 : vector<16x16xf32>
      %284 = arith.addf %280, %283 : vector<16x16xf32>
      %285 = vector.extract_strided_slice %256 {offsets = [0, 0], sizes = [16, 16], strides = [1, 1]} : vector<22x16xf32> to vector<16x16xf32>
      %286 = vector.broadcast %158 : f32 to vector<16x16xf32>
      %287 = arith.mulf %286, %285 : vector<16x16xf32>
      %288 = arith.addf %284, %287 : vector<16x16xf32>
      %289 = vector.extract_strided_slice %263 {offsets = [0, 0], sizes = [16, 16], strides = [1, 1]} : vector<22x16xf32> to vector<16x16xf32>
      %290 = vector.broadcast %207 : f32 to vector<16x16xf32>
      %291 = arith.mulf %290, %289 : vector<16x16xf32>
      %292 = arith.addf %288, %291 : vector<16x16xf32>
      %293 = vector.extract_strided_slice %257 {offsets = [0, 0], sizes = [16, 16], strides = [1, 1]} : vector<22x16xf32> to vector<16x16xf32>
      %294 = vector.broadcast %159 : f32 to vector<16x16xf32>
      %295 = arith.mulf %294, %293 : vector<16x16xf32>
      %296 = arith.addf %292, %295 : vector<16x16xf32>
      %297 = vector.extract_strided_slice %264 {offsets = [0, 0], sizes = [16, 16], strides = [1, 1]} : vector<22x16xf32> to vector<16x16xf32>
      %298 = vector.broadcast %208 : f32 to vector<16x16xf32>
      %299 = arith.mulf %298, %297 : vector<16x16xf32>
      %300 = arith.addf %296, %299 : vector<16x16xf32>
      %301 = vector.extract_strided_slice %258 {offsets = [0, 0], sizes = [16, 16], strides = [1, 1]} : vector<22x16xf32> to vector<16x16xf32>
      %302 = vector.broadcast %160 : f32 to vector<16x16xf32>
      %303 = arith.mulf %302, %301 : vector<16x16xf32>
      %304 = arith.addf %300, %303 : vector<16x16xf32>
      %305 = vector.extract_strided_slice %265 {offsets = [0, 0], sizes = [16, 16], strides = [1, 1]} : vector<22x16xf32> to vector<16x16xf32>
      %306 = vector.broadcast %209 : f32 to vector<16x16xf32>
      %307 = arith.mulf %306, %305 : vector<16x16xf32>
      %308 = arith.addf %304, %307 : vector<16x16xf32>
      %309 = vector.extract_strided_slice %259 {offsets = [0, 0], sizes = [16, 16], strides = [1, 1]} : vector<22x16xf32> to vector<16x16xf32>
      %310 = vector.broadcast %161 : f32 to vector<16x16xf32>
      %311 = arith.mulf %310, %309 : vector<16x16xf32>
      %312 = arith.addf %308, %311 : vector<16x16xf32>
      %313 = vector.extract_strided_slice %266 {offsets = [0, 0], sizes = [16, 16], strides = [1, 1]} : vector<22x16xf32> to vector<16x16xf32>
      %314 = vector.broadcast %210 : f32 to vector<16x16xf32>
      %315 = arith.mulf %314, %313 : vector<16x16xf32>
      %316 = arith.addf %312, %315 : vector<16x16xf32>
      %317 = vector.extract_strided_slice %260 {offsets = [0, 0], sizes = [16, 16], strides = [1, 1]} : vector<22x16xf32> to vector<16x16xf32>
      %318 = vector.broadcast %162 : f32 to vector<16x16xf32>
      %319 = arith.mulf %318, %317 : vector<16x16xf32>
      %320 = arith.addf %316, %319 : vector<16x16xf32>
      %321 = vector.extract_strided_slice %267 {offsets = [0, 0], sizes = [16, 16], strides = [1, 1]} : vector<22x16xf32> to vector<16x16xf32>
      %322 = vector.broadcast %211 : f32 to vector<16x16xf32>
      %323 = arith.mulf %322, %321 : vector<16x16xf32>
      %324 = arith.addf %320, %323 : vector<16x16xf32>
      %325 = vector.extract_strided_slice %254 {offsets = [1, 0], sizes = [16, 16], strides = [1, 1]} : vector<22x16xf32> to vector<16x16xf32>
      %326 = vector.broadcast %163 : f32 to vector<16x16xf32>
      %327 = arith.mulf %326, %325 : vector<16x16xf32>
      %328 = arith.addf %324, %327 : vector<16x16xf32>
      %329 = vector.extract_strided_slice %261 {offsets = [1, 0], sizes = [16, 16], strides = [1, 1]} : vector<22x16xf32> to vector<16x16xf32>
      %330 = vector.broadcast %212 : f32 to vector<16x16xf32>
      %331 = arith.mulf %330, %329 : vector<16x16xf32>
      %332 = arith.addf %328, %331 : vector<16x16xf32>
      %333 = vector.extract_strided_slice %255 {offsets = [1, 0], sizes = [16, 16], strides = [1, 1]} : vector<22x16xf32> to vector<16x16xf32>
      %334 = vector.broadcast %164 : f32 to vector<16x16xf32>
      %335 = arith.mulf %334, %333 : vector<16x16xf32>
      %336 = arith.addf %332, %335 : vector<16x16xf32>
      %337 = vector.extract_strided_slice %262 {offsets = [1, 0], sizes = [16, 16], strides = [1, 1]} : vector<22x16xf32> to vector<16x16xf32>
      %338 = vector.broadcast %213 : f32 to vector<16x16xf32>
      %339 = arith.mulf %338, %337 : vector<16x16xf32>
      %340 = arith.addf %336, %339 : vector<16x16xf32>
      %341 = vector.extract_strided_slice %256 {offsets = [1, 0], sizes = [16, 16], strides = [1, 1]} : vector<22x16xf32> to vector<16x16xf32>
      %342 = vector.broadcast %165 : f32 to vector<16x16xf32>
      %343 = arith.mulf %342, %341 : vector<16x16xf32>
      %344 = arith.addf %340, %343 : vector<16x16xf32>
      %345 = vector.extract_strided_slice %263 {offsets = [1, 0], sizes = [16, 16], strides = [1, 1]} : vector<22x16xf32> to vector<16x16xf32>
      %346 = vector.broadcast %214 : f32 to vector<16x16xf32>
      %347 = arith.mulf %346, %345 : vector<16x16xf32>
      %348 = arith.addf %344, %347 : vector<16x16xf32>
      %349 = vector.extract_strided_slice %257 {offsets = [1, 0], sizes = [16, 16], strides = [1, 1]} : vector<22x16xf32> to vector<16x16xf32>
      %350 = vector.broadcast %166 : f32 to vector<16x16xf32>
      %351 = arith.mulf %350, %349 : vector<16x16xf32>
      %352 = arith.addf %348, %351 : vector<16x16xf32>
      %353 = vector.extract_strided_slice %264 {offsets = [1, 0], sizes = [16, 16], strides = [1, 1]} : vector<22x16xf32> to vector<16x16xf32>
      %354 = vector.broadcast %215 : f32 to vector<16x16xf32>
      %355 = arith.mulf %354, %353 : vector<16x16xf32>
      %356 = arith.addf %352, %355 : vector<16x16xf32>
      %357 = vector.extract_strided_slice %258 {offsets = [1, 0], sizes = [16, 16], strides = [1, 1]} : vector<22x16xf32> to vector<16x16xf32>
      %358 = vector.broadcast %167 : f32 to vector<16x16xf32>
      %359 = arith.mulf %358, %357 : vector<16x16xf32>
      %360 = arith.addf %356, %359 : vector<16x16xf32>
      %361 = vector.extract_strided_slice %265 {offsets = [1, 0], sizes = [16, 16], strides = [1, 1]} : vector<22x16xf32> to vector<16x16xf32>
      %362 = vector.broadcast %216 : f32 to vector<16x16xf32>
      %363 = arith.mulf %362, %361 : vector<16x16xf32>
      %364 = arith.addf %360, %363 : vector<16x16xf32>
      %365 = vector.extract_strided_slice %259 {offsets = [1, 0], sizes = [16, 16], strides = [1, 1]} : vector<22x16xf32> to vector<16x16xf32>
      %366 = vector.broadcast %168 : f32 to vector<16x16xf32>
      %367 = arith.mulf %366, %365 : vector<16x16xf32>
      %368 = arith.addf %364, %367 : vector<16x16xf32>
      %369 = vector.extract_strided_slice %266 {offsets = [1, 0], sizes = [16, 16], strides = [1, 1]} : vector<22x16xf32> to vector<16x16xf32>
      %370 = vector.broadcast %217 : f32 to vector<16x16xf32>
      %371 = arith.mulf %370, %369 : vector<16x16xf32>
      %372 = arith.addf %368, %371 : vector<16x16xf32>
      %373 = vector.extract_strided_slice %260 {offsets = [1, 0], sizes = [16, 16], strides = [1, 1]} : vector<22x16xf32> to vector<16x16xf32>
      %374 = vector.broadcast %169 : f32 to vector<16x16xf32>
      %375 = arith.mulf %374, %373 : vector<16x16xf32>
      %376 = arith.addf %372, %375 : vector<16x16xf32>
      %377 = vector.extract_strided_slice %267 {offsets = [1, 0], sizes = [16, 16], strides = [1, 1]} : vector<22x16xf32> to vector<16x16xf32>
      %378 = vector.broadcast %218 : f32 to vector<16x16xf32>
      %379 = arith.mulf %378, %377 : vector<16x16xf32>
      %380 = arith.addf %376, %379 : vector<16x16xf32>
      %381 = vector.extract_strided_slice %254 {offsets = [2, 0], sizes = [16, 16], strides = [1, 1]} : vector<22x16xf32> to vector<16x16xf32>
      %382 = vector.broadcast %170 : f32 to vector<16x16xf32>
      %383 = arith.mulf %382, %381 : vector<16x16xf32>
      %384 = arith.addf %380, %383 : vector<16x16xf32>
      %385 = vector.extract_strided_slice %261 {offsets = [2, 0], sizes = [16, 16], strides = [1, 1]} : vector<22x16xf32> to vector<16x16xf32>
      %386 = vector.broadcast %219 : f32 to vector<16x16xf32>
      %387 = arith.mulf %386, %385 : vector<16x16xf32>
      %388 = arith.addf %384, %387 : vector<16x16xf32>
      %389 = vector.extract_strided_slice %255 {offsets = [2, 0], sizes = [16, 16], strides = [1, 1]} : vector<22x16xf32> to vector<16x16xf32>
      %390 = vector.broadcast %171 : f32 to vector<16x16xf32>
      %391 = arith.mulf %390, %389 : vector<16x16xf32>
      %392 = arith.addf %388, %391 : vector<16x16xf32>
      %393 = vector.extract_strided_slice %262 {offsets = [2, 0], sizes = [16, 16], strides = [1, 1]} : vector<22x16xf32> to vector<16x16xf32>
      %394 = vector.broadcast %220 : f32 to vector<16x16xf32>
      %395 = arith.mulf %394, %393 : vector<16x16xf32>
      %396 = arith.addf %392, %395 : vector<16x16xf32>
      %397 = vector.extract_strided_slice %256 {offsets = [2, 0], sizes = [16, 16], strides = [1, 1]} : vector<22x16xf32> to vector<16x16xf32>
      %398 = vector.broadcast %172 : f32 to vector<16x16xf32>
      %399 = arith.mulf %398, %397 : vector<16x16xf32>
      %400 = arith.addf %396, %399 : vector<16x16xf32>
      %401 = vector.extract_strided_slice %263 {offsets = [2, 0], sizes = [16, 16], strides = [1, 1]} : vector<22x16xf32> to vector<16x16xf32>
      %402 = vector.broadcast %221 : f32 to vector<16x16xf32>
      %403 = arith.mulf %402, %401 : vector<16x16xf32>
      %404 = arith.addf %400, %403 : vector<16x16xf32>
      %405 = vector.extract_strided_slice %257 {offsets = [2, 0], sizes = [16, 16], strides = [1, 1]} : vector<22x16xf32> to vector<16x16xf32>
      %406 = vector.broadcast %173 : f32 to vector<16x16xf32>
      %407 = arith.mulf %406, %405 : vector<16x16xf32>
      %408 = arith.addf %404, %407 : vector<16x16xf32>
      %409 = vector.extract_strided_slice %264 {offsets = [2, 0], sizes = [16, 16], strides = [1, 1]} : vector<22x16xf32> to vector<16x16xf32>
      %410 = vector.broadcast %222 : f32 to vector<16x16xf32>
      %411 = arith.mulf %410, %409 : vector<16x16xf32>
      %412 = arith.addf %408, %411 : vector<16x16xf32>
      %413 = vector.extract_strided_slice %258 {offsets = [2, 0], sizes = [16, 16], strides = [1, 1]} : vector<22x16xf32> to vector<16x16xf32>
      %414 = vector.broadcast %174 : f32 to vector<16x16xf32>
      %415 = arith.mulf %414, %413 : vector<16x16xf32>
      %416 = arith.addf %412, %415 : vector<16x16xf32>
      %417 = vector.extract_strided_slice %265 {offsets = [2, 0], sizes = [16, 16], strides = [1, 1]} : vector<22x16xf32> to vector<16x16xf32>
      %418 = vector.broadcast %223 : f32 to vector<16x16xf32>
      %419 = arith.mulf %418, %417 : vector<16x16xf32>
      %420 = arith.addf %416, %419 : vector<16x16xf32>
      %421 = vector.extract_strided_slice %259 {offsets = [2, 0], sizes = [16, 16], strides = [1, 1]} : vector<22x16xf32> to vector<16x16xf32>
      %422 = vector.broadcast %175 : f32 to vector<16x16xf32>
      %423 = arith.mulf %422, %421 : vector<16x16xf32>
      %424 = arith.addf %420, %423 : vector<16x16xf32>
      %425 = vector.extract_strided_slice %266 {offsets = [2, 0], sizes = [16, 16], strides = [1, 1]} : vector<22x16xf32> to vector<16x16xf32>
      %426 = vector.broadcast %224 : f32 to vector<16x16xf32>
      %427 = arith.mulf %426, %425 : vector<16x16xf32>
      %428 = arith.addf %424, %427 : vector<16x16xf32>
      %429 = vector.extract_strided_slice %260 {offsets = [2, 0], sizes = [16, 16], strides = [1, 1]} : vector<22x16xf32> to vector<16x16xf32>
      %430 = vector.broadcast %176 : f32 to vector<16x16xf32>
      %431 = arith.mulf %430, %429 : vector<16x16xf32>
      %432 = arith.addf %428, %431 : vector<16x16xf32>
      %433 = vector.extract_strided_slice %267 {offsets = [2, 0], sizes = [16, 16], strides = [1, 1]} : vector<22x16xf32> to vector<16x16xf32>
      %434 = vector.broadcast %225 : f32 to vector<16x16xf32>
      %435 = arith.mulf %434, %433 : vector<16x16xf32>
      %436 = arith.addf %432, %435 : vector<16x16xf32>
      %437 = vector.extract_strided_slice %254 {offsets = [3, 0], sizes = [16, 16], strides = [1, 1]} : vector<22x16xf32> to vector<16x16xf32>
      %438 = vector.broadcast %177 : f32 to vector<16x16xf32>
      %439 = arith.mulf %438, %437 : vector<16x16xf32>
      %440 = arith.addf %436, %439 : vector<16x16xf32>
      %441 = vector.extract_strided_slice %261 {offsets = [3, 0], sizes = [16, 16], strides = [1, 1]} : vector<22x16xf32> to vector<16x16xf32>
      %442 = vector.broadcast %226 : f32 to vector<16x16xf32>
      %443 = arith.mulf %442, %441 : vector<16x16xf32>
      %444 = arith.addf %440, %443 : vector<16x16xf32>
      %445 = vector.extract_strided_slice %255 {offsets = [3, 0], sizes = [16, 16], strides = [1, 1]} : vector<22x16xf32> to vector<16x16xf32>
      %446 = vector.broadcast %178 : f32 to vector<16x16xf32>
      %447 = arith.mulf %446, %445 : vector<16x16xf32>
      %448 = arith.addf %444, %447 : vector<16x16xf32>
      %449 = vector.extract_strided_slice %262 {offsets = [3, 0], sizes = [16, 16], strides = [1, 1]} : vector<22x16xf32> to vector<16x16xf32>
      %450 = vector.broadcast %227 : f32 to vector<16x16xf32>
      %451 = arith.mulf %450, %449 : vector<16x16xf32>
      %452 = arith.addf %448, %451 : vector<16x16xf32>
      %453 = vector.extract_strided_slice %256 {offsets = [3, 0], sizes = [16, 16], strides = [1, 1]} : vector<22x16xf32> to vector<16x16xf32>
      %454 = vector.broadcast %179 : f32 to vector<16x16xf32>
      %455 = arith.mulf %454, %453 : vector<16x16xf32>
      %456 = arith.addf %452, %455 : vector<16x16xf32>
      %457 = vector.extract_strided_slice %263 {offsets = [3, 0], sizes = [16, 16], strides = [1, 1]} : vector<22x16xf32> to vector<16x16xf32>
      %458 = vector.broadcast %228 : f32 to vector<16x16xf32>
      %459 = arith.mulf %458, %457 : vector<16x16xf32>
      %460 = arith.addf %456, %459 : vector<16x16xf32>
      %461 = vector.extract_strided_slice %257 {offsets = [3, 0], sizes = [16, 16], strides = [1, 1]} : vector<22x16xf32> to vector<16x16xf32>
      %462 = vector.broadcast %180 : f32 to vector<16x16xf32>
      %463 = arith.mulf %462, %461 : vector<16x16xf32>
      %464 = arith.addf %460, %463 : vector<16x16xf32>
      %465 = vector.extract_strided_slice %264 {offsets = [3, 0], sizes = [16, 16], strides = [1, 1]} : vector<22x16xf32> to vector<16x16xf32>
      %466 = vector.broadcast %229 : f32 to vector<16x16xf32>
      %467 = arith.mulf %466, %465 : vector<16x16xf32>
      %468 = arith.addf %464, %467 : vector<16x16xf32>
      %469 = vector.extract_strided_slice %258 {offsets = [3, 0], sizes = [16, 16], strides = [1, 1]} : vector<22x16xf32> to vector<16x16xf32>
      %470 = vector.broadcast %181 : f32 to vector<16x16xf32>
      %471 = arith.mulf %470, %469 : vector<16x16xf32>
      %472 = arith.addf %468, %471 : vector<16x16xf32>
      %473 = vector.extract_strided_slice %265 {offsets = [3, 0], sizes = [16, 16], strides = [1, 1]} : vector<22x16xf32> to vector<16x16xf32>
      %474 = vector.broadcast %230 : f32 to vector<16x16xf32>
      %475 = arith.mulf %474, %473 : vector<16x16xf32>
      %476 = arith.addf %472, %475 : vector<16x16xf32>
      %477 = vector.extract_strided_slice %259 {offsets = [3, 0], sizes = [16, 16], strides = [1, 1]} : vector<22x16xf32> to vector<16x16xf32>
      %478 = vector.broadcast %182 : f32 to vector<16x16xf32>
      %479 = arith.mulf %478, %477 : vector<16x16xf32>
      %480 = arith.addf %476, %479 : vector<16x16xf32>
      %481 = vector.extract_strided_slice %266 {offsets = [3, 0], sizes = [16, 16], strides = [1, 1]} : vector<22x16xf32> to vector<16x16xf32>
      %482 = vector.broadcast %231 : f32 to vector<16x16xf32>
      %483 = arith.mulf %482, %481 : vector<16x16xf32>
      %484 = arith.addf %480, %483 : vector<16x16xf32>
      %485 = vector.extract_strided_slice %260 {offsets = [3, 0], sizes = [16, 16], strides = [1, 1]} : vector<22x16xf32> to vector<16x16xf32>
      %486 = vector.broadcast %183 : f32 to vector<16x16xf32>
      %487 = arith.mulf %486, %485 : vector<16x16xf32>
      %488 = arith.addf %484, %487 : vector<16x16xf32>
      %489 = vector.extract_strided_slice %267 {offsets = [3, 0], sizes = [16, 16], strides = [1, 1]} : vector<22x16xf32> to vector<16x16xf32>
      %490 = vector.broadcast %232 : f32 to vector<16x16xf32>
      %491 = arith.mulf %490, %489 : vector<16x16xf32>
      %492 = arith.addf %488, %491 : vector<16x16xf32>
      %493 = vector.extract_strided_slice %254 {offsets = [4, 0], sizes = [16, 16], strides = [1, 1]} : vector<22x16xf32> to vector<16x16xf32>
      %494 = vector.broadcast %184 : f32 to vector<16x16xf32>
      %495 = arith.mulf %494, %493 : vector<16x16xf32>
      %496 = arith.addf %492, %495 : vector<16x16xf32>
      %497 = vector.extract_strided_slice %261 {offsets = [4, 0], sizes = [16, 16], strides = [1, 1]} : vector<22x16xf32> to vector<16x16xf32>
      %498 = vector.broadcast %233 : f32 to vector<16x16xf32>
      %499 = arith.mulf %498, %497 : vector<16x16xf32>
      %500 = arith.addf %496, %499 : vector<16x16xf32>
      %501 = vector.extract_strided_slice %255 {offsets = [4, 0], sizes = [16, 16], strides = [1, 1]} : vector<22x16xf32> to vector<16x16xf32>
      %502 = vector.broadcast %185 : f32 to vector<16x16xf32>
      %503 = arith.mulf %502, %501 : vector<16x16xf32>
      %504 = arith.addf %500, %503 : vector<16x16xf32>
      %505 = vector.extract_strided_slice %262 {offsets = [4, 0], sizes = [16, 16], strides = [1, 1]} : vector<22x16xf32> to vector<16x16xf32>
      %506 = vector.broadcast %234 : f32 to vector<16x16xf32>
      %507 = arith.mulf %506, %505 : vector<16x16xf32>
      %508 = arith.addf %504, %507 : vector<16x16xf32>
      %509 = vector.extract_strided_slice %256 {offsets = [4, 0], sizes = [16, 16], strides = [1, 1]} : vector<22x16xf32> to vector<16x16xf32>
      %510 = vector.broadcast %186 : f32 to vector<16x16xf32>
      %511 = arith.mulf %510, %509 : vector<16x16xf32>
      %512 = arith.addf %508, %511 : vector<16x16xf32>
      %513 = vector.extract_strided_slice %263 {offsets = [4, 0], sizes = [16, 16], strides = [1, 1]} : vector<22x16xf32> to vector<16x16xf32>
      %514 = vector.broadcast %235 : f32 to vector<16x16xf32>
      %515 = arith.mulf %514, %513 : vector<16x16xf32>
      %516 = arith.addf %512, %515 : vector<16x16xf32>
      %517 = vector.extract_strided_slice %257 {offsets = [4, 0], sizes = [16, 16], strides = [1, 1]} : vector<22x16xf32> to vector<16x16xf32>
      %518 = vector.broadcast %187 : f32 to vector<16x16xf32>
      %519 = arith.mulf %518, %517 : vector<16x16xf32>
      %520 = arith.addf %516, %519 : vector<16x16xf32>
      %521 = vector.extract_strided_slice %264 {offsets = [4, 0], sizes = [16, 16], strides = [1, 1]} : vector<22x16xf32> to vector<16x16xf32>
      %522 = vector.broadcast %236 : f32 to vector<16x16xf32>
      %523 = arith.mulf %522, %521 : vector<16x16xf32>
      %524 = arith.addf %520, %523 : vector<16x16xf32>
      %525 = vector.extract_strided_slice %258 {offsets = [4, 0], sizes = [16, 16], strides = [1, 1]} : vector<22x16xf32> to vector<16x16xf32>
      %526 = vector.broadcast %188 : f32 to vector<16x16xf32>
      %527 = arith.mulf %526, %525 : vector<16x16xf32>
      %528 = arith.addf %524, %527 : vector<16x16xf32>
      %529 = vector.extract_strided_slice %265 {offsets = [4, 0], sizes = [16, 16], strides = [1, 1]} : vector<22x16xf32> to vector<16x16xf32>
      %530 = vector.broadcast %237 : f32 to vector<16x16xf32>
      %531 = arith.mulf %530, %529 : vector<16x16xf32>
      %532 = arith.addf %528, %531 : vector<16x16xf32>
      %533 = vector.extract_strided_slice %259 {offsets = [4, 0], sizes = [16, 16], strides = [1, 1]} : vector<22x16xf32> to vector<16x16xf32>
      %534 = vector.broadcast %189 : f32 to vector<16x16xf32>
      %535 = arith.mulf %534, %533 : vector<16x16xf32>
      %536 = arith.addf %532, %535 : vector<16x16xf32>
      %537 = vector.extract_strided_slice %266 {offsets = [4, 0], sizes = [16, 16], strides = [1, 1]} : vector<22x16xf32> to vector<16x16xf32>
      %538 = vector.broadcast %238 : f32 to vector<16x16xf32>
      %539 = arith.mulf %538, %537 : vector<16x16xf32>
      %540 = arith.addf %536, %539 : vector<16x16xf32>
      %541 = vector.extract_strided_slice %260 {offsets = [4, 0], sizes = [16, 16], strides = [1, 1]} : vector<22x16xf32> to vector<16x16xf32>
      %542 = vector.broadcast %190 : f32 to vector<16x16xf32>
      %543 = arith.mulf %542, %541 : vector<16x16xf32>
      %544 = arith.addf %540, %543 : vector<16x16xf32>
      %545 = vector.extract_strided_slice %267 {offsets = [4, 0], sizes = [16, 16], strides = [1, 1]} : vector<22x16xf32> to vector<16x16xf32>
      %546 = vector.broadcast %239 : f32 to vector<16x16xf32>
      %547 = arith.mulf %546, %545 : vector<16x16xf32>
      %548 = arith.addf %544, %547 : vector<16x16xf32>
      %549 = vector.extract_strided_slice %254 {offsets = [5, 0], sizes = [16, 16], strides = [1, 1]} : vector<22x16xf32> to vector<16x16xf32>
      %550 = vector.broadcast %191 : f32 to vector<16x16xf32>
      %551 = arith.mulf %550, %549 : vector<16x16xf32>
      %552 = arith.addf %548, %551 : vector<16x16xf32>
      %553 = vector.extract_strided_slice %261 {offsets = [5, 0], sizes = [16, 16], strides = [1, 1]} : vector<22x16xf32> to vector<16x16xf32>
      %554 = vector.broadcast %240 : f32 to vector<16x16xf32>
      %555 = arith.mulf %554, %553 : vector<16x16xf32>
      %556 = arith.addf %552, %555 : vector<16x16xf32>
      %557 = vector.extract_strided_slice %255 {offsets = [5, 0], sizes = [16, 16], strides = [1, 1]} : vector<22x16xf32> to vector<16x16xf32>
      %558 = vector.broadcast %192 : f32 to vector<16x16xf32>
      %559 = arith.mulf %558, %557 : vector<16x16xf32>
      %560 = arith.addf %556, %559 : vector<16x16xf32>
      %561 = vector.extract_strided_slice %262 {offsets = [5, 0], sizes = [16, 16], strides = [1, 1]} : vector<22x16xf32> to vector<16x16xf32>
      %562 = vector.broadcast %241 : f32 to vector<16x16xf32>
      %563 = arith.mulf %562, %561 : vector<16x16xf32>
      %564 = arith.addf %560, %563 : vector<16x16xf32>
      %565 = vector.extract_strided_slice %256 {offsets = [5, 0], sizes = [16, 16], strides = [1, 1]} : vector<22x16xf32> to vector<16x16xf32>
      %566 = vector.broadcast %193 : f32 to vector<16x16xf32>
      %567 = arith.mulf %566, %565 : vector<16x16xf32>
      %568 = arith.addf %564, %567 : vector<16x16xf32>
      %569 = vector.extract_strided_slice %263 {offsets = [5, 0], sizes = [16, 16], strides = [1, 1]} : vector<22x16xf32> to vector<16x16xf32>
      %570 = vector.broadcast %242 : f32 to vector<16x16xf32>
      %571 = arith.mulf %570, %569 : vector<16x16xf32>
      %572 = arith.addf %568, %571 : vector<16x16xf32>
      %573 = vector.extract_strided_slice %257 {offsets = [5, 0], sizes = [16, 16], strides = [1, 1]} : vector<22x16xf32> to vector<16x16xf32>
      %574 = vector.broadcast %194 : f32 to vector<16x16xf32>
      %575 = arith.mulf %574, %573 : vector<16x16xf32>
      %576 = arith.addf %572, %575 : vector<16x16xf32>
      %577 = vector.extract_strided_slice %264 {offsets = [5, 0], sizes = [16, 16], strides = [1, 1]} : vector<22x16xf32> to vector<16x16xf32>
      %578 = vector.broadcast %243 : f32 to vector<16x16xf32>
      %579 = arith.mulf %578, %577 : vector<16x16xf32>
      %580 = arith.addf %576, %579 : vector<16x16xf32>
      %581 = vector.extract_strided_slice %258 {offsets = [5, 0], sizes = [16, 16], strides = [1, 1]} : vector<22x16xf32> to vector<16x16xf32>
      %582 = vector.broadcast %195 : f32 to vector<16x16xf32>
      %583 = arith.mulf %582, %581 : vector<16x16xf32>
      %584 = arith.addf %580, %583 : vector<16x16xf32>
      %585 = vector.extract_strided_slice %265 {offsets = [5, 0], sizes = [16, 16], strides = [1, 1]} : vector<22x16xf32> to vector<16x16xf32>
      %586 = vector.broadcast %244 : f32 to vector<16x16xf32>
      %587 = arith.mulf %586, %585 : vector<16x16xf32>
      %588 = arith.addf %584, %587 : vector<16x16xf32>
      %589 = vector.extract_strided_slice %259 {offsets = [5, 0], sizes = [16, 16], strides = [1, 1]} : vector<22x16xf32> to vector<16x16xf32>
      %590 = vector.broadcast %196 : f32 to vector<16x16xf32>
      %591 = arith.mulf %590, %589 : vector<16x16xf32>
      %592 = arith.addf %588, %591 : vector<16x16xf32>
      %593 = vector.extract_strided_slice %266 {offsets = [5, 0], sizes = [16, 16], strides = [1, 1]} : vector<22x16xf32> to vector<16x16xf32>
      %594 = vector.broadcast %245 : f32 to vector<16x16xf32>
      %595 = arith.mulf %594, %593 : vector<16x16xf32>
      %596 = arith.addf %592, %595 : vector<16x16xf32>
      %597 = vector.extract_strided_slice %260 {offsets = [5, 0], sizes = [16, 16], strides = [1, 1]} : vector<22x16xf32> to vector<16x16xf32>
      %598 = vector.broadcast %197 : f32 to vector<16x16xf32>
      %599 = arith.mulf %598, %597 : vector<16x16xf32>
      %600 = arith.addf %596, %599 : vector<16x16xf32>
      %601 = vector.extract_strided_slice %267 {offsets = [5, 0], sizes = [16, 16], strides = [1, 1]} : vector<22x16xf32> to vector<16x16xf32>
      %602 = vector.broadcast %246 : f32 to vector<16x16xf32>
      %603 = arith.mulf %602, %601 : vector<16x16xf32>
      %604 = arith.addf %600, %603 : vector<16x16xf32>
      %605 = vector.extract_strided_slice %254 {offsets = [6, 0], sizes = [16, 16], strides = [1, 1]} : vector<22x16xf32> to vector<16x16xf32>
      %606 = vector.broadcast %198 : f32 to vector<16x16xf32>
      %607 = arith.mulf %606, %605 : vector<16x16xf32>
      %608 = arith.addf %604, %607 : vector<16x16xf32>
      %609 = vector.extract_strided_slice %261 {offsets = [6, 0], sizes = [16, 16], strides = [1, 1]} : vector<22x16xf32> to vector<16x16xf32>
      %610 = vector.broadcast %247 : f32 to vector<16x16xf32>
      %611 = arith.mulf %610, %609 : vector<16x16xf32>
      %612 = arith.addf %608, %611 : vector<16x16xf32>
      %613 = vector.extract_strided_slice %255 {offsets = [6, 0], sizes = [16, 16], strides = [1, 1]} : vector<22x16xf32> to vector<16x16xf32>
      %614 = vector.broadcast %199 : f32 to vector<16x16xf32>
      %615 = arith.mulf %614, %613 : vector<16x16xf32>
      %616 = arith.addf %612, %615 : vector<16x16xf32>
      %617 = vector.extract_strided_slice %262 {offsets = [6, 0], sizes = [16, 16], strides = [1, 1]} : vector<22x16xf32> to vector<16x16xf32>
      %618 = vector.broadcast %248 : f32 to vector<16x16xf32>
      %619 = arith.mulf %618, %617 : vector<16x16xf32>
      %620 = arith.addf %616, %619 : vector<16x16xf32>
      %621 = vector.extract_strided_slice %256 {offsets = [6, 0], sizes = [16, 16], strides = [1, 1]} : vector<22x16xf32> to vector<16x16xf32>
      %622 = vector.broadcast %200 : f32 to vector<16x16xf32>
      %623 = arith.mulf %622, %621 : vector<16x16xf32>
      %624 = arith.addf %620, %623 : vector<16x16xf32>
      %625 = vector.extract_strided_slice %263 {offsets = [6, 0], sizes = [16, 16], strides = [1, 1]} : vector<22x16xf32> to vector<16x16xf32>
      %626 = vector.broadcast %249 : f32 to vector<16x16xf32>
      %627 = arith.mulf %626, %625 : vector<16x16xf32>
      %628 = arith.addf %624, %627 : vector<16x16xf32>
      %629 = vector.extract_strided_slice %257 {offsets = [6, 0], sizes = [16, 16], strides = [1, 1]} : vector<22x16xf32> to vector<16x16xf32>
      %630 = vector.broadcast %201 : f32 to vector<16x16xf32>
      %631 = arith.mulf %630, %629 : vector<16x16xf32>
      %632 = arith.addf %628, %631 : vector<16x16xf32>
      %633 = vector.extract_strided_slice %264 {offsets = [6, 0], sizes = [16, 16], strides = [1, 1]} : vector<22x16xf32> to vector<16x16xf32>
      %634 = vector.broadcast %250 : f32 to vector<16x16xf32>
      %635 = arith.mulf %634, %633 : vector<16x16xf32>
      %636 = arith.addf %632, %635 : vector<16x16xf32>
      %637 = vector.extract_strided_slice %258 {offsets = [6, 0], sizes = [16, 16], strides = [1, 1]} : vector<22x16xf32> to vector<16x16xf32>
      %638 = vector.broadcast %202 : f32 to vector<16x16xf32>
      %639 = arith.mulf %638, %637 : vector<16x16xf32>
      %640 = arith.addf %636, %639 : vector<16x16xf32>
      %641 = vector.extract_strided_slice %265 {offsets = [6, 0], sizes = [16, 16], strides = [1, 1]} : vector<22x16xf32> to vector<16x16xf32>
      %642 = vector.broadcast %251 : f32 to vector<16x16xf32>
      %643 = arith.mulf %642, %641 : vector<16x16xf32>
      %644 = arith.addf %640, %643 : vector<16x16xf32>
      %645 = vector.extract_strided_slice %259 {offsets = [6, 0], sizes = [16, 16], strides = [1, 1]} : vector<22x16xf32> to vector<16x16xf32>
      %646 = vector.broadcast %203 : f32 to vector<16x16xf32>
      %647 = arith.mulf %646, %645 : vector<16x16xf32>
      %648 = arith.addf %644, %647 : vector<16x16xf32>
      %649 = vector.extract_strided_slice %266 {offsets = [6, 0], sizes = [16, 16], strides = [1, 1]} : vector<22x16xf32> to vector<16x16xf32>
      %650 = vector.broadcast %252 : f32 to vector<16x16xf32>
      %651 = arith.mulf %650, %649 : vector<16x16xf32>
      %652 = arith.addf %648, %651 : vector<16x16xf32>
      %653 = vector.extract_strided_slice %260 {offsets = [6, 0], sizes = [16, 16], strides = [1, 1]} : vector<22x16xf32> to vector<16x16xf32>
      %654 = vector.broadcast %204 : f32 to vector<16x16xf32>
      %655 = arith.mulf %654, %653 : vector<16x16xf32>
      %656 = arith.addf %652, %655 : vector<16x16xf32>
      %657 = vector.extract_strided_slice %267 {offsets = [6, 0], sizes = [16, 16], strides = [1, 1]} : vector<22x16xf32> to vector<16x16xf32>
      %658 = vector.broadcast %253 : f32 to vector<16x16xf32>
      %659 = arith.mulf %658, %657 : vector<16x16xf32>
      %660 = arith.addf %656, %659 : vector<16x16xf32>
      %661 = arith.negf %660 : vector<16x16xf32>
      %662 = math.exp %661 : vector<16x16xf32>
      %cst_127 = arith.constant 1.000000e+00 : f32
      %663 = vector.broadcast %cst_127 : f32 to vector<16x16xf32>
      %664 = arith.addf %663, %662 : vector<16x16xf32>
      %665 = arith.divf %663, %664 : vector<16x16xf32>
      %666 = vector.shape_cast %665 : vector<16x16xf32> to vector<1x1x16x16xf32>
      %c0_128 = arith.constant 0 : index
      %c0_129 = arith.constant 0 : index
      %c0_130 = arith.constant 0 : index
      %c0_131 = arith.constant 0 : index
      %667 = vector.load %arg4[%c0_128, %c0_129, %c0_130, %c0_131] : memref<1x1x16x16xf32, #tpu.memory_space<vmem>>, vector<1x1x16x16xf32>
      tpu.vector_store %arg4[%c0_128, %c0_129, %c0_130, %c0_131], %666 {strides = array<i32>} : memref<1x1x16x16xf32, #tpu.memory_space<vmem>>, vector<1x1x16x16xf32>,
    } else {
    }
    return
  }
  func.func @transform_0(%arg0: i32, %arg1: i32) -> i32 {
    %c0_i32 = arith.constant 0 : i32
    %c0_i32_0 = arith.constant 0 : i32
    return %c0_i32 : i32
  }
  func.func @transform_1(%arg0: i32, %arg1: i32) -> (i32, i32, i32) {
    %c0_i32 = arith.constant 0 : i32
    %c0_i32_0 = arith.constant 0 : i32
    return %arg0, %arg1, %c0_i32 : i32, i32, i32
  }
  func.func @transform_2(%arg0: i32, %arg1: i32) -> (i32, i32, i32, i32) {
    %c0_i32 = arith.constant 0 : i32
    %c0_i32_0 = arith.constant 0 : i32
    %c0_i32_1 = arith.constant 0 : i32
    %c0_i32_2 = arith.constant 0 : i32
    return %arg0, %c0_i32, %c0_i32_0, %c0_i32_1 : i32, i32, i32, i32
  }
}

</mosaic_0001>

<bundles_post_ra>
// kernel: tpu_custom_call.1
= control target key start
LH: loop header
LB: loop body
LE: loop exit
PB: predicated region body
PF: predicated region fallthrough
CT: control target
= control target key end

     0   :  { %s5368_s0 = inlined_call_operand.hbm [shape: f32[98], index: 0, kind: input, shape index: {}]   ;;  %s5369_s1 = inlined_call_operand.hbm [shape: f32[2,4,256], index: 1, kind: input, shape index: {}]   ;;  %s5370_s2 = inlined_call_operand.hbm [shape: f32[2,1,16,16], index: 2, kind: output, shape index: {}]  }
   0x1   :  { %5466 = sst [smem:[#allocation66_spill]] %s5368_s0 }
   0x2   :  { %5467 = sst [smem:[#allocation67_spill]] %s5369_s1 }
   0x3   :  { %5468 = sst [smem:[#allocation68_spill]] %s5370_s2 }
   0x4   :  { %7 = vsyncpa [#allocation8], 0 }
   0x5   :  { %8 = vsyncpa [#allocation6], 0 }
   0x6   :  { %10 = vsyncpa [#allocation6 + $0x1], 0 }
   0x7   :  { %11 = vsyncpa [#allocation7], 0 }
   0x8   :  { %13 = vsyncpa [#allocation7 + $0x1], 0  ;;  %s2976_s9 = smov 0   ;;  %s2978_s10 = smov 0  }
   0x9   :  { %s2980_s11 = smov 0   ;;  %s2982_s12 = smov 0  }
   0xa   :  { %s2984_s13 = smov 0   ;;  %s2986_s14 = smov 0  }
   0xb LB: > { %5469 = sst [smem:[#allocation14_spill]] %s2910_s9  ;;  %s2571_s15 = sadd.s32 4294967295, %s2930_s14   ;;  %s2930_s14 = sphi %s2986_s14, %s19_s14   ;;  %s2926_s13 = sphi %s2984_s13, %s5731_s13   ;;  %s2922_s12 = sphi %s2982_s12, %s5730_s12   ;;  %s2918_s11 = sphi %s2980_s11, %s5729_s11   ;;  %s2914_s10 = sphi %s2978_s10, %s5728_s10   ;;  %s2910_s9 = sphi %s2976_s9, %s5727_s9  }
   0xc   : > { %5470 = sst [smem:[#allocation15_spill]] %s2914_s10  ;;  %s2572_s16 = sadd.s32 4294967294, %s2930_s14  }
   0xd   : > { %5471 = sst [smem:[#allocation16_spill]] %s2918_s11  ;;  %p74_p0 = scmp.ne.s32.totalorder %s2914_s10, %s2910_s9 }
   0xe   : > { %5472 = sst [smem:[#allocation17_spill]] %s2922_s12  ;;  %p3010_p1 = scmp.eq.s32.totalorder %s2571_s15, 0 }
   0xf   : > { %5473 = sst [smem:[#allocation18_spill]] %s2926_s13  ;;  %p3014_p2 = scmp.eq.s32.totalorder %s2571_s15, 1 }
  0x10   : > { %5474 = sst [smem:[#allocation19_spill]] %s2930_s14  ;;  %p104_p3 = scmp.eq.s32.totalorder %s2572_s16, 1 }
  0x11   : > { %p3020_p4 = por %p3010_p1, %p74_p0  ;;  %p2573_p5 = scmp.ge.s32.totalorder %s2930_s14, 1 }
  0x12   : > { %p3025_p6 = por %p104_p3, %p74_p0  ;;  %p111_p7 = scmp.lt.s32.totalorder %s2930_s14, 3 }
  0x13   : > { %s31_s22 = sadd.s32 1, %s2926_s13  ;;  %s61_s23 = sadd.s32 1, %s2918_s11 }
  0x14   : > { %s5478_s20 = scalar_select %p3025_p6, 1, 0 }
  0x15   : > { %p3030_p8 = pnand %p2573_p5, %p111_p7  ;;  %p33_p12 = scmp.ge.s32.totalorder %s31_s22, 2 }
  0x16   : > { %5479 = sst [smem:[#allocation20_spill]] %s5478_s20  ;;  %p68_p13 = scmp.ne.s32.totalorder %s2918_s11, %s2914_s10 }
  0x17   : > { %p2697_p10 = pneg %p3030_p8  ;;  %p69_p0 = scmp.eq.s32.totalorder %s2930_s14, 0 }
  0x18   : > { %s2932_s24 = smov [#allocation5]   ;;  %s5481_s0 = sld [smem:[#allocation66_spill]] }
  0x19   : > { %p2698_p11 = pnand %p2697_p10, %p3010_p1  ;;  %s5733_s22 = smov (%p33_p12, %s31_s22), 0 }
  0x1a   : > { %5482 = sst [smem:[#allocation21_spill]] %s5733_s22  ;;  %p3049_p3 = por %p69_p0, %p68_p13 }
  0x1b   : > { %p3055_p5 = por %p3014_p2, %p68_p13  ;;  %s56_s29 = ssub.s32 %s2926_s13, %s5733_s22 }
  0x1c   : > { %p2710_p7 = scmp.lt.s32.totalorder %s2930_s14, 2  ;;  %p59_p10 = scmp.eq.s32.totalorder %s56_s29, 0 }
  0x1d   : > { %s5484_s28 = scalar_select %p3055_p5, 1, 0 }
  0x1e   : > { %2700 = dma.hbm_to_smem (!%p2698_p11), %s5481_s0, 16, %s2932_s24, [#allocation8]  }
  0x1f   : > { %5485 = sst [smem:[#allocation22_spill]] %s5484_s28  ;;  %s133_s30 = sand.u32 1, %s2918_s11  }
  0x20   : > { %s2576_s3 = sshll.u32 %s133_s30, 3  ;;  %s2687_s5 = sshll.u32 %s2926_s13, 7 }
  0x21   : > { %s3064_s4 = scalar_select %p59_p10, %s2918_s11, %s61_s23  }
  0x22   : > { %s5487_s1 = sld [smem:[#allocation67_spill]]  ;;  %s137_s15 = scalar_lea.vmem [#allocation9], %s2576_s3 }
  0x23   : > { %5486 = sst [smem:[#allocation23_spill]] %s3064_s4  ;;  %s147_s16 = sshll.u32 %s137_s15, 4  ;;  %s148_s16 = int_to_ptr.vmem [resolvable:$true] %s147_s16 }
  0x24   : > { %p3072_p2 = pnand %p2710_p7, %p3049_p3  ;;  %s134_s24 = scalar_lea.sflag [#allocation6], %s133_s30 }
  0x25   : > { %s2831_s25 = scalar_lea.vmem %s148_s16, 128  ;;  %s2933_s23 = smov [#allocation9]  }
  0x26   : > { %p2820_p11 = pneg %p3072_p2  ;;  %p2832_p12 = scmp.ne.s32.totalorder %s148_s16, %s2831_s25 }
  0x27   : > { %s2836_s26 = sshll.u32 %s2933_s23, 4  ;;  %s2837_s26 = int_to_ptr.vmem [resolvable:$false] %s2836_s26 }
  0x28   : > { %s145_s8 = scalar_lea.hbm %s5487_s1, %s2687_s5  ;;  %p2834_p13 = pnand %p2832_p12, %p2820_p11 }
  0x29   : > { %s2838_s29 = scalar_lea.vmem %s2837_s26, 256  ;;  %p2839_p10 = scmp.lt.s32.totalorder %s148_s16, %s2837_s26 }
  0x2a   : > { %p2835_p0 = pneg %p2834_p13  ;;  %p2840_p9 = scmp.lt.s32.totalorder %s2838_s29, %s2831_s25 }
  0x2c   : > { %p2841_p6 = por %p2840_p9, %p2839_p10 }
  0x2e   : > { %p2842_p5 = pnand %p2841_p6, %p2835_p0 }
  0x30   : > { %2845 = shalt.err (!%p2842_p5)
}
  0x31   : > { %2704 = dma.hbm_to_vmem [thread:$0]  (!%p3072_p2), %s145_s8, 128, %s148_s16, %s134_s24  }
  0x32   : > { %156 = sbr.rel (%p3030_p8) target bundleno = 848 (0x350), region = 28 }
  0x37   : > { %2897 = dma.done.wait (%p3010_p1), [#allocation8], 16  }
  0x38   : > { %2899 = vsyncadd (%p3010_p1), [#allocation8], 4294967280  ;;  %s3087_s27 = sand.u32 1, %s2914_s10  }
  0x39   : > { %5489 = sst [smem:[#allocation24_spill]] %s3087_s27  ;;  %s2581_s30 = sshll.u32 %s3087_s27, 3 }
  0x3a   : > { %s163_s3 = scalar_lea.sflag [#allocation6], %s3087_s27  ;;  %s166_s5 = scalar_lea.vmem [#allocation9], %s2581_s30 }
  0x3b   : > { %2901 = dma.done.wait (%p3020_p4), %s163_s3, 128  }
  0x3c   : > { %2903 = vsyncadd (%p3020_p4), %s163_s3, 4294967168 }
  0x3d   : > { %171 = sfence }
  0x3e   : > { %v192_v0 = vlaneseq  ;;  %v198_v1 = vld [vmem:[%s166_s5] sm:$0xff]  ;;  %vm203_vm0 = vcmask 1043456   ;;  %v2934_v7 = vmov -inf   ;;  %v2935_v11 = vmov 0.0   ;;  %s2937_s17 = smov 96   ;;  %s2938_s19 = smov 112  }
  0x3f   : > { %v201_v2 = vcombine.high %v198_v1, %v198_v1  ;;  %v204_v3 = vsel %vm203_vm0, %v198_v1, 0.0  ;;  %v242_v4 = vsel %vm203_vm0, %v198_v1, -inf  ;;  %v2936_v18 = vmov 1966171168   ;;  %s2939_s21 = smov 64   ;;  %s2940_s6 = smov 80  }
  0x40   : > { %vm3097_vm1 = vcmp.lt.s32.totalorder %v192_v0, 256  ;;  %v205_v6 = vrot.slane %v204_v3, 4  ;;  %v243_v9 = vrot.slane %v242_v4, 4  ;;  %v222_v19 = vunpack.c.l.s4 %v2936_v18  ;;  %s2941_s7 = smov 115   ;;  %s2942_s8 = smov 3  }
  0x41   : > { %197 = vst.msk [vmem:[#allocation3] sm:$0x3] %vm3097_vm1, %v2934_v7  ;;  %v211_v8 = vsel %vm203_vm0, %v201_v2, 0.0  ;;  %v249_v10 = vsel %vm203_vm0, %v201_v2, -inf  ;;  %196 = vst.msk [vmem:[#allocation2] sm:$0x3] %vm3097_vm1, %v2935_v11 }
  0x42   : > { %v206_v12 = vadd.f32 %v205_v6, %v204_v3  ;;  %v212_v13 = vrot.slane %v211_v8, 4  ;;  %v250_v14 = vrot.slane %v249_v10, 4  ;;  %v244_v15 = vmax.f32 %v242_v4, %v243_v9  ;;  %s2943_s15 = smov 99   ;;  %s2944_s16 = smov 83  }
  0x43   : > { %v225_v25 = vshrl.u32 %v192_v0, 7  ;;  %v223_v29 = vunpack.c.0.s8 %v222_v19  ;;  %vm280_vm2 = vcmask 179200   ;;  %s2945_s18 = smov 67   ;;  %s2946_s24 = smov 51   ;;  %vm299_vm3 = vcmask 147480  }
  0x44   : > { %v207_v16 = vrot.slane %v206_v12, 2  ;;  %v213_v17 = vadd.f32 %v212_v13, %v211_v8  ;;  %v251_v20 = vmax.f32 %v249_v10, %v250_v14  ;;  %v245_v21 = vrot.slane %v244_v15, 2  ;;  %285 = vst.msk [vmem:[#allocation4 + $0x18] sm:$0xff] %vm280_vm2, %v2935_v11  ;;  %281 = vst.msk [vmem:[#allocation4] sm:$0xff] %vm280_vm2, %v2935_v11  ;;  %s2947_s25 = smov 32   ;;  %s2948_s23 = smov 48  }
  0x45   : > { %v226_v37 = vsub.s32 %v223_v29, %v225_v25  ;;  %282 = vst.msk [vmem:[#allocation4 + $0x8] sm:$0xff] %vm280_vm2, %v2935_v11  ;;  %286 = vst.msk [vmem:[#allocation4 + $0x20] sm:$0xff] %vm280_vm2, %v2935_v11  ;;  %v3116_v50 = vsub.s32 0, %v225_v25  ;;  %s2949_s26 = smov 16   ;;  %s2950_s29 = smov 35   ;;  %vm283_vm4 = vcmask 177152  }
  0x46   : > { %v208_v22 = vadd.f32 %v207_v16, %v206_v12  ;;  %v214_v23 = vrot.slane %v213_v17, 2  ;;  %v252_v24 = vrot.slane %v251_v20, 2  ;;  %v246_v26 = vmax.f32 %v244_v15, %v245_v21  ;;  %s2951_s30 = smov 19   ;;  %284 = vst.msk [vmem:[#allocation4 + $0x10] sm:$0x3f] %vm283_vm4, %v2935_v11  ;;  %s3154_s3 = sld [smem:[#allocation5]] }
  0x47   : > { %287 = vst.msk [vmem:[#allocation4 + $0x28] sm:$0x3f] %vm283_vm4, %v2935_v11  ;;  %s3158_s5 = sld [smem:[#allocation5 + $0x31]]  ;;  %s5495_s0 = smov 122   ;;  %vm816_vm5 = vcmask 1046528   ;;  %vm1089_vm6 = vcmask 1045504  }
  0x48   : > { %v209_v27 = vrot.slane %v208_v22, 1  ;;  %v215_v28 = vadd.f32 %v214_v23, %v213_v17  ;;  %v253_v30 = vmax.f32 %v251_v20, %v252_v24  ;;  %v247_v31 = vrot.slane %v246_v26, 1  ;;  %v256_v43 = vld [vmem:[#allocation3] sm:$0x3]  ;;  %v199_v44 = vld [vmem:[#allocation2] sm:$0x3] }
  0x49   : > { %s2640_s1 = sld [smem:[#allocation5 + $0x3a]]  ;;  %vm1362_vm7 = vcmask 1044480   ;;  %vm1907_vm8 = vcmask 1042432   ;;  %vm2180_vm9 = vcmask 1041408   ;;  %vm2458_vm10 = vcmask 130048  }
  0x4a   : > { %v210_v32 = vadd.f32 %v209_v27, %v208_v22  ;;  %v216_v33 = vrot.slane %v215_v28, 1  ;;  %v254_v34 = vrot.slane %v253_v30, 1  ;;  %v248_v35 = vmax.f32 %v246_v26, %v247_v31  ;;  %s3278_s22 = sld [smem:[#allocation5 + $0x3b]] }
  0x4b   : > { %s3280_s13 = sld [smem:[#allocation5 + $0x3c]] }
  0x4c   : > { %v217_v36 = vadd.f32 %v216_v33, %v215_v28  ;;  %v255_v38 = vmax.f32 %v253_v30, %v254_v34  ;;  %s3283_s4 = sld [smem:[#allocation5 + $0x3d]] }
  0x4d   : > { %5492 = sst [smem:[#allocation25_spill]] %s3158_s5 }
  0x4e   : > { %v220_v39 = vcombine.low %v210_v32, %v217_v36  ;;  %v259_v40 = vcombine.low %v248_v35, %v255_v38  ;;  %v5400_v38 = vstv %s3154_s3  ;;  %s3285_s11 = sld [smem:[#allocation5 + $0x3e]] }
  0x4f   : > { %s3287_s10 = sld [smem:[#allocation5 + $0x40]] }
  0x50   : > { %v227_v41 = vrot.slane %v220_v39, %v226_v37  ;;  %v266_v42 = vrot.slane %v259_v40, %v226_v37  ;;  %s3289_s14 = sld [smem:[#allocation5 + $0x41]] }
  0x51   : > { %s3293_s20 = sld [smem:[#allocation5 + $0x7]] }
  0x52   : > { %v234_v45 = vrot.slane %v227_v41, %v226_v37  ;;  %v273_v46 = vrot.slane %v266_v42, %v226_v37  ;;  %s3295_s9 = sld [smem:[#allocation5 + $0x38]] }
  0x53   : > { %s3297_s2 = sld [smem:[#allocation5 + $0x8]] }
  0x54   : > { %v275_v47 = vmax.f32 %v256_v43, %v273_v46  ;;  %v236_v48 = vadd.f32 %v234_v45, %v199_v44  ;;  %v5398_v44 = vstv %s3158_s5  ;;  %s3301_s28 = sld [smem:[#allocation5 + $0x9]] }
  0x55   : > { %s3303_s12 = sld [smem:[#allocation5 + $0xa]] }
  0x56   : > { %276 = vst.msk [vmem:[#allocation3] sm:$0x3] %vm3097_vm1, %v275_v47  ;;  %241 = vst.msk [vmem:[#allocation2] sm:$0x3] %vm3097_vm1, %v236_v48  ;;  %s3305_s27 = sld [smem:[#allocation5 + $0xb]] }
  0x57   : > { %s3309_s5 = sld [smem:[#allocation5 + $0xc]] }
  0x5d   : > { %v290_v49 = vld [vmem:[#allocation3] sm:$0x3]  ;;  %v288_v52 = vld [vmem:[#allocation2] sm:$0x3] }
  0x5e   : > { %418 = vrot.lane.b32.xlu1 %v290_v49, %s2937_s17  ;;  %396 = vrot.lane.b32.xlu0 %v290_v49, %s2938_s19  ;;  %v305_v51 = vrot.slane %v290_v49, %v3116_v50  ;;  %v289_v53 = vmul.f32 0.25, %v288_v52  ;;  %v376_v55 = vrot.slane %v290_v49, 1 }
  0x60   : > { %v295_v54 = vrot.slane %v289_v53, %v3116_v50  ;;  %v367_v56 = vrot.slane %v289_v53, 1  ;;  %v380_v57 = vrot.slane %v376_v55, %v3116_v50 }
  0x62   : > { %462 = vrot.lane.b32.xlu1 %v290_v49, %s2939_s21  ;;  %440 = vrot.lane.b32.xlu0 %v290_v49, %s2940_s6  ;;  %v371_v58 = vrot.slane %v367_v56, %v3116_v50 }
  0x66   : > { %315 = vrot.lane.b32.xlu1 %v305_v51, %s2941_s7  ;;  %306 = vrot.lane.b32.xlu0 %v305_v51, %s2942_s8 }
  0x6a   : > { %323 = vrot.lane.b32.xlu1 %v305_v51, %s2943_s15  ;;  %385 = vrot.lane.b32.xlu0 %v289_v53, %s2938_s19  ;;  %s3172_s19 = sld [smem:[#allocation5 + $0x33]] }
  0x6e   : > { %331 = vrot.lane.b32.xlu1 %v305_v51, %s2944_s16  ;;  %429 = vrot.lane.b32.xlu0 %v289_v53, %s2940_s6  ;;  %s3198_s6 = sld [smem:[#allocation5 + $0x35]] }
  0x72   : > { %407 = vrot.lane.b32.xlu1 %v289_v53, %s2937_s17  ;;  %296 = vrot.lane.b32.xlu0 %v295_v54, %s2942_s8  ;;  %s3161_s17 = sld [smem:[#allocation5 + $0x32]] }
  0x76   : > { %451 = vrot.lane.b32.xlu1 %v289_v53, %s2939_s21  ;;  %319 = vrot.lane.b32.xlu0 %v295_v54, %s2943_s15  ;;  %s3187_s21 = sld [smem:[#allocation5 + $0x34]] }
  0x77   : > { %s3208_s15 = sld [smem:[#allocation5 + $0x36]] }
  0x78   : > { %v666_v56 = vstv %s3161_s17  ;;  %s2598_s17 = sld [smem:[#allocation5 + $0x10]] }
  0x7a   : > { %339 = vrot.lane.b32.xlu1 %v305_v51, %s2945_s18  ;;  %327 = vrot.lane.b32.xlu0 %v295_v54, %s2944_s16  ;;  %s5380_s16 = smov 126  }
  0x7e   : > { %347 = vrot.lane.b32.xlu1 %v305_v51, %s2946_s24  ;;  %335 = vrot.lane.b32.xlu0 %v295_v54, %s2945_s18  ;;  %s5382_s18 = smov 125  }
  0x82   : > { %311 = vrot.lane.b32.xlu1 %v295_v54, %s2941_s7  ;;  %343 = vrot.lane.b32.xlu0 %v295_v54, %s2946_s24  ;;  %s5378_s7 = smov 127   ;;  %s3224_s24 = sld [smem:[#allocation5 + $0x1]] }
  0x86   : > { %495 = vrot.lane.b32.xlu1 %v289_v53, %s2947_s25  ;;  %473 = vrot.lane.b32.xlu0 %v289_v53, %s2948_s23 }
  0x8a   : > { %484 = vrot.lane.b32.xlu1 %v290_v49, %s2948_s23  ;;  %517 = vrot.lane.b32.xlu0 %v289_v53, %s2949_s26  ;;  %s3231_s23 = sld [smem:[#allocation5 + $0x2]] }
  0x8e   : > { %506 = vrot.lane.b32.xlu0 %v290_v49, %s2947_s25  ;;  %528 = vrot.lane.b32.xlu1 %v290_v49, %s2949_s26  ;;  %s5372_s25 = smov 124   ;;  %s5374_s26 = smov 123  }
  0x92   : > { %355 = vrot.lane.b32.xlu1 %v305_v51, %s2950_s29  ;;  %351 = vrot.lane.b32.xlu0 %v295_v54, %s2950_s29  ;;  %s3238_s29 = sld [smem:[#allocation5 + $0x3]] }
  0x96   : > { %363 = vrot.lane.b32.xlu1 %v305_v51, %s2951_s30  ;;  %359 = vrot.lane.b32.xlu0 %v295_v54, %s2951_s30  ;;  %s5376_s30 = smov 122  }
  0x9a   : > { %381 = vrot.lane.b32.xlu1 %v380_v57, %s2942_s8  ;;  %372 = vrot.lane.b32.xlu0 %v371_v58, %s2942_s8 }
  0xd0   : > { %v419_v59 = vpop.permute.xlu1 %418  ;;  %v397_v60 = vpop.permute.xlu0 %396 }
  0xd1   : > { %v420_v61 = vrot.slane %v419_v59, 1  ;;  %v398_v62 = vrot.slane %v397_v60, 1 }
  0xd3   : > { %v402_v63 = vrot.slane %v398_v62, %v3116_v50  ;;  %v424_v2 = vrot.slane %v420_v61, %v3116_v50  ;;  %v692_v61 = vstv %s3172_s19  ;;  %s2599_s19 = sld [smem:[#allocation5 + $0x11]] }
  0xd4   : > { %v463_v0 = vpop.permute.xlu1 %462  ;;  %v441_v1 = vpop.permute.xlu0 %440 }
  0xd5   : > { %v442_v3 = vrot.slane %v441_v1, 1  ;;  %403 = vrot.lane.b32.xlu1 %v402_v63, %s2942_s8  ;;  %v464_v7 = vrot.slane %v463_v0, 1  ;;  %v718_v0 = vstv %s3187_s21  ;;  %s2600_s21 = sld [smem:[#allocation5 + $0x12]] }
  0xd7   : > { %v446_v6 = vrot.slane %v442_v3, %v3116_v50  ;;  %v468_v12 = vrot.slane %v464_v7, %v3116_v50 }
  0xd8   : > { %v316_v4 = vpop.permute.xlu1 %315  ;;  %v307_v5 = vpop.permute.xlu0 %306 }
  0xd9   : > { %318 = vst.msk [vmem:[#allocation4 + $0x1c] sm:$0x1] %vm299_vm3, %v316_v4  ;;  %310 = vst.msk [vmem:[#allocation4 + $0x1b] sm:$0x1] %vm299_vm3, %v307_v5  ;;  %425 = vrot.lane.b32.xlu1 %v424_v2, %s2942_s8  ;;  %v744_v4 = vstv %s3198_s6  ;;  %s2601_s6 = sld [smem:[#allocation5 + $0x13]] }
  0xdc   : > { %v324_v8 = vpop.permute.xlu1 %323  ;;  %v386_v9 = vpop.permute.xlu0 %385 }
  0xdd   : > { %326 = vst.msk [vmem:[#allocation4 + $0x1d] sm:$0x1] %vm299_vm3, %v324_v8  ;;  %v387_v10 = vrot.slane %v386_v9, 1  ;;  %447 = vrot.lane.b32.xlu1 %v446_v6, %s2942_s8  ;;  %v770_v6 = vstv %s3208_s15  ;;  %s2602_s15 = sld [smem:[#allocation5 + $0x14]] }
  0xdf   : > { %v391_v13 = vrot.slane %v387_v10, %v3116_v50  ;;  %v653_v10 = vstv %s3224_s24  ;;  %s3918_s24 = sld [smem:[#allocation5 + $0x17]] }
  0xe0   : > { %v332_v14 = vpop.permute.xlu1 %331  ;;  %v430_v15 = vpop.permute.xlu0 %429 }
  0xe1   : > { %334 = vst.msk [vmem:[#allocation4 + $0x1e] sm:$0x1] %vm299_vm3, %v332_v14  ;;  %469 = vrot.lane.b32.xlu1 %v468_v12, %s2942_s8  ;;  %392 = vrot.lane.b32.xlu0 %v391_v13, %s2942_s8  ;;  %v431_v19 = vrot.slane %v430_v15, 1  ;;  %v679_v13 = vstv %s3231_s23  ;;  %v705_v15 = vstv %s3238_s29  ;;  %s2666_s23 = sld [smem:[#allocation5 + $0x54]] }
  0xe2   : > { %s3943_s29 = sld [smem:[#allocation5 + $0x5b]] }
  0xe3   : > { %v435_v24 = vrot.slane %v431_v19, %v3116_v50 }
  0xe4   : > { %v408_v16 = vpop.permute.xlu1 %407  ;;  %v297_v17 = vpop.permute.xlu0 %296 }
  0xe5   : > { %v409_v18 = vrot.slane %v408_v16, 1  ;;  %300 = vst.msk [vmem:[#allocation4 + $0x3] sm:$0x1] %vm299_vm3, %v297_v17 }
  0xe7   : > { %v413_v20 = vrot.slane %v409_v18, %v3116_v50 }
  0xe8   : > { %v452_v21 = vpop.permute.xlu1 %451  ;;  %v320_v22 = vpop.permute.xlu0 %319 }
  0xe9   : > { %v453_v23 = vrot.slane %v452_v21, 1  ;;  %322 = vst.msk [vmem:[#allocation4 + $0x5] sm:$0x1] %vm299_vm3, %v320_v22  ;;  %414 = vrot.lane.b32.xlu0 %v413_v20, %s2942_s8 }
  0xeb   : > { %v457_v27 = vrot.slane %v453_v23, %v3116_v50 }
  0xec   : > { %v340_v25 = vpop.permute.xlu1 %339  ;;  %v328_v26 = vpop.permute.xlu0 %327 }
  0xed   : > { %342 = vst.msk [vmem:[#allocation4 + $0x1f] sm:$0x1] %vm299_vm3, %v340_v25  ;;  %330 = vst.msk [vmem:[#allocation4 + $0x6] sm:$0x1] %vm299_vm3, %v328_v26  ;;  %436 = vrot.lane.b32.xlu0 %v435_v24, %s2942_s8 }
  0xf0   : > { %v348_v28 = vpop.permute.xlu1 %347  ;;  %v336_v29 = vpop.permute.xlu0 %335 }
  0xf1   : > { %350 = vst.msk [vmem:[#allocation4 + $0x20] sm:$0x1] %vm299_vm3, %v348_v28  ;;  %338 = vst.msk [vmem:[#allocation4 + $0x7] sm:$0x1] %vm299_vm3, %v336_v29  ;;  %458 = vrot.lane.b32.xlu0 %v457_v27, %s2942_s8 }
  0xf4   : > { %v312_v30 = vpop.permute.xlu1 %311  ;;  %v344_v31 = vpop.permute.xlu0 %343  ;;  %v3164_v39 = vld [vmem:[#allocation4 + $0x18] sm:$0xff] }
  0xf5   : > { %314 = vst.msk [vmem:[#allocation4 + $0x4] sm:$0x1] %vm299_vm3, %v312_v30  ;;  %346 = vst.msk [vmem:[#allocation4 + $0x8] sm:$0x1] %vm299_vm3, %v344_v31  ;;  %v649_v49 = vmul.f32 %v5398_v44, %v3164_v39  ;;  %v667_v60 = vmul.f32 %v666_v56, %v3164_v39  ;;  %v719_v3 = vmul.f32 %v718_v0, %v3164_v39 }
  0xf6   : > { %v745_v5 = vmul.f32 %v744_v4, %v3164_v39  ;;  %v771_v7 = vmul.f32 %v770_v6, %v3164_v39 }
  0xf8   : > { %v496_v11 = vpop.permute.xlu1 %495  ;;  %v474_v32 = vpop.permute.xlu0 %473 }
  0xf9   : > { %v497_v33 = vrot.slane %v496_v11, 1  ;;  %v475_v34 = vrot.slane %v474_v32, 1  ;;  %v3313_v11 = vstv %s2640_s1  ;;  %s5496_s1 = smov 127  }
  0xfb   : > { %v479_v35 = vrot.slane %v475_v34, %v3116_v50  ;;  %v501_v41 = vrot.slane %v497_v33, %v3116_v50 }
  0xfc   : > { %v485_v36 = vpop.permute.xlu1 %484  ;;  %v518_v37 = vpop.permute.xlu0 %517  ;;  %v3166_v40 = vld [vmem:[#allocation4] sm:$0xff] }
  0xfd   : > { %v486_v42 = vrot.slane %v485_v36, 1  ;;  %v519_v43 = vrot.slane %v518_v37, 1  ;;  %480 = vrot.lane.b32.xlu0 %v479_v35, %s2942_s8  ;;  %v644_v48 = vmul.f32 %v5400_v38, %v3166_v40  ;;  %v654_v12 = vmul.f32 %v653_v10, %v3166_v40 }
  0xfe   : > { %v680_v14 = vmul.f32 %v679_v13, %v3166_v40  ;;  %v706_v16 = vmul.f32 %v705_v15, %v3166_v40  ;;  %v903_v37 = vmul.f32 %v3313_v11, %v3164_v39 }
  0xff   : > { %v490_v45 = vrot.slane %v486_v42, %v3116_v50  ;;  %v523_v51 = vrot.slane %v519_v43, %v3116_v50  ;;  %v3183_v54 = vadd.f32 %v649_v49, %v644_v48  ;;  %v3337_v43 = vstv %s3280_s13  ;;  %s2651_s13 = sld [smem:[#allocation5 + $0x45]] }
 0x100   : > { %v507_v46 = vpop.permute.xlu0 %506  ;;  %v529_v47 = vpop.permute.xlu1 %528 }
 0x101   : > { %v508_v52 = vrot.slane %v507_v46, 1  ;;  %491 = vrot.lane.b32.xlu1 %v490_v45, %s2942_s8  ;;  %502 = vrot.lane.b32.xlu0 %v501_v41, %s2942_s8  ;;  %v530_v53 = vrot.slane %v529_v47, 1  ;;  %v3334_v41 = vstv %s3278_s22  ;;  %v3340_v45 = vstv %s3283_s4  ;;  %s2655_s22 = sld [smem:[#allocation5 + $0x49]] }
 0x102   : > { %v3343_v46 = vstv %s3285_s11  ;;  %v3346_v47 = vstv %s3287_s10  ;;  %s5499_s10 = smov 126   ;;  %s3538_s11 = sld [smem:[#allocation5 + $0x43]] }
 0x103   : > { %v512_v55 = vrot.slane %v508_v52, %v3116_v50  ;;  %v534_v59 = vrot.slane %v530_v53, %v3116_v50  ;;  %v693_v50 = vmul.f32 %v692_v61, %v3164_v39  ;;  %v3362_v53 = vstv %s3289_s14  ;;  %s2653_s14 = sld [smem:[#allocation5 + $0x47]] }
 0x104   : > { %v356_v57 = vpop.permute.xlu1 %355  ;;  %v352_v58 = vpop.permute.xlu0 %351  ;;  %s2657_s4 = sld [smem:[#allocation5 + $0x4b]] }
 0x105   : > { %524 = vrot.lane.b32.xlu0 %v523_v51, %s2942_s8  ;;  %513 = vrot.lane.b32.xlu1 %v512_v55, %s2942_s8  ;;  %358 = vst.msk [vmem:[#allocation4 + $0x21] sm:$0x1] %vm299_vm3, %v356_v57  ;;  %354 = vst.msk [vmem:[#allocation4 + $0x9] sm:$0x1] %vm299_vm3, %v352_v58  ;;  %v3365_v55 = vstv %s3293_s20  ;;  %v909_v57 = vrot.slane %v903_v37, 1  ;;  %v943_v58 = vmul.f32 %v3334_v41, %v3164_v39  ;;  %s2654_s20 = sld [smem:[#allocation5 + $0x48]] }
 0x106   : > { %5497 = vst [vmem:[#allocation26_spill] sm:$0xff] %v3365_v55 }
 0x108   : > { %v364_v62 = vpop.permute.xlu1 %363  ;;  %v360_v63 = vpop.permute.xlu0 %359 }
 0x109   : > { %671 = vrot.lane.b32.xlu0 %v667_v60, %s5378_s7  ;;  %535 = vrot.lane.b32.xlu1 %v534_v59, %s2942_s8  ;;  %366 = vst.msk [vmem:[#allocation4 + $0x22] sm:$0x1] %vm299_vm3, %v364_v62  ;;  %362 = vst.msk [vmem:[#allocation4 + $0xa] sm:$0x1] %vm299_vm3, %v360_v63  ;;  %s3217_s8 = sld [smem:[#allocation5 + $0x37]]  ;;  %v3374_v59 = vstv %s3297_s2  ;;  %v3377_v60 = vstv %s3301_s28  ;;  %s5502_s2 = smov 125  }
 0x10a   : > { %v3380_v62 = vstv %s3303_s12  ;;  %v3383_v63 = vstv %s3305_s27  ;;  %s2650_s12 = sld [smem:[#allocation5 + $0x44]] }
 0x10b   : > { %s2656_s28 = sld [smem:[#allocation5 + $0x4a]] }
 0x10c   : > { %v382_v1 = vpop.permute.xlu1 %381  ;;  %v373_v2 = vpop.permute.xlu0 %372  ;;  %s2658_s27 = sld [smem:[#allocation5 + $0x4c]] }
 0x10d   : > { %697 = vrot.lane.b32.xlu0 %v693_v50, %s5380_s16  ;;  %384 = vst.msk [vmem:[#allocation4 + $0x23] sm:$0x1] %vm299_vm3, %v382_v1  ;;  %375 = vst.msk [vmem:[#allocation4 + $0xb] sm:$0x1] %vm299_vm3, %v373_v2  ;;  %v3386_v50 = vstv %s3309_s5  ;;  %s2597_s5 = sld [smem:[#allocation5 + $0xf]] }
 0x10e   : > { %5500 = vst [vmem:[#allocation28_spill] sm:$0xff] %v3386_v50 }
 0x10f   : > { %v796_v8 = vstv %s3217_s8  ;;  %s3913_s8 = sld [smem:[#allocation5 + $0x16]] }
 0x110   : > { %v797_v9 = vmul.f32 %v796_v8, %v3164_v39 }
 0x111   : > { %723 = vrot.lane.b32.xlu0 %v719_v3, %s5382_s18 }
 0x115   : > { %749 = vrot.lane.b32.xlu0 %v745_v5, %s5372_s25  ;;  %s3245_s25 = sld [smem:[#allocation5 + $0x4]] }
 0x119   : > { %775 = vrot.lane.b32.xlu0 %v771_v7, %s5374_s26  ;;  %s3252_s26 = sld [smem:[#allocation5 + $0x5]] }
 0x11b   : > { %v5408_v17 = vstv %s3245_s25 }
 0x11c   : > { %v732_v18 = vmul.f32 %v5408_v17, %v3166_v40 }
 0x11d   : > { %801 = vrot.lane.b32.xlu0 %v797_v9, %s5376_s30  ;;  %s3259_s30 = sld [smem:[#allocation5 + $0x6]]  ;;  %v983_v9 = vmul.f32 %v3337_v43, %v3164_v39 }
 0x11f   : > { %v5407_v19 = vstv %s3252_s26 }
 0x120   : > { %v758_v20 = vmul.f32 %v5407_v19, %v3166_v40 }
 0x121   : > { %658 = vrot.lane.b32.xlu0 %v654_v12, %s5378_s7  ;;  %s5493_s7 = smov 124   ;;  %v1023_v12 = vmul.f32 %v3340_v45, %v3164_v39 }
 0x123   : > { %v5406_v21 = vstv %s3259_s30 }
 0x124   : > { %v784_v22 = vmul.f32 %v5406_v21, %v3166_v40 }
 0x125   : > { %684 = vrot.lane.b32.xlu0 %v680_v14, %s5380_s16  ;;  %s5494_s16 = smov 123   ;;  %v3410_v14 = vmul.f32 %v3343_v46, %v3164_v39 }
 0x129   : > { %710 = vrot.lane.b32.xlu0 %v706_v16, %s5382_s18  ;;  %s2639_s18 = sld [smem:[#allocation5 + $0x39]]  ;;  %v949_v16 = vrot.slane %v943_v58, 1 }
 0x12d   : > { %736 = vrot.lane.b32.xlu0 %v732_v18, %s5493_s7  ;;  %v810_v18 = vmul.f32 %v3365_v55, %v3166_v40 }
 0x12f   : > { %v3299_v28 = vstv %s2639_s18  ;;  %s3315_s18 = sld [smem:[#allocation5 + $0xd]] }
 0x130   : > { %v863_v29 = vmul.f32 %v3299_v28, %v3164_v39 }
 0x131   : > { %762 = vrot.lane.b32.xlu0 %v758_v20, %s5494_s16 }
 0x132   : > { %v869_v35 = vrot.slane %v863_v29, 1 }
 0x135   : > { %788 = vrot.lane.b32.xlu0 %v784_v22, %s5495_s0  ;;  %v3389_v1 = vstv %s3315_s18  ;;  %v843_v22 = vmul.f32 %v3374_v59, %v3166_v40  ;;  %s4004_s18 = sld [smem:[#allocation5 + $0x19]] }
 0x136   : > { %5501 = vst [vmem:[#allocation29_spill] sm:$0xff] %v3389_v1 }
 0x137   : > { %v849_v58 = vrot.slane %v843_v22, 1 }
 0x147   : > { %v404_v23 = vpop.permute.xlu1 %403 }
 0x148   : > { %406 = vst.msk [vmem:[#allocation4 + $0x24] sm:$0x1] %vm299_vm3, %v404_v23  ;;  %v883_v23 = vmul.f32 %v3377_v60, %v3166_v40 }
 0x14b   : > { %v426_v24 = vpop.permute.xlu1 %425 }
 0x14c   : > { %428 = vst.msk [vmem:[#allocation4 + $0x25] sm:$0x1] %vm299_vm3, %v426_v24  ;;  %v923_v24 = vmul.f32 %v3380_v62, %v3166_v40 }
 0x14f   : > { %v448_v25 = vpop.permute.xlu1 %447 }
 0x150   : > { %450 = vst.msk [vmem:[#allocation4 + $0x26] sm:$0x1] %vm299_vm3, %v448_v25  ;;  %v963_v25 = vmul.f32 %v3383_v63, %v3166_v40 }
 0x153   : > { %v470_v26 = vpop.permute.xlu1 %469  ;;  %v393_v27 = vpop.permute.xlu0 %392 }
 0x154   : > { %472 = vst.msk [vmem:[#allocation4 + $0x27] sm:$0x1] %vm299_vm3, %v470_v26  ;;  %395 = vst.msk [vmem:[#allocation4 + $0xc] sm:$0x1] %vm299_vm3, %v393_v27  ;;  %v1003_v26 = vmul.f32 %v3386_v50, %v3166_v40 }
 0x15b   : > { %v3311_v30 = vld [vmem:[#allocation4 + $0x20] sm:$0xff]  ;;  %v415_v31 = vpop.permute.xlu0 %414 }
 0x15c   : > { %417 = vst.msk [vmem:[#allocation4 + $0xd] sm:$0x1] %vm299_vm3, %v415_v31  ;;  %v668_v32 = vmul.f32 %v666_v56, %v3311_v30  ;;  %v3323_v33 = vmul.f32 %v3299_v28, %v3311_v30  ;;  %v3327_v34 = vmul.f32 %v3313_v11, %v3311_v30  ;;  %v694_v49 = vmul.f32 %v692_v61, %v3311_v30 }
 0x15d   : > { %v3358_v52 = vmul.f32 %v3334_v41, %v3311_v30  ;;  %v3368_v56 = vstv %s3295_s9  ;;  %v720_v3 = vmul.f32 %v718_v0, %v3311_v30  ;;  %v3401_v7 = vmul.f32 %v3337_v43, %v3311_v30  ;;  %s3491_s9 = sld [smem:[#allocation5 + $0x42]] }
 0x15e   : > { %673 = vrot.lane.b32.xlu1 %v668_v32, %s5496_s1  ;;  %v5404_v36 = vrot.slane %v3323_v33, 1  ;;  %v5403_v51 = vrot.slane %v3327_v34, 1  ;;  %5498 = vst [vmem:[#allocation27_spill] sm:$0xff] %v3368_v56  ;;  %v3414_v0 = vmul.f32 %v3346_v47, %v3164_v39  ;;  %v827_v20 = vmul.f32 %v3368_v56, %v3164_v39 }
 0x15f   : > { %v437_v42 = vpop.permute.xlu0 %436  ;;  %v5402_v5 = vrot.slane %v3358_v52, 1  ;;  %v746_v29 = vmul.f32 %v744_v4, %v3311_v30  ;;  %v5401_v31 = vrot.slane %v3401_v7, 1  ;;  %v3440_v32 = vmul.f32 %v3340_v45, %v3311_v30 }
 0x160   : > { %439 = vst.msk [vmem:[#allocation4 + $0xe] sm:$0x1] %vm299_vm3, %v437_v42  ;;  %v871_v48 = vsel %vm816_vm5, %v869_v35, %v5404_v36  ;;  %v911_v2 = vsel %vm816_vm5, %v909_v57, %v5403_v51  ;;  %v989_v35 = vrot.slane %v983_v9, 1  ;;  %v3445_v37 = vmul.f32 %v3343_v46, %v3311_v30 }
 0x161   : > { %874 = vrot.lane.b32.xlu0 %v871_v48, %s5496_s1  ;;  %v951_v27 = vsel %vm816_vm5, %v949_v16, %v5402_v5  ;;  %v3449_v42 = vmul.f32 %v3368_v56, %v3311_v30  ;;  %v1043_v4 = vmul.f32 %v3389_v1, %v3166_v40  ;;  %v1029_v48 = vrot.slane %v1023_v12, 1 }
 0x162   : > { %699 = vrot.lane.b32.xlu1 %v694_v49, %s5499_s10  ;;  %v817_v49 = vrot.slane %v810_v18, 1  ;;  %v833_v57 = vrot.slane %v827_v20, 1  ;;  %v929_v9 = vrot.slane %v923_v24, 1  ;;  %v969_v16 = vrot.slane %v963_v25, 1 }
 0x163   : > { %v459_v61 = vpop.permute.xlu0 %458  ;;  %5503 = vst [vmem:[#allocation30_spill] sm:$0xff] %v3449_v42  ;;  %v772_v44 = vmul.f32 %v770_v6, %v3311_v30  ;;  %v1009_v12 = vrot.slane %v1003_v26, 1  ;;  %v798_v18 = vmul.f32 %v796_v8, %v3311_v30  ;;  %v5419_v20 = vrot.slane %v3445_v37, 1 }
 0x164   : > { %461 = vst.msk [vmem:[#allocation4 + $0xf] sm:$0x1] %vm299_vm3, %v459_v61  ;;  %v3471_v22 = vmul.f32 %v3346_v47, %v3311_v30 }
 0x165   : > { %914 = vrot.lane.b32.xlu0 %v911_v2, %s5499_s10  ;;  %v5399_v2 = vrot.slane %v3449_v42, 1 }
 0x166   : > { %725 = vrot.lane.b32.xlu1 %v720_v3, %s5502_s2  ;;  %v889_v3 = vrot.slane %v883_v23, 1  ;;  %v1049_v23 = vrot.slane %v1043_v4, 1 }
 0x167   : > { %v3481_v24 = vsel %vm816_vm5, %v833_v57, %v5399_v2 }
 0x169   : > { %954 = vrot.lane.b32.xlu0 %v951_v27, %s5502_s2  ;;  %v991_v27 = vsel %vm816_vm5, %v989_v35, %v5401_v31 }
 0x16a   : > { %751 = vrot.lane.b32.xlu1 %v746_v29, %s5493_s7  ;;  %v5405_v29 = vrot.slane %v3440_v32, 1 }
 0x16b   : > { %v3454_v61 = vld [vmem:[#allocation4 + $0x8] sm:$0xff] }
 0x16c   : > { %v3476_v6 = vmul.f32 %v3365_v55, %v3454_v61  ;;  %v3485_v8 = vmul.f32 %v3374_v59, %v3454_v61  ;;  %v3489_v25 = vmul.f32 %v3377_v60, %v3454_v61  ;;  %v3499_v35 = vmul.f32 %v3383_v63, %v3454_v61 }
 0x16d   : > { %994 = vrot.lane.b32.xlu0 %v991_v27, %s5493_s7  ;;  %v3503_v4 = vmul.f32 %v3386_v50, %v3454_v61  ;;  %v3507_v57 = vmul.f32 %v3389_v1, %v3454_v61  ;;  %v1031_v27 = vsel %vm816_vm5, %v1029_v48, %v5405_v29  ;;  %v1069_v48 = vrot.slane %v3410_v14, 1 }
 0x16e   : > { %777 = vrot.lane.b32.xlu1 %v772_v44, %s5494_s16  ;;  %5504 = vst [vmem:[#allocation31_spill] sm:$0xff] %v3476_v6  ;;  %5505 = vst [vmem:[#allocation32_spill] sm:$0xff] %v3489_v25  ;;  %v3495_v44 = vmul.f32 %v3380_v62, %v3454_v61  ;;  %v5409_v2 = vrot.slane %v3476_v6, 1  ;;  %v5415_v38 = vrot.slane %v3485_v8, 1  ;;  %v5414_v31 = vrot.slane %v3489_v25, 1 }
 0x16f   : > { %v481_v26 = vpop.permute.xlu0 %480  ;;  %5507 = vst [vmem:[#allocation34_spill] sm:$0xff] %v3499_v35  ;;  %5508 = vst [vmem:[#allocation35_spill] sm:$0xff] %v3503_v4  ;;  %v5412_v51 = vrot.slane %v3499_v35, 1  ;;  %v5411_v36 = vrot.slane %v3503_v4, 1  ;;  %v3705_v50 = vstv %s2655_s22  ;;  %v3745_v25 = vstv %s2657_s4  ;;  %s2613_s22 = sld [smem:[#allocation5 + $0x1f]] }
 0x170   : > { %5506 = vst [vmem:[#allocation33_spill] sm:$0xff] %v3495_v44  ;;  %5509 = vst [vmem:[#allocation36_spill] sm:$0xff] %v3507_v57  ;;  %v5413_v5 = vrot.slane %v3495_v44, 1  ;;  %v3526_v29 = vsel %vm816_vm5, %v817_v49, %v5409_v2  ;;  %v3536_v21 = vsel %vm816_vm5, %v889_v3, %v5414_v31  ;;  %v5510_v31 = vstv %s3245_s25  ;;  %s2617_s25 = sld [smem:[#allocation5 + $0x23]] }
 0x171   : > { %483 = vst.msk [vmem:[#allocation4 + $0x10] sm:$0x1] %vm299_vm3, %v481_v26  ;;  %1034 = vrot.lane.b32.xlu0 %v1031_v27, %s5494_s16  ;;  %v5410_v26 = vrot.slane %v3507_v57, 1  ;;  %v3531_v27 = vsel %vm816_vm5, %v849_v58, %v5415_v38  ;;  %v3548_v49 = vsel %vm816_vm5, %v969_v16, %v5412_v51  ;;  %v3553_v58 = vsel %vm816_vm5, %v1009_v12, %v5411_v36  ;;  %s2614_s4 = sld [smem:[#allocation5 + $0x20]] }
 0x172   : > { %803 = vrot.lane.b32.xlu1 %v798_v18, %s5495_s0  ;;  %v3543_v14 = vsel %vm816_vm5, %v929_v9, %v5413_v5  ;;  %v1071_v9 = vsel %vm816_vm5, %v1069_v48, %v5419_v20  ;;  %v655_v16 = vmul.f32 %v653_v10, %v3454_v61  ;;  %v5417_v12 = vrot.slane %v3471_v22, 2 }
 0x173   : > { %v492_v19 = vpop.permute.xlu1 %491  ;;  %v503_v17 = vpop.permute.xlu0 %502  ;;  %v3558_v3 = vsel %vm816_vm5, %v1049_v23, %v5410_v26  ;;  %v3571_v18 = vmul.f32 %v3362_v53, %v3311_v30  ;;  %v3579_v10 = vstv %s3491_s9  ;;  %v733_v38 = vmul.f32 %v5510_v31, %v3454_v61  ;;  %s4045_s9 = sld [smem:[#allocation5 + $0x1a]] }
 0x174   : > { %494 = vst.msk [vmem:[#allocation4 + $0x28] sm:$0x1] %vm299_vm3, %v492_v19  ;;  %505 = vst.msk [vmem:[#allocation4 + $0x11] sm:$0x1] %vm299_vm3, %v503_v17  ;;  %v1142_v17 = vrot.slane %v3414_v0, 2  ;;  %v1176_v19 = vmul.f32 %v3362_v53, %v3164_v39  ;;  %v681_v0 = vmul.f32 %v679_v13, %v3454_v61  ;;  %v3592_v2 = vmul.f32 %v3579_v10, %v3311_v30 }
 0x175   : > { %1074 = vrot.lane.b32.xlu0 %v1071_v9, %s5495_s0  ;;  %v3642_v31 = vstv %s2651_s13  ;;  %s2660_s13 = sld [smem:[#allocation5 + $0x4e]] }
 0x176   : > { %660 = vrot.lane.b32.xlu1 %v655_v16, %s5496_s1  ;;  %v1144_v9 = vsel %vm1089_vm6, %v1142_v17, %v5417_v12  ;;  %v5416_v16 = vrot.slane %v3571_v18, 2  ;;  %v3601_v17 = vstv %s3538_s11  ;;  %s4087_s11 = sld [smem:[#allocation5 + $0x1b]] }
 0x177   : > { %v514_v23 = vpop.permute.xlu1 %513  ;;  %v525_v48 = vpop.permute.xlu0 %524 }
 0x178   : > { %516 = vst.msk [vmem:[#allocation4 + $0x29] sm:$0x1] %vm299_vm3, %v514_v23  ;;  %527 = vst.msk [vmem:[#allocation4 + $0x12] sm:$0x1] %vm299_vm3, %v525_v48  ;;  %v1182_v23 = vrot.slane %v1176_v19, 2  ;;  %v1216_v48 = vmul.f32 %v3579_v10, %v3164_v39  ;;  %v5418_v19 = vrot.slane %v3592_v2, 2 }
 0x179   : > { %1147 = vrot.lane.b32.xlu0 %v1144_v9, %s5496_s1  ;;  %v707_v9 = vmul.f32 %v705_v15, %v3454_v61 }
 0x17a   : > { %686 = vrot.lane.b32.xlu1 %v681_v0, %s5499_s10  ;;  %v1184_v13 = vsel %vm1089_vm6, %v1182_v23, %v5416_v16  ;;  %v3613_v0 = vmul.f32 %v3601_v17, %v3311_v30  ;;  %v1222_v51 = vrot.slane %v1216_v48, 2  ;;  %v3621_v23 = vstv %s2650_s12  ;;  %s2611_s12 = sld [smem:[#allocation5 + $0x1d]] }
 0x17b   : > { %v536_v26 = vpop.permute.xlu1 %535  ;;  %v3598_v36 = vpop.permute.xlu0 %671  ;;  %v3632_v48 = vmul.f32 %v3621_v23, %v3311_v30  ;;  %v1296_v16 = vmul.f32 %v3621_v23, %v3164_v39 }
 0x17c   : > { %538 = vst.msk [vmem:[#allocation4 + $0x2a] sm:$0x1] %vm299_vm3, %v536_v26  ;;  %v1256_v26 = vmul.f32 %v3601_v17, %v3164_v39  ;;  %v1224_v15 = vsel %vm1089_vm6, %v1222_v51, %v5418_v19 }
 0x17d   : > { %1187 = vrot.lane.b32.xlu0 %v1184_v13, %s5499_s10  ;;  %v5422_v13 = vrot.slane %v3613_v0, 2  ;;  %v1302_v6 = vrot.slane %v1296_v16, 2 }
 0x17e   : > { %712 = vrot.lane.b32.xlu1 %v707_v9, %s5502_s2  ;;  %v1262_v9 = vrot.slane %v1256_v26, 2  ;;  %v3653_v26 = vmul.f32 %v3642_v31, %v3311_v30 }
 0x17f   : > { %v3619_v5 = vpop.permute.xlu0 %697 }
 0x180   : > { %v1264_v19 = vsel %vm1089_vm6, %v1262_v9, %v5422_v13  ;;  %v1336_v9 = vmul.f32 %v3642_v31, %v3164_v39 }
 0x181   : > { %1227 = vrot.lane.b32.xlu0 %v1224_v15, %s5502_s2  ;;  %v5511_v15 = vstv %s3252_s26  ;;  %s3936_s26 = sld [smem:[#allocation5 + $0x18]] }
 0x182   : > { %738 = vrot.lane.b32.xlu1 %v733_v38, %s5493_s7  ;;  %v759_v20 = vmul.f32 %v5511_v15, %v3454_v61  ;;  %v5427_v38 = vrot.slane %v3632_v48, 2  ;;  %v3663_v15 = vstv %s2653_s14  ;;  %v1342_v4 = vrot.slane %v1336_v9, 2  ;;  %s2612_s14 = sld [smem:[#allocation5 + $0x1e]] }
 0x183   : > { %v3638_v12 = vld [vmem:[#allocation4 + $0x28] sm:$0x3f]  ;;  %v3640_v51 = vpop.permute.xlu0 %723 }
 0x184   : > { %v865_v42 = vmul.f32 %v3299_v28, %v3638_v12  ;;  %v1304_v56 = vsel %vm1089_vm6, %v1302_v6, %v5427_v38  ;;  %v5430_v28 = vrot.slane %v3653_v26, 2  ;;  %v905_v57 = vmul.f32 %v3313_v11, %v3638_v12 }
 0x185   : > { %1267 = vrot.lane.b32.xlu0 %v1264_v19, %s5493_s7  ;;  %v5512_v19 = vstv %s3259_s30  ;;  %v1409_v6 = vmul.f32 %v3663_v15, %v3164_v39  ;;  %v945_v35 = vmul.f32 %v3334_v41, %v3638_v12  ;;  %v3713_v41 = vmul.f32 %v3705_v50, %v3311_v30  ;;  %s3947_s30 = sld [smem:[#allocation5 + $0x2a]] }
 0x186   : > { %764 = vrot.lane.b32.xlu1 %v759_v20, %s5494_s16  ;;  %v785_v55 = vmul.f32 %v5512_v19, %v3454_v61  ;;  %v3674_v20 = vmul.f32 %v3663_v15, %v3311_v30  ;;  %v872_v16 = vrot.slane %v865_v42, 1  ;;  %v3684_v19 = vstv %s2654_s20  ;;  %s2661_s20 = sld [smem:[#allocation5 + $0x4f]] }
 0x187   : > { %v3661_v13 = vpop.permute.xlu0 %749  ;;  %v1344_v1 = vsel %vm1089_vm6, %v1342_v4, %v5430_v28  ;;  %v3692_v11 = vmul.f32 %v3684_v19, %v3311_v30  ;;  %v912_v9 = vrot.slane %v905_v57, 1  ;;  %v1415_v4 = vrot.slane %v1409_v6, 3 }
 0x188   : > { %v1449_v28 = vmul.f32 %v3684_v19, %v3164_v39  ;;  %v3724_v57 = vstv %s2656_s28  ;;  %s2662_s28 = sld [smem:[#allocation5 + $0x50]] }
 0x189   : > { %1307 = vrot.lane.b32.xlu0 %v1304_v56, %s5494_s16 }
 0x18a   : > { %790 = vrot.lane.b32.xlu1 %v785_v55, %s5495_s0  ;;  %v5513_v55 = vrot.slane %v3323_v33, 1  ;;  %v5514_v33 = vrot.slane %v3674_v20, 3  ;;  %v1455_v44 = vrot.slane %v1449_v28, 3  ;;  %v5517_v28 = vrot.slane %v3358_v52, 1 }
 0x18b   : > { %v3682_v38 = vpop.permute.xlu0 %775  ;;  %v5518_v52 = vrot.slane %v3713_v41, 3 }
 0x18c   : > { %v873_v42 = vsel %vm816_vm5, %v5513_v55, %v872_v16  ;;  %v5515_v16 = vrot.slane %v3327_v34, 1  ;;  %v952_v55 = vrot.slane %v945_v35, 1  ;;  %v5516_v34 = vrot.slane %v3692_v11, 3 }
 0x18d   : > { %1347 = vrot.lane.b32.xlu0 %v1344_v1, %s5495_s0  ;;  %v1417_v1 = vsel %vm1362_vm7, %v1415_v4, %v5514_v33  ;;  %v1489_v4 = vmul.f32 %v3705_v50, %v3164_v39 }
 0x18e   : > { %876 = vrot.lane.b32.xlu1 %v873_v42, %s5496_s1  ;;  %v913_v6 = vsel %vm816_vm5, %v5515_v16, %v912_v9  ;;  %v985_v42 = vmul.f32 %v3337_v43, %v3638_v12  ;;  %v1457_v9 = vsel %vm1362_vm7, %v1455_v44, %v5516_v34  ;;  %v3733_v43 = vmul.f32 %v3724_v57, %v3311_v30 }
 0x18f   : > { %v3703_v56 = vpop.permute.xlu0 %801  ;;  %v953_v16 = vsel %vm816_vm5, %v5517_v28, %v952_v55  ;;  %v1495_v44 = vrot.slane %v1489_v4, 3  ;;  %v1529_v34 = vmul.f32 %v3724_v57, %v3164_v39 }
 0x191   : > { %1420 = vrot.lane.b32.xlu0 %v1417_v1, %s5496_s1  ;;  %v1497_v55 = vsel %vm1362_vm7, %v1495_v44, %v5518_v52  ;;  %v3765_v52 = vstv %s2658_s27  ;;  %s2663_s27 = sld [smem:[#allocation5 + $0x51]] }
 0x192   : > { %916 = vrot.lane.b32.xlu1 %v913_v6, %s5499_s10  ;;  %v992_v6 = vrot.slane %v985_v42, 1  ;;  %v1536_v42 = vrot.slane %v3733_v43, 3  ;;  %v3945_v43 = vstv %s2602_s15  ;;  %s2667_s15 = sld [smem:[#allocation5 + $0x55]] }
 0x193   : > { %v659_v33 = vpop.permute.xlu0 %658 }
 0x194   : > { %v664_v1 = vadd.f32 %v659_v33, %v3183_v54  ;;  %v1025_v54 = vmul.f32 %v3340_v45, %v3638_v12  ;;  %v3753_v45 = vmul.f32 %v3745_v25, %v3311_v30 }
 0x195   : > { %1460 = vrot.lane.b32.xlu0 %v1457_v9, %s5499_s10 }
 0x196   : > { %v677_v33 = vadd.f32 %v3598_v36, %v664_v1  ;;  %956 = vrot.lane.b32.xlu1 %v953_v16, %s5502_s2  ;;  %v5519_v36 = vrot.slane %v3401_v7, 1  ;;  %v1032_v1 = vrot.slane %v1025_v54, 1  ;;  %v1535_v16 = vrot.slane %v1529_v34, 3 }
 0x197   : > { %v685_v35 = vpop.permute.xlu0 %684 }
 0x198   : > { %v690_v9 = vadd.f32 %v685_v35, %v677_v33  ;;  %v993_v4 = vsel %vm816_vm5, %v5519_v36, %v992_v6  ;;  %v1065_v35 = vmul.f32 %v3343_v46, %v3638_v12  ;;  %v1569_v33 = vmul.f32 %v3745_v25, %v3164_v39 }
 0x199   : > { %1500 = vrot.lane.b32.xlu0 %v1497_v55, %s5502_s2  ;;  %v1537_v7 = vsel %vm1362_vm7, %v1535_v16, %v1536_v42  ;;  %v1576_v6 = vrot.slane %v3753_v45, 3  ;;  %v3773_v46 = vmul.f32 %v3765_v52, %v3311_v30 }
 0x19a   : > { %v703_v28 = vadd.f32 %v3619_v5, %v690_v9  ;;  %996 = vrot.lane.b32.xlu1 %v993_v4, %s5493_s7  ;;  %v5520_v5 = vrot.slane %v3440_v32, 1  ;;  %v1072_v34 = vrot.slane %v1065_v35, 1  ;;  %v1138_v9 = vmul.f32 %v3346_v47, %v3638_v12 }
 0x19b   : > { %v711_v44 = vpop.permute.xlu0 %710  ;;  %v1575_v4 = vrot.slane %v1569_v33, 3  ;;  %v5521_v47 = vrot.slane %v3445_v37, 1  ;;  %v1178_v33 = vmul.f32 %v3362_v53, %v3638_v12  ;;  %v5522_v37 = vrot.slane %v3471_v22, 2 }
 0x19c   : > { %v716_v55 = vadd.f32 %v711_v44, %v703_v28  ;;  %v1033_v54 = vsel %vm816_vm5, %v5520_v5, %v1032_v1  ;;  %v1609_v28 = vmul.f32 %v3765_v52, %v3164_v39  ;;  %v1616_v1 = vrot.slane %v3773_v46, 3 }
 0x19d   : > { %1540 = vrot.lane.b32.xlu0 %v1537_v7, %s5493_s7  ;;  %v1577_v32 = vsel %vm1362_vm7, %v1575_v4, %v1576_v6  ;;  %v1145_v35 = vrot.slane %v1138_v9, 2  ;;  %v1185_v9 = vrot.slane %v1178_v33, 2  ;;  %v1218_v53 = vmul.f32 %v3579_v10, %v3638_v12 }
 0x19e   : > { %v729_v36 = vadd.f32 %v3640_v51, %v716_v55  ;;  %1036 = vrot.lane.b32.xlu1 %v1033_v54, %s5494_s16  ;;  %v1073_v51 = vsel %vm816_vm5, %v5521_v47, %v1072_v34  ;;  %v1615_v55 = vrot.slane %v1609_v28, 3  ;;  %v5523_v28 = vrot.slane %v3571_v18, 2 }
 0x19f   : > { %v737_v16 = vpop.permute.xlu0 %736  ;;  %v1146_v34 = vsel %vm1089_vm6, %v5522_v37, %v1145_v35  ;;  %v1225_v22 = vrot.slane %v1218_v53, 2  ;;  %v1298_v47 = vmul.f32 %v3621_v23, %v3638_v12 }
 0x1a0   : > { %v742_v44 = vadd.f32 %v737_v16, %v729_v36  ;;  %v1617_v54 = vsel %vm1362_vm7, %v1615_v55, %v1616_v1  ;;  %v1186_v16 = vsel %vm1089_vm6, %v5523_v28, %v1185_v9 }
 0x1a1   : > { %1580 = vrot.lane.b32.xlu0 %v1577_v32, %s5494_s16 }
 0x1a2   : > { %v755_v39 = vadd.f32 %v3661_v13, %v742_v44  ;;  %1076 = vrot.lane.b32.xlu1 %v1073_v51, %s5495_s0  ;;  %v1258_v44 = vmul.f32 %v3601_v17, %v3638_v12  ;;  %v1338_v17 = vmul.f32 %v3642_v31, %v3638_v12 }
 0x1a3   : > { %v763_v7 = vpop.permute.xlu0 %762 }
 0x1a4   : > { %v768_v5 = vadd.f32 %v763_v7, %v755_v39  ;;  %v1265_v18 = vrot.slane %v1258_v44, 2  ;;  %v3861_v39 = vstv %s2598_s17  ;;  %s2664_s17 = sld [smem:[#allocation5 + $0x52]] }
 0x1a5   : > { %1620 = vrot.lane.b32.xlu0 %v1617_v54, %s5495_s0  ;;  %v1156_v37 = vmul.f32 %v3861_v39, %v3166_v40 }
 0x1a6   : > { %v781_v13 = vadd.f32 %v3682_v38, %v768_v5  ;;  %1149 = vrot.lane.b32.xlu1 %v1146_v34, %s5496_s1  ;;  %v5524_v38 = vrot.slane %v3592_v2, 2  ;;  %v1305_v2 = vrot.slane %v1298_v47, 2  ;;  %v1491_v5 = vmul.f32 %v3705_v50, %v3638_v12 }
 0x1a7   : > { %v789_v36 = vpop.permute.xlu0 %788  ;;  %v3878_v34 = vstv %s2599_s19  ;;  %v5529_v50 = vrot.slane %v3692_v11, 3  ;;  %v3920_v47 = vstv %s2601_s6  ;;  %s2616_s19 = sld [smem:[#allocation5 + $0x22]] }
 0x1a8   : > { %v794_v4 = vadd.f32 %v789_v36, %v781_v13  ;;  %v3886_v9 = vmul.f32 %v3878_v34, %v3454_v61  ;;  %v1498_v13 = vrot.slane %v1491_v5, 3  ;;  %v1531_v36 = vmul.f32 %v3724_v57, %v3638_v12  ;;  %s4391_s6 = sld [smem:[#allocation5 + $0x53]] }
 0x1a9   : > { %854 = vrot.lane.b32.xlu0 %v3531_v27, %s5496_s1  ;;  %v1226_v27 = vsel %vm1089_vm6, %v5524_v38, %v1225_v22  ;;  %v1196_v28 = vmul.f32 %v3878_v34, %v3166_v40  ;;  %v5530_v57 = vrot.slane %v3713_v41, 3  ;;  %v1571_v38 = vmul.f32 %v3745_v25, %v3638_v12 }
 0x1aa   : > { %v807_v32 = vadd.f32 %v3703_v56, %v794_v4  ;;  %1189 = vrot.lane.b32.xlu1 %v1186_v16, %s5499_s10  ;;  %v1345_v56 = vrot.slane %v1338_v17, 2  ;;  %v1162_v4 = vrot.slane %v1156_v37, 2  ;;  %v3897_v16 = vstv %s2600_s21  ;;  %s5586_s21 = sld [smem:[#allocation25_spill]] }
 0x1ab   : > { %v5442_v11 = vrot.slane %v3886_v9, 2  ;;  %v3905_v44 = vmul.f32 %v3897_v16, %v3454_v61  ;;  %v3928_v25 = vmul.f32 %v3920_v47, %v3454_v61  ;;  %v1611_v17 = vmul.f32 %v3765_v52, %v3638_v12 }
 0x1ac   : > { %v824_v10 = vadd.f32 %v3526_v29, %v807_v32  ;;  %v5525_v29 = vrot.slane %v3613_v0, 2  ;;  %v3845_v0 = vstv %s2597_s5  ;;  %v1499_v32 = vsel %vm1362_vm7, %v5530_v57, %v1498_v13  ;;  %s2615_s5 = sld [smem:[#allocation5 + $0x21]] }
 0x1ad   : > { %894 = vrot.lane.b32.xlu0 %v3536_v21, %s5499_s10  ;;  %v3849_v31 = vmul.f32 %v3845_v0, %v3454_v61  ;;  %v1116_v33 = vmul.f32 %v3845_v0, %v3166_v40  ;;  %v5439_v52 = vrot.slane %v3928_v25, 2  ;;  %v3981_v5 = vstv %s2666_s23  ;;  %s4524_s23 = sld [smem:[#allocation5 + $0x26]] }
 0x1ae   : > { %v3826_v51 = vadd.f32 %v3481_v24, %v824_v10  ;;  %1229 = vrot.lane.b32.xlu1 %v1226_v27, %s5502_s2  ;;  %v1266_v21 = vsel %vm1089_vm6, %v5525_v29, %v1265_v18  ;;  %v5526_v24 = vrot.slane %v3632_v48, 2  ;;  %v1538_v10 = vrot.slane %v1531_v36, 3  ;;  %5532 = vst [vmem:[#allocation38_spill] sm:$0xff] %v3981_v5  ;;  %v3995_v36 = vld [vmem:[#allocation4] sm:$0xff] }
 0x1af   : > { %v5445_v55 = vrot.slane %v3849_v31, 2  ;;  %v1122_v54 = vrot.slane %v1116_v33, 2  ;;  %v1202_v27 = vrot.slane %v1196_v28, 2  ;;  %v1236_v18 = vmul.f32 %v3897_v16, %v3166_v40 }
 0x1b0   : > { %v1306_v23 = vsel %vm1089_vm6, %v5526_v24, %v1305_v2  ;;  %v5440_v29 = vrot.slane %v3905_v44, 2  ;;  %v1578_v2 = vrot.slane %v1571_v38, 3  ;;  %v3938_v24 = vld [vmem:[#allocation4 + $0x10] sm:$0x3f]  ;;  %v1316_v33 = vmul.f32 %v3945_v43, %v3166_v40 }
 0x1b1   : > { %934 = vrot.lane.b32.xlu0 %v3543_v14, %s5502_s2  ;;  %v1411_v14 = vmul.f32 %v3663_v15, %v3638_v12  ;;  %v1451_v15 = vmul.f32 %v3684_v19, %v3638_v12  ;;  %v1204_v41 = vsel %vm1089_vm6, %v1202_v27, %v5442_v11  ;;  %v3993_v13 = vstv %s3918_s24  ;;  %s4495_s24 = sld [smem:[#allocation5 + $0x56]] }
 0x1b2   : > { %1269 = vrot.lane.b32.xlu1 %v1266_v21, %s5493_s7  ;;  %v1539_v21 = vsel %vm1362_vm7, %v1536_v42, %v1538_v10  ;;  %v4024_v38 = vmul.f32 %v3993_v13, %v3454_v61  ;;  %v925_v27 = vmul.f32 %v3380_v62, %v3938_v24  ;;  %v1429_v62 = vmul.f32 %v3995_v36, %v3993_v13 }
 0x1b3   : > { %v1418_v35 = vrot.slane %v1411_v14, 3  ;;  %v1458_v7 = vrot.slane %v1451_v15, 3  ;;  %v3955_v14 = vmul.f32 %v3945_v43, %v3454_v61 }
 0x1b5   : > { %974 = vrot.lane.b32.xlu0 %v3548_v49, %s5493_s7  ;;  %v5527_v49 = vrot.slane %v3653_v26, 2  ;;  %v5528_v26 = vrot.slane %v3674_v20, 3  ;;  %v1459_v53 = vsel %vm1362_vm7, %v5529_v50, %v1458_v7  ;;  %v1322_v50 = vrot.slane %v1316_v33, 2 }
 0x1b6   : > { %1309 = vrot.lane.b32.xlu1 %v1306_v23, %s5494_s16  ;;  %v1242_v23 = vrot.slane %v1236_v18, 2  ;;  %v5535_v18 = vrot.slane %v3485_v8, 1 }
 0x1b7   : > { %v1346_v48 = vsel %vm1089_vm6, %v5527_v49, %v1345_v56  ;;  %v1419_v19 = vsel %vm1362_vm7, %v5528_v26, %v1418_v35  ;;  %v1276_v56 = vmul.f32 %v3920_v47, %v3166_v40  ;;  %v1579_v49 = vsel %vm1362_vm7, %v1576_v6, %v1578_v2 }
 0x1b8   : > { %v1244_v42 = vsel %vm1089_vm6, %v1242_v23, %v5440_v29  ;;  %v845_v35 = vmul.f32 %v3374_v59, %v3938_v24  ;;  %v3967_v26 = vstv %s3913_s8  ;;  %v5438_v59 = vrot.slane %v3955_v14, 2  ;;  %s4471_s8 = sld [smem:[#allocation5 + $0x25]] }
 0x1b9   : > { %1014 = vrot.lane.b32.xlu0 %v3553_v58, %s5494_s16  ;;  %v3866_v58 = vmul.f32 %v3861_v39, %v3454_v61  ;;  %v1282_v15 = vrot.slane %v1276_v56, 2  ;;  %v3979_v6 = vmul.f32 %v3967_v26, %v3454_v61 }
 0x1ba   : > { %1349 = vrot.lane.b32.xlu1 %v1346_v48, %s5495_s0  ;;  %v1618_v48 = vrot.slane %v1611_v17, 3  ;;  %v852_v37 = vrot.slane %v845_v35, 1  ;;  %v4038_v17 = vmul.f32 %v3981_v5, %v3311_v30 }
 0x1bb   : > { %v5444_v20 = vrot.slane %v3866_v58, 2  ;;  %v1284_v45 = vsel %vm1089_vm6, %v1282_v15, %v5439_v52  ;;  %v5436_v10 = vrot.slane %v3979_v6, 3 }
 0x1bc   : > { %5537 = vst [vmem:[#allocation42_spill] sm:$0xff] %v4038_v17 }
 0x1bd   : > { %1054 = vrot.lane.b32.xlu0 %v3558_v3, %s5495_s0  ;;  %v1124_v3 = vsel %vm1089_vm6, %v1122_v54, %v5445_v55  ;;  %v1164_v22 = vsel %vm1089_vm6, %v1162_v4, %v5444_v20  ;;  %v1619_v54 = vsel %vm1362_vm7, %v1616_v1, %v1618_v48  ;;  %v4002_v1 = vstv %s3936_s26  ;;  %s4548_s26 = sld [smem:[#allocation5 + $0x3f]] }
 0x1be   : > { %1422 = vrot.lane.b32.xlu1 %v1419_v19, %s5496_s1  ;;  %v3969_v19 = vstv %s2617_s25  ;;  %v5434_v48 = vrot.slane %v4038_v17, 5  ;;  %v1198_v17 = vmul.f32 %v3878_v34, %v3938_v24  ;;  %s4518_s25 = sld [smem:[#allocation5 + $0xe]] }
 0x1bf   : > { %5531 = vst [vmem:[#allocation37_spill] sm:$0xff] %v3969_v19  ;;  %v1901_v46 = vmul.f32 %v3995_v36, %v3969_v19  ;;  %v4034_v2 = vmul.f32 %v3969_v19, %v3454_v61 }
 0x1c1   : > { %1127 = vrot.lane.b32.xlu0 %v1124_v3, %s5496_s1  ;;  %v885_v3 = vmul.f32 %v3377_v60, %v3938_v24  ;;  %v4006_v60 = vld [vmem:[#allocation4 + $0x18] sm:$0xff]  ;;  %5536 = vst [vmem:[#allocation41_spill] sm:$0xff] %v4034_v2  ;;  %v1908_v56 = vrot.slane %v1901_v46, 5  ;;  %v932_v46 = vrot.slane %v925_v27, 1 }
 0x1c2   : > { %1462 = vrot.lane.b32.xlu1 %v1459_v53, %s5499_s10  ;;  %v1389_v53 = vmul.f32 %v3967_v26, %v3166_v40  ;;  %v1918_v28 = vmul.f32 %v4006_v60, %v3981_v5  ;;  %v4014_v40 = vstv %s3943_s29  ;;  %v1238_v5 = vmul.f32 %v3897_v16, %v3938_v24  ;;  %s4554_s29 = sld [smem:[#allocation5 + $0x57]] }
 0x1c3   : > { %5534 = vst [vmem:[#allocation40_spill] sm:$0xff] %v4014_v40 }
 0x1c4   : > { %v1395_v23 = vrot.slane %v1389_v53, 3 }
 0x1c5   : > { %1167 = vrot.lane.b32.xlu0 %v1164_v22, %s5499_s10  ;;  %v4011_v22 = vstv %s3947_s30  ;;  %s4576_s30 = sld [smem:[#allocation5 + $0x27]] }
 0x1c6   : > { %1502 = vrot.lane.b32.xlu1 %v1499_v32, %s5502_s2  ;;  %5533 = vst [vmem:[#allocation39_spill] sm:$0xff] %v4011_v22  ;;  %v1324_v32 = vsel %vm1089_vm6, %v1322_v50, %v5438_v59  ;;  %v2174_v35 = vmul.f32 %v3995_v36, %v4011_v22  ;;  %v1397_v33 = vsel %vm1362_vm7, %v1395_v23, %v5436_v10  ;;  %v5546_v10 = vld [vmem:[#allocation28_spill] sm:$0xff] }
 0x1c7   : > { %v4091_v23 = vmul.f32 %v4011_v22, %v3454_v61  ;;  %v1158_v22 = vmul.f32 %v3861_v39, %v3938_v24  ;;  %v4209_v39 = vld [vmem:[#allocation4 + $0x20] sm:$0xff] }
 0x1c9   : > { %1207 = vrot.lane.b32.xlu0 %v1204_v41, %s5502_s2  ;;  %v853_v41 = vsel %vm816_vm5, %v5535_v18, %v852_v37  ;;  %v965_v37 = vmul.f32 %v3383_v63, %v3938_v24  ;;  %v1435_v63 = vrot.slane %v1429_v62, 3  ;;  %v1469_v18 = vmul.f32 %v3995_v36, %v4002_v1  ;;  %5542 = vst [vmem:[#allocation44_spill] sm:$0xff] %v4091_v23 }
 0x1ca   : > { %1542 = vrot.lane.b32.xlu1 %v1539_v21, %s5493_s7  ;;  %v892_v21 = vrot.slane %v885_v3, 1  ;;  %v5538_v3 = vld [vmem:[#allocation32_spill] sm:$0xff] }
 0x1cb   : > { %v5539_v50 = vrot.slane %v5538_v3, 1  ;;  %v1475_v59 = vrot.slane %v1469_v18, 3 }
 0x1cd   : > { %1247 = vrot.lane.b32.xlu0 %v1244_v42, %s5493_s7  ;;  %v5435_v42 = vrot.slane %v4034_v2, 5  ;;  %v893_v53 = vsel %vm816_vm5, %v5539_v50, %v892_v21  ;;  %v4085_v21 = vstv %s4004_s18  ;;  %v4105_v50 = vmul.f32 %v4014_v40, %v3311_v30  ;;  %s4618_s18 = sld [smem:[#allocation5 + $0x58]] }
 0x1ce   : > { %1582 = vrot.lane.b32.xlu1 %v1579_v49, %s5494_s16  ;;  %v1924_v49 = vrot.slane %v1918_v28, 5  ;;  %v4101_v3 = vmul.f32 %v4085_v21, %v3454_v61  ;;  %v1509_v52 = vmul.f32 %v3995_v36, %v4085_v21  ;;  %v4226_v2 = vstv %s2612_s14  ;;  %s4713_s14 = sld [smem:[#allocation5 + $0x15]] }
 0x1cf   : > { %v4070_v28 = vsel %vm1907_vm8, %v1908_v56, %v5435_v42  ;;  %v2181_v56 = vrot.slane %v2174_v35, 6  ;;  %5543 = vst [vmem:[#allocation45_spill] sm:$0xff] %v4105_v50  ;;  %v5544_v35 = vld [vmem:[#allocation33_spill] sm:$0xff]  ;;  %v972_v42 = vrot.slane %v965_v37, 1  ;;  %v5446_v29 = vrot.slane %v4105_v50, 6 }
 0x1d0   : > { %v3971_v7 = vpop.permute.xlu1 %673  ;;  %5540 = vst [vmem:[#allocation32_spill] sm:$0xff] %v4070_v28  ;;  %v1515_v20 = vrot.slane %v1509_v52, 3  ;;  %v5554_v52 = vld [vmem:[#allocation35_spill] sm:$0xff]  ;;  %v1118_v50 = vmul.f32 %v3845_v0, %v3938_v24  ;;  %v4236_v34 = vmul.f32 %v4226_v2, %v3454_v61 }
 0x1d1   : > { %1287 = vrot.lane.b32.xlu0 %v1284_v45, %s5494_s16  ;;  %v5437_v45 = vrot.slane %v4024_v38, 3 }
 0x1d2   : > { %1622 = vrot.lane.b32.xlu1 %v1619_v54, %s5495_s0  ;;  %v4059_v54 = vmul.f32 %v4002_v1, %v3454_v61 }
 0x1d3   : > { %v3999_v4 = vpop.permute.xlu0 %874  ;;  %v1437_v62 = vsel %vm1362_vm7, %v1435_v63, %v5437_v45  ;;  %v1005_v63 = vmul.f32 %v5546_v10, %v3938_v24  ;;  %v5441_v45 = vrot.slane %v4091_v23, 6 }
 0x1d4   : > { %v4016_v57 = vpop.permute.xlu1 %699 }
 0x1d5   : > { %1327 = vrot.lane.b32.xlu0 %v1324_v32, %s5495_s0  ;;  %v4075_v32 = vsel %vm1907_vm8, %v1924_v49, %v5434_v48  ;;  %v4126_v10 = vsel %vm2180_vm9, %v2181_v56, %v5441_v45  ;;  %v5549_v56 = vld [vmem:[#allocation34_spill] sm:$0xff]  ;;  %v1012_v11 = vrot.slane %v1005_v63, 1  ;;  %v4178_v63 = vstv %s2611_s12  ;;  %s4683_s12 = sld [smem:[#allocation5 + $0x29]] }
 0x1d6   : > { %856 = vrot.lane.b32.xlu1 %v853_v41, %s5496_s1  ;;  %5541 = vst [vmem:[#allocation43_spill] sm:$0xff] %v4075_v32  ;;  %v2191_v41 = vmul.f32 %v4006_v60, %v4014_v40  ;;  %5547 = vst [vmem:[#allocation33_spill] sm:$0xff] %v4126_v10  ;;  %v4188_v0 = vmul.f32 %v4178_v63, %v3454_v61  ;;  %v1125_v40 = vrot.slane %v1118_v50, 2  ;;  %v1165_v10 = vrot.slane %v1158_v22, 2 }
 0x1d7   : > { %v4043_v8 = vpop.permute.xlu0 %914  ;;  %v1278_v32 = vmul.f32 %v3920_v47, %v3938_v24 }
 0x1d8   : > { %v4051_v15 = vpop.permute.xlu1 %725  ;;  %v2197_v30 = vrot.slane %v2191_v41, 6 }
 0x1d9   : > { %1400 = vrot.lane.b32.xlu0 %v1397_v33, %s5496_s1  ;;  %v5443_v33 = vrot.slane %v4059_v54, 3 }
 0x1da   : > { %896 = vrot.lane.b32.xlu1 %v893_v53, %s5499_s10  ;;  %v5545_v53 = vrot.slane %v5544_v35, 1  ;;  %v4121_v35 = vstv %s4045_s9  ;;  %v4141_v41 = vsel %vm2180_vm9, %v2197_v30, %v5446_v29  ;;  %v4155_v30 = vstv %s4087_s11  ;;  %s4651_s9 = sld [smem:[#allocation5 + $0x28]] }
 0x1db   : > { %v4082_v27 = vpop.permute.xlu0 %954  ;;  %v4136_v18 = vmul.f32 %v4121_v35, %v3454_v61  ;;  %5548 = vst [vmem:[#allocation28_spill] sm:$0xff] %v4141_v41  ;;  %v1549_v55 = vmul.f32 %v3995_v36, %v4121_v35  ;;  %s4670_s11 = sld [smem:[#allocation5 + $0x59]] }
 0x1dc   : > { %v4093_v49 = vpop.permute.xlu1 %751  ;;  %v933_v48 = vsel %vm816_vm5, %v5545_v53, %v932_v46  ;;  %v5550_v53 = vrot.slane %v5549_v56, 1  ;;  %v5553_v56 = vrot.slane %v4101_v3, 3 }
 0x1dd   : > { %1440 = vrot.lane.b32.xlu0 %v1437_v62, %s5499_s10  ;;  %v1555_v23 = vrot.slane %v1549_v55, 3  ;;  %v5557_v55 = vld [vmem:[#allocation36_spill] sm:$0xff] }
 0x1de   : > { %936 = vrot.lane.b32.xlu1 %v933_v48, %s5502_s2  ;;  %v1477_v48 = vsel %vm1362_vm7, %v1475_v59, %v5443_v33  ;;  %v973_v45 = vsel %vm816_vm5, %v5550_v53, %v972_v42  ;;  %v5551_v59 = vld [vmem:[#allocation29_spill] sm:$0xff]  ;;  %v1517_v42 = vsel %vm1362_vm7, %v1515_v20, %v5553_v56  ;;  %v5555_v53 = vrot.slane %v5554_v52, 1 }
 0x1df   : > { %v4118_v62 = vpop.permute.xlu0 %994  ;;  %v1045_v33 = vmul.f32 %v5551_v59, %v3938_v24  ;;  %v1589_v20 = vmul.f32 %v3995_v36, %v4155_v30  ;;  %v5556_v52 = vrot.slane %v4136_v18, 3 }
 0x1e0   : > { %v4128_v37 = vpop.permute.xlu1 %777  ;;  %v1013_v59 = vsel %vm816_vm5, %v5555_v53, %v1012_v11  ;;  %v5558_v53 = vrot.slane %v5557_v55, 1 }
 0x1e1   : > { %1480 = vrot.lane.b32.xlu0 %v1477_v48, %s5502_s2  ;;  %v1052_v29 = vrot.slane %v1045_v33, 1  ;;  %v1557_v11 = vsel %vm1362_vm7, %v1555_v23, %v5556_v52  ;;  %v1595_v41 = vrot.slane %v1589_v20, 3  ;;  %v1661_v23 = vmul.f32 %v3995_v36, %v4178_v63 }
 0x1e2   : > { %976 = vrot.lane.b32.xlu1 %v973_v45, %s5493_s7  ;;  %v4165_v45 = vmul.f32 %v4155_v30, %v3454_v61  ;;  %v4201_v33 = vstv %s2660_s13  ;;  %s4707_s13 = sld [smem:[#allocation5 + $0x46]] }
 0x1e3   : > { %v4152_v46 = vpop.permute.xlu0 %1034  ;;  %v4213_v20 = vmul.f32 %v4209_v39, %v4201_v33 }
 0x1e4   : > { %v4157_v48 = vpop.permute.xlu1 %803  ;;  %v5559_v55 = vrot.slane %v4165_v45, 3 }
 0x1e5   : > { %5552 = vst [vmem:[#allocation34_spill] sm:$0xff] %v4157_v48  ;;  %1520 = vrot.lane.b32.xlu0 %v1517_v42, %s5493_s7 }
 0x1e6   : > { %1016 = vrot.lane.b32.xlu1 %v1013_v59, %s5494_s16  ;;  %v1053_v59 = vsel %vm816_vm5, %v5558_v53, %v1052_v29  ;;  %v1597_v29 = vsel %vm1362_vm7, %v1595_v41, %v5559_v55  ;;  %v5560_v53 = vrot.slane %v3849_v31, 2  ;;  %v1667_v41 = vrot.slane %v1661_v23, 4 }
 0x1e7   : > { %v4176_v56 = vpop.permute.xlu0 %1074  ;;  %v1681_v55 = vmul.f32 %v4006_v60, %v4201_v33  ;;  %v5562_v31 = vrot.slane %v4188_v0, 4  ;;  %v5563_v23 = vrot.slane %v3866_v58, 2  ;;  %v5565_v58 = vrot.slane %v4213_v20, 4 }
 0x1e8   : > { %v4180_v42 = vpop.permute.xlu1 %660 }
 0x1e9   : > { %1560 = vrot.lane.b32.xlu0 %v1557_v11, %s5494_s16  ;;  %v1669_v22 = vsel %vm203_vm0, %v1667_v41, %v5562_v31  ;;  %v1687_v19 = vrot.slane %v1681_v55, 4  ;;  %v1701_v41 = vmul.f32 %v3995_v36, %v4226_v2  ;;  %v5566_v55 = vrot.slane %v3886_v9, 2 }
 0x1ea   : > { %1056 = vrot.lane.b32.xlu1 %v1053_v59, %s5495_s0  ;;  %v1126_v59 = vsel %vm1089_vm6, %v5560_v53, %v1125_v40  ;;  %v1166_v53 = vsel %vm1089_vm6, %v5563_v23, %v1165_v10  ;;  %v4249_v40 = vstv %s2661_s20  ;;  %v4272_v10 = vstv %s2613_s22  ;;  %s4734_s20 = sld [smem:[#allocation5 + $0x5a]] }
 0x1eb   : > { %v4199_v52 = vpop.permute.xlu0 %1147  ;;  %v4259_v16 = vmul.f32 %v4209_v39, %v4249_v40  ;;  %v1707_v28 = vrot.slane %v1701_v41, 4  ;;  %v5568_v9 = vrot.slane %v4236_v34, 4  ;;  %v4282_v47 = vmul.f32 %v4272_v10, %v3454_v61  ;;  %s4742_s22 = sld [smem:[#allocation5 + $0x5c]] }
 0x1ec   : > { %v4203_v11 = vpop.permute.xlu1 %686  ;;  %v5569_v41 = vrot.slane %v3905_v44, 2 }
 0x1ed   : > { %1600 = vrot.lane.b32.xlu0 %v1597_v29, %s5495_s0  ;;  %v5572_v44 = vrot.slane %v4259_v16, 4 }
 0x1ee   : > { %1129 = vrot.lane.b32.xlu1 %v1126_v59, %s5496_s1  ;;  %v1205_v59 = vrot.slane %v1198_v17, 2  ;;  %v1689_v17 = vsel %vm203_vm0, %v1687_v19, %v5565_v58  ;;  %v1721_v19 = vmul.f32 %v4006_v60, %v4249_v40 }
 0x1ef   : > { %v4224_v50 = vpop.permute.xlu0 %1187 }
 0x1f0   : > { %5561 = vst [vmem:[#allocation29_spill] sm:$0xff] %v4224_v50  ;;  %v4228_v29 = vpop.permute.xlu1 %712  ;;  %v1206_v23 = vsel %vm1089_vm6, %v5566_v55, %v1205_v59  ;;  %v4295_v59 = vstv %s2662_s28  ;;  %v1551_v50 = vmul.f32 %v4121_v35, %v3938_v24  ;;  %s4748_s28 = sld [smem:[#allocation5 + $0x2b]] }
 0x1f1   : > { %1672 = vrot.lane.b32.xlu0 %v1669_v22, %s5496_s1 }
 0x1f2   : > { %1169 = vrot.lane.b32.xlu1 %v1166_v53, %s5499_s10  ;;  %v1245_v53 = vrot.slane %v1238_v5, 2  ;;  %v1709_v5 = vsel %vm203_vm0, %v1707_v28, %v5568_v9  ;;  %v1741_v28 = vmul.f32 %v3995_v36, %v4272_v10 }
 0x1f3   : > { %v4247_v31 = vpop.permute.xlu0 %1227 }
 0x1f4   : > { %5564 = vst [vmem:[#allocation35_spill] sm:$0xff] %v4247_v31  ;;  %v4251_v22 = vpop.permute.xlu1 %738  ;;  %v1246_v55 = vsel %vm1089_vm6, %v5569_v41, %v1245_v53  ;;  %v1727_v31 = vrot.slane %v1721_v19, 4  ;;  %v5573_v19 = vrot.slane %v3928_v25, 2  ;;  %v1747_v48 = vrot.slane %v1741_v28, 4 }
 0x1f5   : > { %1692 = vrot.lane.b32.xlu0 %v1689_v17, %s5496_s1  ;;  %v4318_v53 = vstv %s2614_s4  ;;  %v5576_v25 = vrot.slane %v4282_v47, 4  ;;  %v5577_v28 = vrot.slane %v3955_v14, 2  ;;  %s4848_s4 = sld [smem:[#allocation5 + $0x2c]] }
 0x1f6   : > { %1209 = vrot.lane.b32.xlu1 %v1206_v23, %s5502_s2  ;;  %v1285_v23 = vrot.slane %v1278_v32, 2  ;;  %v1729_v32 = vsel %vm203_vm0, %v1727_v31, %v5572_v44  ;;  %v1761_v31 = vmul.f32 %v4006_v60, %v4295_v59 }
 0x1f7   : > { %v4270_v58 = vpop.permute.xlu0 %1267 }
 0x1f8   : > { %5567 = vst [vmem:[#allocation36_spill] sm:$0xff] %v4270_v58  ;;  %v4274_v17 = vpop.permute.xlu1 %764  ;;  %v1318_v58 = vmul.f32 %v3945_v43, %v3938_v24  ;;  %v4305_v43 = vmul.f32 %v4209_v39, %v4295_v59  ;;  %v1286_v41 = vsel %vm1089_vm6, %v5573_v19, %v1285_v23 }
 0x1f9   : > { %1712 = vrot.lane.b32.xlu0 %v1709_v5, %s5499_s10 }
 0x1fa   : > { %1249 = vrot.lane.b32.xlu1 %v1246_v55, %s5493_s7  ;;  %v1325_v55 = vrot.slane %v1318_v58, 2  ;;  %v1749_v58 = vsel %vm203_vm0, %v1747_v48, %v5576_v25  ;;  %v5455_v23 = vrot.slane %v4305_v43, 4  ;;  %v1781_v48 = vmul.f32 %v3995_v36, %v4318_v53 }
 0x1fb   : > { %v4293_v9 = vpop.permute.xlu0 %1307 }
 0x1fc   : > { %5570 = vst [vmem:[#allocation46_spill] sm:$0xff] %v4293_v9  ;;  %v4297_v5 = vpop.permute.xlu1 %790  ;;  %v1391_v9 = vmul.f32 %v3967_v26, %v3938_v24  ;;  %v4328_v26 = vmul.f32 %v4318_v53, %v3454_v61  ;;  %v1326_v19 = vsel %vm1089_vm6, %v5577_v28, %v1325_v55  ;;  %v4341_v61 = vstv %s2663_s27  ;;  %s4870_s27 = sld [smem:[#allocation5 + $0x5d]] }
 0x1fd   : > { %5571 = vst [vmem:[#allocation47_spill] sm:$0xff] %v4297_v5  ;;  %1732 = vrot.lane.b32.xlu0 %v1729_v32, %s5499_s10  ;;  %v5580_v55 = vrot.slane %v3979_v6, 3 }
 0x1fe   : > { %1289 = vrot.lane.b32.xlu1 %v1286_v41, %s5494_s16  ;;  %v1398_v41 = vrot.slane %v1391_v9, 3  ;;  %v4364_v9 = vstv %s2615_s5  ;;  %v5583_v6 = vrot.slane %v4328_v26, 4  ;;  %s4875_s5 = sld [smem:[#allocation5 + $0x4d]] }
 0x1ff   : > { %v4316_v44 = vpop.permute.xlu0 %1347 }
 0x200   : > { %5574 = vst [vmem:[#allocation48_spill] sm:$0xff] %v4316_v44  ;;  %v4320_v32 = vpop.permute.xlu1 %876  ;;  %v1431_v44 = vmul.f32 %v3993_v13, %v3938_v24  ;;  %v4351_v13 = vmul.f32 %v4209_v39, %v4341_v61 }
 0x201   : > { %5575 = vst [vmem:[#allocation49_spill] sm:$0xff] %v4320_v32  ;;  %1752 = vrot.lane.b32.xlu0 %v1749_v58, %s5502_s2  ;;  %v1767_v32 = vrot.slane %v1761_v31, 4  ;;  %v1399_v31 = vsel %vm1362_vm7, %v5580_v55, %v1398_v41  ;;  %v5585_v55 = vrot.slane %v4024_v38, 3 }
 0x202   : > { %1329 = vrot.lane.b32.xlu1 %v1326_v19, %s5495_s0  ;;  %v1438_v28 = vrot.slane %v1431_v44, 3  ;;  %v1471_v19 = vmul.f32 %v4002_v1, %v3938_v24  ;;  %v4372_v1 = vld [vmem:[#allocation4 + $0x8] sm:$0xff] }
 0x203   : > { %v4339_v25 = vpop.permute.xlu0 %1420  ;;  %v1769_v14 = vsel %vm203_vm0, %v1767_v32, %v5455_v23  ;;  %v1801_v32 = vmul.f32 %v4006_v60, %v4341_v61 }
 0x204   : > { %5578 = vst [vmem:[#allocation50_spill] sm:$0xff] %v4339_v25  ;;  %v4343_v58 = vpop.permute.xlu1 %916  ;;  %v1787_v25 = vrot.slane %v1781_v48, 4  ;;  %v4376_v48 = vmul.f32 %v4372_v1, %v4364_v9 }
 0x205   : > { %5579 = vst [vmem:[#allocation51_spill] sm:$0xff] %v4343_v58  ;;  %1772 = vrot.lane.b32.xlu0 %v1769_v14, %s5502_s2  ;;  %v4389_v58 = vstv %s2664_s17  ;;  %s4891_s17 = sld [smem:[#allocation5 + $0x5e]] }
 0x206   : > { %1402 = vrot.lane.b32.xlu1 %v1399_v31, %s5496_s1  ;;  %v1789_v44 = vsel %vm203_vm0, %v1787_v25, %v5583_v6  ;;  %5584 = vst [vmem:[#allocation54_spill] sm:$0xff] %v4376_v48  ;;  %v1439_v31 = vsel %vm1362_vm7, %v5585_v55, %v1438_v28  ;;  %v1807_v25 = vrot.slane %v1801_v32, 4  ;;  %v1821_v6 = vmul.f32 %v3995_v36, %v4364_v9 }
 0x207   : > { %v4362_v23 = vpop.permute.xlu0 %1460  ;;  %v5589_v28 = vrot.slane %v4351_v13, 4  ;;  %v4401_v32 = vmul.f32 %v4209_v39, %v4389_v58 }
 0x208   : > { %5581 = vst [vmem:[#allocation52_spill] sm:$0xff] %v4362_v23  ;;  %v4366_v14 = vpop.permute.xlu1 %956  ;;  %v1478_v23 = vrot.slane %v1471_v19, 3 }
 0x209   : > { %5582 = vst [vmem:[#allocation53_spill] sm:$0xff] %v4366_v14  ;;  %1792 = vrot.lane.b32.xlu0 %v1789_v44, %s5493_s7  ;;  %v1511_v14 = vmul.f32 %v4085_v21, %v3938_v24  ;;  %v1809_v19 = vsel %vm203_vm0, %v1807_v25, %v5589_v28  ;;  %v5590_v44 = vstv %s3154_s3  ;;  %v1827_v25 = vrot.slane %v1821_v6, 4  ;;  %s2618_s3 = sld [smem:[#allocation5 + $0x24]] }
 0x20a   : > { %1442 = vrot.lane.b32.xlu1 %v1439_v31, %s5499_s10  ;;  %v645_v55 = vmul.f32 %v4372_v1, %v5590_v44  ;;  %v5591_v31 = vrot.slane %v4059_v54, 3  ;;  %v1841_v28 = vmul.f32 %v4006_v60, %v4389_v58  ;;  %v5592_v21 = vstv %s5586_s21  ;;  %s4911_s21 = sld [smem:[#allocation5 + $0x2d]] }
 0x20b   : > { %v4387_v41 = vpop.permute.xlu0 %1500  ;;  %v650_v5 = vmul.f32 %v4209_v39, %v5592_v21  ;;  %v5596_v21 = vrot.slane %v4101_v3, 3 }
 0x20c   : > { %5587 = vst [vmem:[#allocation55_spill] sm:$0xff] %v4387_v41  ;;  %v4393_v38 = vpop.permute.xlu1 %996  ;;  %v1479_v41 = vsel %vm1362_vm7, %v5591_v31, %v1478_v23  ;;  %v5595_v23 = vrot.slane %v4376_v48, 4 }
 0x20d   : > { %5588 = vst [vmem:[#allocation56_spill] sm:$0xff] %v4393_v38  ;;  %1812 = vrot.lane.b32.xlu0 %v1809_v19, %s5493_s7  ;;  %v1518_v38 = vrot.slane %v1511_v14, 3  ;;  %v4420_v19 = vstv %s2616_s19  ;;  %v652_v6 = vadd.f32 %v650_v5, %v645_v55  ;;  %v4445_v5 = vstv %s4391_s6  ;;  %s4899_s19 = sld [smem:[#allocation5 + $0x5f]] }
 0x20e   : > { %1482 = vrot.lane.b32.xlu1 %v1479_v41, %s5502_s2  ;;  %v1829_v35 = vsel %vm203_vm0, %v1827_v25, %v5595_v23  ;;  %v4430_v41 = vmul.f32 %v4372_v1, %v4420_v19  ;;  %v1847_v25 = vrot.slane %v1841_v28, 4  ;;  %v1861_v23 = vmul.f32 %v3995_v36, %v4420_v19  ;;  %s4930_s6 = sld [smem:[#allocation5 + $0x1c]] }
 0x20f   : > { %v4418_v44 = vpop.permute.xlu0 %1540  ;;  %v1519_v31 = vsel %vm1362_vm7, %v5596_v21, %v1518_v38  ;;  %v665_v14 = vadd.f32 %v4180_v42, %v652_v6  ;;  %v4455_v55 = vmul.f32 %v4209_v39, %v4445_v5  ;;  %v5598_v42 = vrot.slane %v4136_v18, 3 }
 0x210   : > { %5593 = vst [vmem:[#allocation57_spill] sm:$0xff] %v4418_v44  ;;  %v4422_v54 = vpop.permute.xlu1 %1036  ;;  %v1558_v44 = vrot.slane %v1551_v50, 3  ;;  %v5597_v50 = vrot.slane %v4401_v32, 4  ;;  %v1663_v6 = vmul.f32 %v4178_v63, %v3938_v24  ;;  %v1867_v21 = vrot.slane %v1861_v23, 4 }
 0x211   : > { %5594 = vst [vmem:[#allocation58_spill] sm:$0xff] %v4422_v54  ;;  %1832 = vrot.lane.b32.xlu0 %v1829_v35, %s5494_s16  ;;  %v1591_v54 = vmul.f32 %v4155_v30, %v3938_v24  ;;  %v4469_v30 = vstv %s2618_s3  ;;  %s4939_s3 = sld [smem:[#allocation5 + $0x2e]] }
 0x212   : > { %1522 = vrot.lane.b32.xlu1 %v1519_v31, %s5493_s7  ;;  %v1849_v38 = vsel %vm203_vm0, %v1847_v25, %v5597_v50  ;;  %v1559_v28 = vsel %vm1362_vm7, %v5598_v42, %v1558_v44  ;;  %v1881_v31 = vmul.f32 %v4006_v60, %v4445_v5  ;;  %v678_v25 = vadd.f32 %v3971_v7, %v665_v14 }
 0x213   : > { %v4442_v48 = vpop.permute.xlu0 %1580  ;;  %v1598_v35 = vrot.slane %v1591_v54, 3  ;;  %v5600_v44 = vrot.slane %v4430_v41, 4  ;;  %v4481_v23 = vmul.f32 %v4372_v1, %v4469_v30  ;;  %v5601_v7 = vrot.slane %v4165_v45, 3 }
 0x214   : > { %v4447_v3 = vpop.permute.xlu1 %1076  ;;  %v1683_v42 = vmul.f32 %v4201_v33, %v3638_v12  ;;  %v5602_v12 = vrot.slane %v4455_v55, 4 }
 0x215   : > { %1852 = vrot.lane.b32.xlu0 %v1849_v38, %s5494_s16  ;;  %v1869_v63 = vsel %vm203_vm0, %v1867_v21, %v5600_v44  ;;  %v1599_v14 = vsel %vm1362_vm7, %v5601_v7, %v1598_v35  ;;  %v1670_v38 = vrot.slane %v1663_v6, 4  ;;  %v1934_v21 = vmul.f32 %v3995_v36, %v4469_v30 }
 0x216   : > { %1562 = vrot.lane.b32.xlu1 %v1559_v28, %s5494_s16  ;;  %v1887_v28 = vrot.slane %v1881_v31, 4  ;;  %v691_v44 = vadd.f32 %v4203_v11, %v678_v25  ;;  %v5460_v6 = vrot.slane %v4481_v23, 5  ;;  %v5603_v11 = vrot.slane %v4188_v0, 4 }
 0x217   : > { %v4467_v50 = vpop.permute.xlu0 %1620  ;;  %v1940_v7 = vrot.slane %v1934_v21, 5  ;;  %v4522_v0 = vstv %s4471_s8  ;;  %s5060_s8 = sld [smem:[#allocation5 + $0x60]] }
 0x218   : > { %5599 = vst [vmem:[#allocation59_spill] sm:$0xff] %v4467_v50  ;;  %v4473_v18 = vpop.permute.xlu1 %1149  ;;  %v4493_v50 = vstv %s2667_s15  ;;  %v1889_v33 = vsel %vm203_vm0, %v1887_v28, %v5602_v12  ;;  %v1671_v25 = vsel %vm203_vm0, %v5603_v11, %v1670_v38  ;;  %v704_v28 = vadd.f32 %v4016_v57, %v691_v44  ;;  %s4971_s15 = sld [smem:[#allocation5 + $0x2f]] }
 0x219   : > { %1872 = vrot.lane.b32.xlu0 %v1869_v63, %s5495_s0  ;;  %v4506_v31 = vmul.f32 %v4209_v39, %v4493_v50  ;;  %v1703_v63 = vmul.f32 %v4226_v2, %v3938_v24  ;;  %v4534_v21 = vmul.f32 %v4372_v1, %v4522_v0  ;;  %v5604_v57 = vrot.slane %v4213_v20, 4 }
 0x21a   : > { %1602 = vrot.lane.b32.xlu1 %v1599_v14, %s5495_s0  ;;  %v1954_v14 = vmul.f32 %v4006_v60, %v4493_v50  ;;  %v717_v20 = vadd.f32 %v4228_v29, %v704_v28  ;;  %v5606_v29 = vrot.slane %v4236_v34, 4 }
 0x21b   : > { %v855_v54 = vpop.permute.xlu0 %854  ;;  %v5458_v2 = vrot.slane %v4506_v31, 5 }
 0x21c   : > { %v860_v45 = vadd.f32 %v855_v54, %v3826_v51  ;;  %v4498_v35 = vpop.permute.xlu1 %1189  ;;  %v1690_v51 = vrot.slane %v1683_v42, 4 }
 0x21d   : > { %1892 = vrot.lane.b32.xlu0 %v1889_v33, %s5495_s0  ;;  %v4540_v33 = vld [vmem:[#allocation4 + $0x28] sm:$0x3f] }
 0x21e   : > { %v880_v54 = vadd.f32 %v3999_v4, %v860_v45  ;;  %1674 = vrot.lane.b32.xlu1 %v1671_v25, %s5496_s1  ;;  %v1942_v4 = vsel %vm1907_vm8, %v1940_v7, %v5460_v6  ;;  %v1691_v44 = vsel %vm203_vm0, %v5604_v57, %v1690_v51  ;;  %v1710_v45 = vrot.slane %v1703_v63, 4 }
 0x21f   : > { %v895_v12 = vpop.permute.xlu0 %894  ;;  %v1723_v11 = vmul.f32 %v4540_v33, %v4249_v40  ;;  %v1974_v7 = vmul.f32 %v3995_v36, %v4522_v0  ;;  %v4552_v51 = vstv %s4495_s24  ;;  %v1743_v57 = vmul.f32 %v4272_v10, %v3938_v24  ;;  %s5083_s24 = sld [smem:[#allocation5 + $0x30]] }
 0x220   : > { %v900_v38 = vadd.f32 %v895_v12, %v880_v54  ;;  %v4526_v42 = vpop.permute.xlu1 %1229  ;;  %v1960_v54 = vrot.slane %v1954_v14, 5  ;;  %v5457_v14 = vrot.slane %v4534_v21, 5  ;;  %v1711_v28 = vsel %vm203_vm0, %v5606_v29, %v1710_v45 }
 0x221   : > { %1945 = vrot.lane.b32.xlu0 %v1942_v4, %s5496_s1  ;;  %v1730_v4 = vrot.slane %v1723_v11, 4  ;;  %v4583_v45 = vstv %s4524_s23  ;;  %v1750_v29 = vrot.slane %v1743_v57, 4  ;;  %v4645_v6 = vstv %s4576_s30  ;;  %s5720_s30 = sld [smem:[#allocation68_spill]] }
 0x222   : > { %v920_v25 = vadd.f32 %v4043_v8, %v900_v38  ;;  %1694 = vrot.lane.b32.xlu1 %v1691_v44, %s5496_s1  ;;  %v1962_v8 = vsel %vm1907_vm8, %v1960_v54, %v5458_v2  ;;  %v4564_v38 = vmul.f32 %v4209_v39, %v4552_v51  ;;  %v1994_v54 = vmul.f32 %v4006_v60, %v4552_v51 }
 0x223   : > { %v935_v12 = vpop.permute.xlu0 %934 }
 0x224   : > { %v940_v63 = vadd.f32 %v935_v12, %v920_v25  ;;  %v4556_v40 = vpop.permute.xlu1 %1269  ;;  %v1980_v25 = vrot.slane %v1974_v7, 5  ;;  %v730_v12 = vadd.f32 %v4051_v15, %v717_v20  ;;  %v5459_v7 = vrot.slane %v4564_v38, 5 }
 0x225   : > { %5605 = vst [vmem:[#allocation60_spill] sm:$0xff] %v4556_v40  ;;  %1965 = vrot.lane.b32.xlu0 %v1962_v8, %s5496_s1  ;;  %v4580_v8 = vstv %s4518_s25  ;;  %v5608_v15 = vrot.slane %v4259_v16, 4  ;;  %s5113_s25 = sld [smem:[#allocation5 + $0x61]] }
 0x226   : > { %v960_v44 = vadd.f32 %v4082_v27, %v940_v63  ;;  %1714 = vrot.lane.b32.xlu1 %v1711_v28, %s5499_s10  ;;  %v1982_v27 = vsel %vm1907_vm8, %v1980_v25, %v5457_v14  ;;  %v4593_v63 = vmul.f32 %v4372_v1, %v4583_v45  ;;  %v1763_v28 = vmul.f32 %v4540_v33, %v4295_v59 }
 0x227   : > { %v975_v34 = vpop.permute.xlu0 %974  ;;  %v1731_v20 = vsel %vm203_vm0, %v5608_v15, %v1730_v4  ;;  %v2000_v25 = vrot.slane %v1994_v54, 5  ;;  %v2014_v14 = vmul.f32 %v3995_v36, %v4583_v45  ;;  %v1083_v16 = vmul.f32 %v3995_v36, %v4580_v8 }
 0x228   : > { %v980_v11 = vadd.f32 %v975_v34, %v960_v44  ;;  %v4585_v10 = vpop.permute.xlu1 %1309  ;;  %v4604_v34 = vstv %s4548_s26  ;;  %v4613_v4 = vmul.f32 %v4372_v1, %v4580_v8  ;;  %v4616_v59 = vstv %s4554_s29 }
 0x229   : > { %5607 = vst [vmem:[#allocation61_spill] sm:$0xff] %v4585_v10  ;;  %1985 = vrot.lane.b32.xlu0 %v1982_v27, %s5499_s10  ;;  %v743_v27 = vadd.f32 %v4251_v22, %v730_v12  ;;  %v2002_v22 = vsel %vm1907_vm8, %v2000_v25, %v5459_v7  ;;  %v4628_v12 = vmul.f32 %v4209_v39, %v4616_v59  ;;  %v2020_v7 = vrot.slane %v2014_v14, 5 }
 0x22a   : > { %v1000_v44 = vadd.f32 %v4118_v62, %v980_v11  ;;  %1734 = vrot.lane.b32.xlu1 %v1731_v20, %s5499_s10  ;;  %v5610_v11 = vrot.slane %v4282_v47, 4  ;;  %v1770_v20 = vrot.slane %v1763_v28, 4  ;;  %v1100_v28 = vmul.f32 %v4006_v60, %v4604_v34 }
 0x22b   : > { %v1015_v2 = vpop.permute.xlu0 %1014  ;;  %v756_v47 = vadd.f32 %v4093_v49, %v743_v27  ;;  %v5612_v14 = vrot.slane %v4593_v63, 5  ;;  %v4661_v49 = vmul.f32 %v4372_v1, %v4645_v6  ;;  %v2054_v27 = vmul.f32 %v3995_v36, %v4645_v6 }
 0x22c   : > { %v1020_v62 = vadd.f32 %v1015_v2, %v1000_v44  ;;  %v4620_v57 = vpop.permute.xlu1 %1349  ;;  %v1751_v15 = vsel %vm203_vm0, %v5610_v11, %v1750_v29  ;;  %v4636_v2 = vmul.f32 %v4209_v39, %v4604_v34  ;;  %v1783_v44 = vmul.f32 %v4318_v53, %v3938_v24 }
 0x22d   : > { %5609 = vst [vmem:[#allocation62_spill] sm:$0xff] %v4620_v57  ;;  %2005 = vrot.lane.b32.xlu0 %v2002_v22, %s5499_s10  ;;  %v2034_v22 = vmul.f32 %v4006_v60, %v4616_v59  ;;  %v1090_v29 = vrot.slane %v1083_v16, 2  ;;  %v5613_v16 = vrot.slane %v4305_v43, 4  ;;  %v1803_v11 = vmul.f32 %v4540_v33, %v4341_v61 }
 0x22e   : > { %v1040_v25 = vadd.f32 %v4152_v46, %v1020_v62  ;;  %1754 = vrot.lane.b32.xlu1 %v1751_v15, %s5502_s2  ;;  %v2022_v62 = vsel %vm1907_vm8, %v2020_v7, %v5612_v14  ;;  %v5614_v43 = vrot.slane %v4613_v4, 2  ;;  %v4681_v15 = vstv %s4618_s18 }
 0x22f   : > { %v1055_v54 = vpop.permute.xlu0 %1054  ;;  %v2040_v14 = vrot.slane %v2034_v22, 5  ;;  %v5616_v22 = vrot.slane %v4628_v12, 5 }
 0x230   : > { %v1060_v46 = vadd.f32 %v1055_v54, %v1040_v25  ;;  %v4653_v53 = vpop.permute.xlu1 %1422  ;;  %v1771_v54 = vsel %vm203_vm0, %v5613_v16, %v1770_v20  ;;  %v1790_v25 = vrot.slane %v1783_v44, 4  ;;  %v1092_v20 = vsel %vm1089_vm6, %v1090_v29, %v5614_v43 }
 0x231   : > { %5611 = vst [vmem:[#allocation63_spill] sm:$0xff] %v4653_v53  ;;  %2025 = vrot.lane.b32.xlu0 %v2022_v62, %s5502_s2  ;;  %v769_v62 = vadd.f32 %v4274_v17, %v756_v47  ;;  %v1106_v44 = vrot.slane %v1100_v28, 2  ;;  %v4693_v47 = vmul.f32 %v4209_v39, %v4681_v15  ;;  %v5617_v29 = vrot.slane %v4636_v2, 2  ;;  %v5630_v53 = vld [vmem:[#allocation34_spill] sm:$0xff] }
 0x232   : > { %v1080_v7 = vadd.f32 %v4176_v56, %v1060_v46  ;;  %1774 = vrot.lane.b32.xlu1 %v1771_v54, %s5502_s2  ;;  %v2042_v46 = vsel %vm1907_vm8, %v2040_v14, %v5616_v22  ;;  %v5618_v54 = vrot.slane %v4328_v26, 4  ;;  %v1810_v43 = vrot.slane %v1803_v11, 4 }
 0x233   : > { %v1128_v16 = vpop.permute.xlu0 %1127  ;;  %v1108_v28 = vsel %vm1089_vm6, %v1106_v44, %v5617_v29  ;;  %v1823_v14 = vmul.f32 %v4364_v9, %v3938_v24  ;;  %v2060_v22 = vrot.slane %v2054_v27, 5  ;;  %v2074_v17 = vmul.f32 %v4006_v60, %v4681_v15 }
 0x234   : > { %v1097_v61 = vadd.f32 %v1092_v20, %v1080_v7  ;;  %v4685_v56 = vpop.permute.xlu1 %1462  ;;  %v1791_v7 = vsel %vm203_vm0, %v5618_v54, %v1790_v25  ;;  %v782_v44 = vadd.f32 %v4128_v37, %v769_v62  ;;  %v4711_v26 = vstv %s4651_s9 }
 0x235   : > { %5615 = vst [vmem:[#allocation64_spill] sm:$0xff] %v4685_v56  ;;  %2045 = vrot.lane.b32.xlu0 %v2042_v46, %s5502_s2  ;;  %v5620_v9 = vrot.slane %v4661_v49, 5  ;;  %v4723_v29 = vmul.f32 %v4372_v1, %v4711_v26  ;;  %v5621_v37 = vrot.slane %v4351_v13, 4  ;;  %v4732_v54 = vstv %s4670_s11 }
 0x236   : > { %v1113_v20 = vadd.f32 %v1108_v28, %v1097_v61  ;;  %1794 = vrot.lane.b32.xlu1 %v1791_v7, %s5493_s7  ;;  %v1843_v28 = vmul.f32 %v4540_v33, %v4389_v58  ;;  %v5622_v7 = vld [vmem:[#allocation26_spill] sm:$0xff]  ;;  %v2094_v13 = vmul.f32 %v3995_v36, %v4711_v26 }
 0x237   : > { %v1168_v46 = vpop.permute.xlu0 %1167  ;;  %v2062_v27 = vsel %vm1907_vm8, %v2060_v22, %v5620_v9  ;;  %v1811_v62 = vsel %vm203_vm0, %v5621_v37, %v1810_v43  ;;  %v2080_v9 = vrot.slane %v2074_v17, 5  ;;  %v5623_v43 = vld [vmem:[#allocation47_spill] sm:$0xff] }
 0x238   : > { %v1133_v11 = vadd.f32 %v1128_v16, %v1113_v20  ;;  %v4715_v25 = vpop.permute.xlu1 %1502  ;;  %v1830_v16 = vrot.slane %v1823_v14, 4  ;;  %v812_v20 = vmul.f32 %v5622_v7, %v3938_v24  ;;  %v795_v14 = vadd.f32 %v5623_v43, %v782_v44  ;;  %v5626_v44 = vld [vmem:[#allocation54_spill] sm:$0xff] }
 0x239   : > { %5619 = vst [vmem:[#allocation65_spill] sm:$0xff] %v4715_v25  ;;  %2065 = vrot.lane.b32.xlu0 %v2062_v27, %s5493_s7  ;;  %v4746_v27 = vstv %s4683_s12  ;;  %v5627_v7 = vrot.slane %v5626_v44, 4  ;;  %v2114_v43 = vmul.f32 %v4006_v60, %v4732_v54  ;;  %v5629_v25 = vld [vmem:[#allocation29_spill] sm:$0xff]  ;;  %s2958_s12 = smov [#allocation10]  }
 0x23a   : > { %v1153_v22 = vadd.f32 %v4199_v52, %v1133_v11  ;;  %1814 = vrot.lane.b32.xlu1 %v1811_v62, %s5493_s7  ;;  %v5625_v52 = vrot.slane %v4693_v47, 5  ;;  %v4758_v62 = vmul.f32 %v4209_v39, %v4732_v54  ;;  %v808_v44 = vadd.f32 %v5630_v53, %v795_v14 }
 0x23b   : > { %v1208_v58 = vpop.permute.xlu0 %1207  ;;  %v4787_v53 = vmul.f32 %v4372_v1, %v4746_v27  ;;  %v2134_v14 = vmul.f32 %v3995_v36, %v4746_v27 }
 0x23c   : > { %v1173_v37 = vadd.f32 %v1168_v46, %v1153_v22  ;;  %v4750_v61 = vpop.permute.xlu1 %1542  ;;  %v2082_v17 = vsel %vm1907_vm8, %v2080_v9, %v5625_v52  ;;  %v1831_v46 = vsel %vm203_vm0, %v5627_v7, %v1830_v16  ;;  %v1850_v22 = vrot.slane %v1843_v28, 4  ;;  %v5628_v52 = vld [vmem:[#allocation27_spill] sm:$0xff] }
 0x23d   : > { %5624 = vst [vmem:[#allocation26_spill] sm:$0xff] %v4750_v61  ;;  %2085 = vrot.lane.b32.xlu0 %v2082_v17, %s5493_s7  ;;  %v1863_v9 = vmul.f32 %v4420_v19, %v3938_v24  ;;  %v829_v11 = vmul.f32 %v4540_v33, %v5628_v52  ;;  %v820_v61 = vrot.slane %v812_v20, 1  ;;  %v2100_v17 = vrot.slane %v2094_v13, 5 }
 0x23e   : > { %v1193_v56 = vadd.f32 %v5629_v25, %v1173_v37  ;;  %1834 = vrot.lane.b32.xlu1 %v1831_v46, %s5494_s16  ;;  %v4774_v16 = vstv %s4713_s14  ;;  %v4777_v28 = vstv %s4707_s13  ;;  %v5632_v24 = vrot.slane %v4723_v29, 5  ;;  %v5634_v46 = vld [vmem:[#allocation31_spill] sm:$0xff]  ;;  %s2850_s13 = sshll.u32 %s2958_s12, 4  ;;  %s2851_s13 = int_to_ptr.vmem [resolvable:$false] %s2850_s13 }
 0x23f   : > { %v1248_v57 = vpop.permute.xlu0 %1247  ;;  %v5633_v20 = vrot.slane %v4401_v32, 4  ;;  %v1870_v13 = vrot.slane %v1863_v9, 4  ;;  %v836_v37 = vrot.slane %v829_v11, 1  ;;  %v5635_v52 = vrot.slane %v5634_v46, 1  ;;  %v4827_v46 = vld [vmem:[#allocation4 + $0x10] sm:$0x3f] }
 0x240   : > { %v1213_v7 = vadd.f32 %v1208_v58, %v1193_v56  ;;  %v4779_v10 = vpop.permute.xlu1 %1582  ;;  %v2102_v19 = vsel %vm1907_vm8, %v2100_v17, %v5632_v24  ;;  %v1883_v58 = vmul.f32 %v4540_v33, %v4445_v5  ;;  %v5636_v24 = vld [vmem:[#allocation35_spill] sm:$0xff]  ;;  %v4806_v9 = vstv %s4748_s28  ;;  %s2852_s14 = scalar_lea.vmem %s2851_s13, 512 }
 0x241   : > { %5631 = vst [vmem:[#allocation47_spill] sm:$0xff] %v4779_v10  ;;  %2105 = vrot.lane.b32.xlu0 %v2102_v19, %s5494_s16  ;;  %v1851_v56 = vsel %vm203_vm0, %v5633_v20, %v1850_v22  ;;  %v821_v17 = vsel %vm816_vm5, %v5635_v52, %v820_v61  ;;  %v2120_v19 = vrot.slane %v2114_v43, 5  ;;  %v4803_v22 = vstv %s4734_s20 }
 0x242   : > { %v1233_v25 = vadd.f32 %v5636_v24, %v1213_v7  ;;  %1854 = vrot.lane.b32.xlu1 %v1851_v56, %s5494_s16  ;;  %v825_v32 = vadd.f32 %v821_v17, %v808_v44  ;;  %v4809_v20 = vstv %s4742_s22  ;;  %v5638_v11 = vrot.slane %v4758_v62, 5  ;;  %v5640_v17 = vld [vmem:[#allocation30_spill] sm:$0xff] }
 0x243   : > { %v1288_v10 = vpop.permute.xlu0 %1287  ;;  %v4819_v43 = vmul.f32 %v4209_v39, %v4803_v22  ;;  %v5639_v44 = vrot.slane %v4430_v41, 4  ;;  %v1936_v52 = vmul.f32 %v4827_v46, %v4469_v30  ;;  %v5641_v24 = vrot.slane %v5640_v17, 1 }
 0x244   : > { %v1253_v40 = vadd.f32 %v1248_v57, %v1233_v25  ;;  %v4811_v5 = vpop.permute.xlu1 %1622  ;;  %v2122_v61 = vsel %vm1907_vm8, %v2120_v19, %v5638_v11  ;;  %v1356_v57 = vmul.f32 %v3995_v36, %v4774_v16  ;;  %v1890_v25 = vrot.slane %v1883_v58, 4  ;;  %v5642_v11 = vld [vmem:[#allocation36_spill] sm:$0xff] }
 0x245   : > { %5637 = vst [vmem:[#allocation54_spill] sm:$0xff] %v4811_v5  ;;  %2125 = vrot.lane.b32.xlu0 %v2122_v61, %s5494_s16  ;;  %v1871_v56 = vsel %vm203_vm0, %v5639_v44, %v1870_v13  ;;  %v837_v19 = vsel %vm816_vm5, %v5641_v24, %v836_v37  ;;  %v2140_v41 = vrot.slane %v2134_v14, 5  ;;  %v2154_v13 = vmul.f32 %v4006_v60, %v4803_v22 }
 0x246   : > { %v1273_v7 = vadd.f32 %v5642_v11, %v1253_v40  ;;  %1874 = vrot.lane.b32.xlu1 %v1871_v56, %s5495_s0  ;;  %v841_v61 = vadd.f32 %v837_v19, %v825_v32  ;;  %v4840_v36 = vmul.f32 %v4372_v1, %v4774_v16  ;;  %v1373_v30 = vmul.f32 %v4006_v60, %v4777_v28  ;;  %v4866_v56 = vld [vmem:[#allocation4] sm:$0xff] }
 0x247   : > { %v4846_v58 = vmul.f32 %v4209_v39, %v4777_v28  ;;  %v1328_v37 = vpop.permute.xlu0 %1327  ;;  %v5643_v44 = vrot.slane %v4787_v53, 5  ;;  %v4856_v17 = vmul.f32 %v4372_v1, %v4806_v9  ;;  %v5644_v24 = vrot.slane %v4455_v55, 4 }
 0x248   : > { %v1293_v40 = vadd.f32 %v1288_v10, %v1273_v7  ;;  %v857_v14 = vpop.permute.xlu1 %856  ;;  %v1943_v11 = vrot.slane %v1936_v52, 5  ;;  %v1956_v10 = vmul.f32 %v4540_v33, %v4493_v50  ;;  %v5645_v7 = vld [vmem:[#allocation46_spill] sm:$0xff]  ;;  %v5461_v55 = vrot.slane %v4840_v36, 3  ;;  %v4895_v52 = vld [vmem:[#allocation4 + $0x18] sm:$0xff] }
 0x249   : > { %v2142_v32 = vsel %vm1907_vm8, %v2140_v41, %v5643_v44  ;;  %v861_v60 = vadd.f32 %v857_v14, %v841_v61  ;;  %v1891_v19 = vsel %vm203_vm0, %v5644_v24, %v1890_v25  ;;  %v1363_v41 = vrot.slane %v1356_v57, 3  ;;  %v5646_v14 = vld [vmem:[#allocation49_spill] sm:$0xff] }
 0x24a   : > { %2145 = vrot.lane.b32.xlu0 %v2142_v32, %s5495_s0  ;;  %v1313_v5 = vadd.f32 %v5645_v7, %v1293_v40  ;;  %1894 = vrot.lane.b32.xlu1 %v1891_v19, %s5495_s0  ;;  %v2160_v44 = vrot.slane %v2154_v13, 5  ;;  %v2207_v61 = vmul.f32 %v4866_v56, %v4806_v9  ;;  %v1379_v25 = vrot.slane %v1373_v30, 3 }
 0x24b   : > { %v881_v50 = vadd.f32 %v5646_v14, %v861_v60  ;;  %v1401_v32 = vpop.permute.xlu0 %1400  ;;  %v5647_v13 = vrot.slane %v4819_v43, 5  ;;  %v4883_v7 = vmul.f32 %v4209_v39, %v4809_v20  ;;  %v5649_v60 = vrot.slane %v4481_v23, 5 }
 0x24c   : > { %v1333_v57 = vadd.f32 %v1328_v37, %v1313_v5  ;;  %v897_v40 = vpop.permute.xlu1 %896  ;;  %v1963_v5 = vrot.slane %v1956_v10, 5  ;;  %v1976_v37 = vmul.f32 %v4827_v46, %v4522_v0  ;;  %v2213_v19 = vrot.slane %v2207_v61, 6  ;;  %v5652_v10 = vld [vmem:[#allocation51_spill] sm:$0xff] }
 0x24d   : > { %v2162_v24 = vsel %vm1907_vm8, %v2160_v44, %v5647_v13  ;;  %5648 = vst [vmem:[#allocation27_spill] sm:$0xff] %v4883_v7  ;;  %v901_v30 = vadd.f32 %v897_v40, %v881_v50  ;;  %v1944_v14 = vsel %vm1907_vm8, %v5649_v60, %v1943_v11  ;;  %v5650_v44 = vld [vmem:[#allocation48_spill] sm:$0xff]  ;;  %v2227_v50 = vmul.f32 %v4895_v52, %v4809_v20 }
 0x24e   : > { %2165 = vrot.lane.b32.xlu0 %v2162_v24, %s5495_s0  ;;  %v1353_v13 = vadd.f32 %v5650_v44, %v1333_v57  ;;  %1947 = vrot.lane.b32.xlu1 %v1944_v14, %s5496_s1  ;;  %v1365_v23 = vsel %vm1362_vm7, %v1363_v41, %v5461_v55  ;;  %v5651_v0 = vrot.slane %v4846_v58, 3  ;;  %v4909_v24 = vstv %s4848_s4 }
 0x24f   : > { %v921_v57 = vadd.f32 %v5652_v10, %v901_v30  ;;  %v1441_v40 = vpop.permute.xlu0 %1440  ;;  %v5653_v14 = vrot.slane %v4856_v17, 6  ;;  %v1996_v10 = vmul.f32 %v4540_v33, %v4552_v51  ;;  %v4934_v41 = vstv %s4870_s27 }
 0x250   : > { %v1381_v11 = vsel %vm1362_vm7, %v1379_v25, %v5651_v0  ;;  %v1370_v61 = vadd.f32 %v1365_v23, %v1353_v13  ;;  %v937_v60 = vpop.permute.xlu1 %936  ;;  %v4919_v25 = vmul.f32 %v4372_v1, %v4909_v24  ;;  %v5655_v0 = vrot.slane %v4506_v31, 5  ;;  %5657 = vst [vmem:[#allocation34_spill] sm:$0xff] %v4934_v41 }
 0x251   : > { %v2215_v44 = vsel %vm2180_vm9, %v2213_v19, %v5653_v14  ;;  %v941_v30 = vadd.f32 %v937_v60, %v921_v57  ;;  %v1983_v23 = vrot.slane %v1976_v37, 5  ;;  %v2233_v19 = vrot.slane %v2227_v50, 6  ;;  %v5656_v57 = vld [vmem:[#allocation53_spill] sm:$0xff] }
 0x252   : > { %5654 = vst [vmem:[#allocation29_spill] sm:$0xff] %v4919_v25  ;;  %2218 = vrot.lane.b32.xlu0 %v2215_v44, %s5496_s1  ;;  %v1964_v13 = vsel %vm1907_vm8, %v5655_v0, %v1963_v5  ;;  %v1386_v55 = vadd.f32 %v1381_v11, %v1370_v61  ;;  %v2247_v14 = vmul.f32 %v4866_v56, %v4909_v24  ;;  %v4937_v31 = vstv %s4875_s5 }
 0x253   : > { %1967 = vrot.lane.b32.xlu1 %v1964_v13, %s5496_s1  ;;  %v961_v60 = vadd.f32 %v5656_v57, %v941_v30  ;;  %v1481_v44 = vpop.permute.xlu0 %1480  ;;  %v5658_v37 = vrot.slane %v4883_v7, 6  ;;  %v4947_v61 = vmul.f32 %v4209_v39, %v4934_v41  ;;  %v5659_v0 = vrot.slane %v4534_v21, 5 }
 0x254   : > { %v1406_v51 = vadd.f32 %v1401_v32, %v1386_v55  ;;  %v977_v5 = vpop.permute.xlu1 %976  ;;  %v2003_v32 = vrot.slane %v1996_v10, 5  ;;  %v2016_v13 = vmul.f32 %v4827_v46, %v4583_v45  ;;  %v2267_v11 = vmul.f32 %v4895_v52, %v4934_v41 }
 0x255   : > { %v2235_v50 = vsel %vm2180_vm9, %v2233_v19, %v5658_v37  ;;  %v981_v30 = vadd.f32 %v977_v5, %v961_v60  ;;  %v1984_v55 = vsel %vm1907_vm8, %v5659_v0, %v1983_v23  ;;  %v5660_v19 = vld [vmem:[#allocation50_spill] sm:$0xff]  ;;  %v2253_v37 = vrot.slane %v2247_v14, 6  ;;  %v5661_v60 = vld [vmem:[#allocation56_spill] sm:$0xff] }
 0x256   : > { %2238 = vrot.lane.b32.xlu0 %v2235_v50, %s5496_s1  ;;  %v1426_v57 = vadd.f32 %v5660_v19, %v1406_v51  ;;  %v4960_v7 = vstv %s4891_s17  ;;  %v1085_v21 = vmul.f32 %v4827_v46, %v4580_v8  ;;  %v4966_v23 = vstv %s4911_s21 }
 0x257   : > { %1987 = vrot.lane.b32.xlu1 %v1984_v55, %s5499_s10  ;;  %v1001_v5 = vadd.f32 %v5661_v60, %v981_v30  ;;  %v1521_v50 = vpop.permute.xlu0 %1520  ;;  %v4969_v10 = vstv %s4899_s19  ;;  %v5662_v14 = vrot.slane %v4919_v25, 6  ;;  %v4979_v30 = vmul.f32 %v4372_v1, %v4966_v23 }
 0x258   : > { %v1446_v45 = vadd.f32 %v1441_v40, %v1426_v57  ;;  %v1017_v51 = vpop.permute.xlu1 %1016  ;;  %v5663_v19 = vrot.slane %v4564_v38, 5  ;;  %v2023_v57 = vrot.slane %v2016_v13, 5  ;;  %v2036_v60 = vmul.f32 %v4540_v33, %v4616_v59 }
 0x259   : > { %v2255_v0 = vsel %vm2180_vm9, %v2253_v37, %v5662_v14  ;;  %v1021_v8 = vadd.f32 %v1017_v51, %v1001_v5  ;;  %v5664_v37 = vld [vmem:[#allocation52_spill] sm:$0xff]  ;;  %v1102_v55 = vmul.f32 %v4540_v33, %v4604_v34  ;;  %v2273_v25 = vrot.slane %v2267_v11, 6  ;;  %v5665_v51 = vld [vmem:[#allocation58_spill] sm:$0xff] }
 0x25a   : > { %2258 = vrot.lane.b32.xlu0 %v2255_v0, %s5499_s10  ;;  %v2004_v40 = vsel %vm1907_vm8, %v5663_v19, %v2003_v32  ;;  %v1466_v14 = vadd.f32 %v5664_v37, %v1446_v45  ;;  %v2287_v5 = vmul.f32 %v4866_v56, %v4966_v23  ;;  %v1093_v41 = vrot.slane %v1085_v21, 2 }
 0x25b   : > { %2007 = vrot.lane.b32.xlu1 %v2004_v40, %s5499_s10  ;;  %v1041_v0 = vadd.f32 %v5665_v51, %v1021_v8  ;;  %v1561_v38 = vpop.permute.xlu0 %1560  ;;  %v4995_v32 = vstv %s4930_s6  ;;  %v4998_v13 = vstv %s4939_s3  ;;  %v5666_v45 = vrot.slane %v4947_v61, 6  ;;  %v5668_v51 = vld [vmem:[#allocation55_spill] sm:$0xff] }
 0x25c   : > { %v1486_v59 = vadd.f32 %v1481_v44, %v1466_v14  ;;  %v1057_v19 = vpop.permute.xlu1 %1056  ;;  %v5006_v11 = vmul.f32 %v4209_v39, %v4960_v7  ;;  %v5667_v21 = vrot.slane %v4593_v63, 5  ;;  %v2043_v44 = vrot.slane %v2036_v60, 5 }
 0x25d   : > { %v2275_v40 = vsel %vm2180_vm9, %v2273_v25, %v5666_v45  ;;  %v1061_v8 = vadd.f32 %v1057_v19, %v1041_v0  ;;  %v2056_v14 = vmul.f32 %v4827_v46, %v4645_v6  ;;  %v1109_v45 = vrot.slane %v1102_v55, 2 }
 0x25e   : > { %2278 = vrot.lane.b32.xlu0 %v2275_v40, %s5499_s10  ;;  %v2024_v37 = vsel %vm1907_vm8, %v5667_v21, %v2023_v57  ;;  %v1506_v25 = vadd.f32 %v5668_v51, %v1486_v59  ;;  %v2293_v34 = vrot.slane %v2287_v5, 6  ;;  %v2307_v39 = vmul.f32 %v4895_v52, %v4960_v7  ;;  %v5672_v51 = vld [vmem:[#allocation57_spill] sm:$0xff] }
 0x25f   : > { %2027 = vrot.lane.b32.xlu1 %v2024_v37, %s5502_s2  ;;  %v5669_v0 = vrot.slane %v4613_v4, 2  ;;  %v1081_v63 = vadd.f32 %v4447_v3, %v1061_v8  ;;  %v1629_v57 = vmul.f32 %v4866_v56, %v4995_v32  ;;  %v1601_v60 = vpop.permute.xlu0 %1600  ;;  %v5025_v6 = vstv %s4971_s15 }
 0x260   : > { %v1526_v59 = vadd.f32 %v1521_v50, %v1506_v25  ;;  %v1130_v55 = vpop.permute.xlu1 %1129  ;;  %v5670_v40 = vrot.slane %v4979_v30, 6  ;;  %v5465_v21 = vrot.slane %v5006_v11, 6  ;;  %v5033_v4 = vmul.f32 %v4372_v1, %v4998_v13 }
 0x261   : > { %v1094_v19 = vsel %vm1089_vm6, %v5669_v0, %v1093_v41  ;;  %v5671_v3 = vrot.slane %v4628_v12, 5  ;;  %v2063_v37 = vrot.slane %v2056_v14, 5  ;;  %v2076_v50 = vmul.f32 %v4540_v33, %v4681_v15 }
 0x262   : > { %v2295_v5 = vsel %vm2180_vm9, %v2293_v34, %v5670_v40  ;;  %v1098_v41 = vadd.f32 %v1094_v19, %v1081_v63  ;;  %v1546_v25 = vadd.f32 %v5672_v51, %v1526_v59  ;;  %v5673_v34 = vrot.slane %v4636_v2, 2 }
 0x263   : > { %2298 = vrot.lane.b32.xlu0 %v2295_v5, %s5502_s2  ;;  %v2044_v8 = vsel %vm1907_vm8, %v5671_v3, %v2043_v44  ;;  %v2313_v40 = vrot.slane %v2307_v39, 6  ;;  %v2327_v19 = vmul.f32 %v4866_v56, %v4998_v13  ;;  %v5050_v12 = vmul.f32 %v4372_v1, %v4995_v32  ;;  %v5054_v44 = vld [vmem:[#allocation4 + $0x20] sm:$0xff]  ;;  %v1673_v14 = vpop.permute.xlu0 %1672 }
 0x264   : > { %v1110_v0 = vsel %vm1089_vm6, %v5673_v34, %v1109_v45  ;;  %2047 = vrot.lane.b32.xlu1 %v2044_v8, %s5502_s2  ;;  %v1645_v15 = vmul.f32 %v4895_v52, %v4937_v31  ;;  %v5058_v2 = vmul.f32 %v5054_v44, %v4937_v31  ;;  %v1566_v45 = vadd.f32 %v1561_v38, %v1546_v25  ;;  %v1170_v39 = vpop.permute.xlu1 %1169 }
 0x265   : > { %v1114_v63 = vadd.f32 %v1110_v0, %v1098_v41  ;;  %v2315_v59 = vsel %vm2180_vm9, %v2313_v40, %v5465_v21  ;;  %v2334_v5 = vrot.slane %v5033_v4, 6  ;;  %v5068_v41 = vmul.f32 %v5054_v44, %v4969_v10 }
 0x266   : > { %v5674_v8 = vrot.slane %v4661_v49, 5  ;;  %v2083_v34 = vrot.slane %v2076_v50, 5  ;;  %v2096_v38 = vmul.f32 %v4827_v46, %v4711_v26  ;;  %v1586_v25 = vadd.f32 %v4442_v48, %v1566_v45 }
 0x267   : > { %v1134_v3 = vadd.f32 %v1130_v55, %v1114_v63  ;;  %2318 = vrot.lane.b32.xlu0 %v2315_v59, %s5502_s2  ;;  %v1635_v0 = vrot.slane %v1629_v57, 4  ;;  %v2333_v40 = vrot.slane %v2327_v19, 6  ;;  %v2347_v21 = vmul.f32 %v4895_v52, %v4969_v10  ;;  %v1693_v50 = vpop.permute.xlu0 %1692 }
 0x268   : > { %v2064_v51 = vsel %vm1907_vm8, %v5674_v8, %v2063_v37  ;;  %v1636_v55 = vrot.slane %v5050_v12, 4  ;;  %v1651_v63 = vrot.slane %v1645_v15, 4  ;;  %v1652_v49 = vrot.slane %v5058_v2, 4  ;;  %v1210_v59 = vpop.permute.xlu1 %1209  ;;  %v5676_v8 = vld [vmem:[#allocation59_spill] sm:$0xff] }
 0x269   : > { %2067 = vrot.lane.b32.xlu1 %v2064_v51, %s5493_s7  ;;  %v1154_v37 = vadd.f32 %v4473_v18, %v1134_v3  ;;  %v1606_v26 = vadd.f32 %v1601_v60, %v1586_v25  ;;  %v2335_v48 = vsel %vm2180_vm9, %v2333_v40, %v2334_v5  ;;  %v2354_v57 = vrot.slane %v5068_v41, 6 }
 0x26a   : > { %v5091_v19 = vmul.f32 %v4372_v1, %v5025_v6  ;;  %v5675_v18 = vrot.slane %v4693_v47, 5  ;;  %v2103_v60 = vrot.slane %v2096_v38, 5  ;;  %v2116_v3 = vmul.f32 %v4540_v33, %v4732_v54 }
 0x26b   : > { %v1174_v15 = vadd.f32 %v1170_v39, %v1154_v37  ;;  %2338 = vrot.lane.b32.xlu0 %v2335_v48, %s5493_s7  ;;  %v1626_v51 = vadd.f32 %v5676_v8, %v1606_v26  ;;  %v2353_v25 = vrot.slane %v2347_v21, 6  ;;  %v2367_v40 = vmul.f32 %v4866_v56, %v5025_v6  ;;  %v1713_v38 = vpop.permute.xlu0 %1712 }
 0x26c   : > { %v2084_v45 = vsel %vm1907_vm8, %v5675_v18, %v2083_v34  ;;  %v1637_v39 = vsel %vm203_vm0, %v1635_v0, %v1636_v55  ;;  %v1653_v47 = vsel %vm203_vm0, %v1651_v63, %v1652_v49  ;;  %v5111_v54 = vstv %s5060_s8  ;;  %v1250_v21 = vpop.permute.xlu1 %1249 }
 0x26d   : > { %2087 = vrot.lane.b32.xlu1 %v2084_v45, %s5493_s7  ;;  %v1194_v34 = vadd.f32 %v4498_v35, %v1174_v15  ;;  %v1642_v37 = vadd.f32 %v1637_v39, %v1626_v51  ;;  %v2355_v26 = vsel %vm2180_vm9, %v2353_v25, %v2354_v57  ;;  %v2374_v0 = vrot.slane %v5091_v19, 6 }
 0x26e   : > { %v5121_v48 = vmul.f32 %v5054_v44, %v5111_v54  ;;  %v5677_v35 = vrot.slane %v4723_v29, 5  ;;  %v2123_v18 = vrot.slane %v2116_v3, 5  ;;  %v2136_v45 = vmul.f32 %v4827_v46, %v4746_v27 }
 0x26f   : > { %v1214_v63 = vadd.f32 %v1210_v59, %v1194_v34  ;;  %2358 = vrot.lane.b32.xlu0 %v2355_v26, %s5493_s7  ;;  %v1658_v8 = vadd.f32 %v1653_v47, %v1642_v37  ;;  %v2373_v51 = vrot.slane %v2367_v40, 6  ;;  %v2387_v25 = vmul.f32 %v4895_v52, %v5111_v54  ;;  %v1733_v59 = vpop.permute.xlu0 %1732 }
 0x270   : > { %v2104_v15 = vsel %vm1907_vm8, %v5677_v35, %v2103_v60  ;;  %v5134_v34 = vstv %s5083_s24  ;;  %v1290_v29 = vpop.permute.xlu1 %1289  ;;  %v2394_v27 = vrot.slane %v5121_v48, 6  ;;  %v2156_v37 = vmul.f32 %v4540_v33, %v4803_v22 }
 0x271   : > { %2107 = vrot.lane.b32.xlu1 %v2104_v15, %s5494_s16  ;;  %v1234_v39 = vadd.f32 %v4526_v42, %v1214_v63  ;;  %v1678_v26 = vadd.f32 %v1673_v14, %v1658_v8  ;;  %v2375_v60 = vsel %vm2180_vm9, %v2373_v51, %v2374_v0  ;;  %v5142_v3 = vmul.f32 %v4372_v1, %v5134_v34  ;;  %v5679_v1 = vld [vmem:[#allocation60_spill] sm:$0xff] }
 0x272   : > { %v5678_v42 = vrot.slane %v4758_v62, 5  ;;  %v2143_v14 = vrot.slane %v2136_v45, 5  ;;  %v2393_v35 = vrot.slane %v2387_v25, 6  ;;  %v2407_v15 = vmul.f32 %v4866_v56, %v5134_v34 }
 0x273   : > { %v1254_v40 = vadd.f32 %v1250_v21, %v1234_v39  ;;  %2378 = vrot.lane.b32.xlu0 %v2375_v60, %s5494_s16  ;;  %v1698_v63 = vadd.f32 %v1693_v50, %v1678_v26  ;;  %v1753_v21 = vpop.permute.xlu0 %1752  ;;  %v5155_v51 = vstv %s5113_s25  ;;  %v1358_v62 = vmul.f32 %v4827_v46, %v4774_v16 }
 0x274   : > { %v2124_v47 = vsel %vm1907_vm8, %v5678_v42, %v2123_v18  ;;  %v1330_v18 = vpop.permute.xlu1 %1329  ;;  %v2395_v22 = vsel %vm2180_vm9, %v2393_v35, %v2394_v27  ;;  %v2414_v50 = vrot.slane %v5142_v3, 6  ;;  %v5165_v45 = vmul.f32 %v5054_v44, %v5155_v51 }
 0x275   : > { %2127 = vrot.lane.b32.xlu1 %v2124_v47, %s5494_s16  ;;  %v1274_v8 = vadd.f32 %v5679_v1, %v1254_v40  ;;  %v5680_v25 = vrot.slane %v4787_v53, 5  ;;  %v2163_v26 = vrot.slane %v2156_v37, 5  ;;  %v2209_v16 = vmul.f32 %v4827_v46, %v4806_v9 }
 0x276   : > { %v1718_v60 = vadd.f32 %v1713_v38, %v1698_v63  ;;  %v1375_v40 = vmul.f32 %v4540_v33, %v4777_v28  ;;  %v2413_v42 = vrot.slane %v2407_v15, 6  ;;  %v2427_v44 = vmul.f32 %v4895_v52, %v5155_v51 }
 0x277   : > { %v1294_v56 = vadd.f32 %v1290_v29, %v1274_v8  ;;  %2398 = vrot.lane.b32.xlu0 %v2395_v22, %s5494_s16  ;;  %v2144_v39 = vsel %vm1907_vm8, %v5680_v25, %v2143_v14  ;;  %v5681_v29 = vld [vmem:[#allocation61_spill] sm:$0xff]  ;;  %v1773_v35 = vpop.permute.xlu0 %1772  ;;  %v1366_v53 = vrot.slane %v1358_v62, 3  ;;  %v2434_v9 = vrot.slane %v5165_v45, 6  ;;  %v5683_v22 = vld [vmem:[#allocation62_spill] sm:$0xff] }
 0x278   : > { %v1403_v1 = vpop.permute.xlu1 %1402  ;;  %v2415_v14 = vsel %vm2180_vm9, %v2413_v42, %v2414_v50  ;;  %v5682_v28 = vrot.slane %v4819_v43, 5  ;;  %v2216_v63 = vrot.slane %v2209_v16, 6  ;;  %v2229_v52 = vmul.f32 %v4540_v33, %v4809_v20 }
 0x279   : > { %2147 = vrot.lane.b32.xlu1 %v2144_v39, %s5495_s0  ;;  %v1314_v47 = vadd.f32 %v5681_v29, %v1294_v56  ;;  %v1738_v15 = vadd.f32 %v1733_v59, %v1718_v60  ;;  %v1382_v8 = vrot.slane %v1375_v40, 3  ;;  %v2433_v62 = vrot.slane %v2427_v44, 6 }
 0x27a   : > { %v2164_v37 = vsel %vm1907_vm8, %v5682_v28, %v2163_v26  ;;  %v5685_v20 = vrot.slane %v4856_v17, 6  ;;  %v2236_v16 = vrot.slane %v2229_v52, 6  ;;  %v2249_v60 = vmul.f32 %v4827_v46, %v4909_v24 }
 0x27b   : > { %v1334_v38 = vadd.f32 %v1330_v18, %v1314_v47  ;;  %2418 = vrot.lane.b32.xlu0 %v2415_v14, %s5495_s0  ;;  %v1793_v25 = vpop.permute.xlu0 %1792  ;;  %v5684_v18 = vrot.slane %v4840_v36, 3  ;;  %v2435_v43 = vsel %vm2180_vm9, %v2433_v62, %v2434_v9  ;;  %v1758_v40 = vadd.f32 %v1753_v21, %v1738_v15 }
 0x27c   : > { %v1443_v42 = vpop.permute.xlu1 %1442  ;;  %v2217_v59 = vsel %vm2180_vm9, %v5685_v20, %v2216_v63  ;;  %v5686_v36 = vrot.slane %v4846_v58, 3  ;;  %v5689_v63 = vld [vmem:[#allocation34_spill] sm:$0xff]  ;;  %v5690_v58 = vld [vmem:[#allocation63_spill] sm:$0xff] }
 0x27d   : > { %2167 = vrot.lane.b32.xlu1 %v2164_v37, %s5495_s0  ;;  %v1354_v56 = vadd.f32 %v5683_v22, %v1334_v38  ;;  %v1367_v39 = vsel %vm1362_vm7, %v5684_v18, %v1366_v53  ;;  %v5687_v38 = vld [vmem:[#allocation27_spill] sm:$0xff]  ;;  %v2256_v37 = vrot.slane %v2249_v60, 6  ;;  %v2269_v52 = vmul.f32 %v4540_v33, %v5689_v63  ;;  %v5691_v22 = vld [vmem:[#allocation29_spill] sm:$0xff] }
 0x27e   : > { %v1383_v44 = vsel %vm1362_vm7, %v5686_v36, %v1382_v8  ;;  %v5688_v28 = vrot.slane %v5687_v38, 6  ;;  %v1778_v24 = vadd.f32 %v1773_v35, %v1758_v40  ;;  %v5694_v40 = vrot.slane %v4947_v61, 6 }
 0x27f   : > { %v1371_v26 = vadd.f32 %v1367_v39, %v1354_v56  ;;  %2438 = vrot.lane.b32.xlu0 %v2435_v43, %s5495_s0  ;;  %v1813_v47 = vpop.permute.xlu0 %1812  ;;  %v5692_v56 = vrot.slane %v5691_v22, 6  ;;  %v2276_v18 = vrot.slane %v2269_v52, 6  ;;  %v2289_v39 = vmul.f32 %v4827_v46, %v4966_v23  ;;  %v5695_v23 = vld [vmem:[#allocation65_spill] sm:$0xff] }
 0x280   : > { %v1483_v53 = vpop.permute.xlu1 %1482  ;;  %v2237_v17 = vsel %vm2180_vm9, %v5688_v28, %v2236_v16  ;;  %v1798_v43 = vadd.f32 %v1793_v25, %v1778_v24 }
 0x281   : > { %2220 = vrot.lane.b32.xlu1 %v2217_v59, %s5496_s1  ;;  %v1387_v29 = vadd.f32 %v1383_v44, %v1371_v26  ;;  %v5693_v26 = vld [vmem:[#allocation64_spill] sm:$0xff]  ;;  %v2296_v36 = vrot.slane %v2289_v39, 6  ;;  %v2309_v44 = vmul.f32 %v4540_v33, %v4960_v7  ;;  %v5697_v7 = vld [vmem:[#allocation26_spill] sm:$0xff]  ;;  %v5700_v39 = vld [vmem:[#allocation47_spill] sm:$0xff] }
 0x282   : > { %v1818_v59 = vadd.f32 %v1813_v47, %v1798_v43  ;;  %v5696_v47 = vrot.slane %v4979_v30, 6  ;;  %v5698_v30 = vrot.slane %v5006_v11, 6 }
 0x283   : > { %v1407_v14 = vadd.f32 %v1403_v1, %v1387_v29  ;;  %v1833_v15 = vpop.permute.xlu0 %1832  ;;  %v2257_v1 = vsel %vm2180_vm9, %v5692_v56, %v2256_v37  ;;  %v2316_v61 = vrot.slane %v2309_v44, 6  ;;  %v2329_v37 = vmul.f32 %v4827_v46, %v4998_v13 }
 0x284   : > { %v1523_v8 = vpop.permute.xlu1 %1522  ;;  %v1838_v29 = vadd.f32 %v1833_v15, %v1818_v59  ;;  %v2349_v13 = vmul.f32 %v4540_v33, %v4969_v10  ;;  %v1647_v56 = vmul.f32 %v4540_v33, %v4937_v31  ;;  %v2369_v33 = vmul.f32 %v4827_v46, %v5025_v6 }
 0x285   : > { %2240 = vrot.lane.b32.xlu1 %v2237_v17, %s5496_s1  ;;  %v1427_v21 = vadd.f32 %v5690_v58, %v1407_v14  ;;  %v1631_v58 = vmul.f32 %v4827_v46, %v4995_v32  ;;  %v2336_v22 = vrot.slane %v2329_v37, 6  ;;  %s5718_s1 = sld [smem:[#allocation17_spill]] }
 0x286   : > { %v2356_v10 = vrot.slane %v2349_v13, 6  ;;  %v1654_v31 = vrot.slane %v1647_v56, 4 }
 0x287   : > { %v1447_v62 = vadd.f32 %v1443_v42, %v1427_v21  ;;  %v1853_v20 = vpop.permute.xlu0 %1852  ;;  %v2277_v42 = vsel %vm2180_vm9, %v5694_v40, %v2276_v18 }
 0x288   : > { %v1563_v16 = vpop.permute.xlu1 %1562  ;;  %v1858_v38 = vadd.f32 %v1853_v20, %v1838_v29  ;;  %v2357_v4 = vsel %vm2180_vm9, %v2354_v57, %v2356_v10 }
 0x289   : > { %2260 = vrot.lane.b32.xlu1 %v2257_v1, %s5499_s10  ;;  %v1467_v35 = vadd.f32 %v5693_v26, %v1447_v62  ;;  %v2317_v62 = vsel %vm2180_vm9, %v5698_v30, %v2316_v61  ;;  %v5699_v1 = vld [vmem:[#allocation32_spill] sm:$0xff]  ;;  %v1638_v26 = vrot.slane %v1631_v58, 4 }
 0x28b   : > { %v1487_v60 = vadd.f32 %v1483_v53, %v1467_v35  ;;  %v1873_v14 = vpop.permute.xlu0 %1872  ;;  %v2297_v53 = vsel %vm2180_vm9, %v5696_v47, %v2296_v36  ;;  %v5701_v35 = vld [vmem:[#allocation43_spill] sm:$0xff]  ;;  %v1639_v36 = vsel %vm203_vm0, %v1636_v55, %v1638_v26 }
 0x28c   : > { %v1603_v28 = vpop.permute.xlu1 %1602  ;;  %v1878_v63 = vadd.f32 %v1873_v14, %v1858_v38 }
 0x28d   : > { %2280 = vrot.lane.b32.xlu1 %v2277_v42, %s5499_s10  ;;  %v1507_v25 = vadd.f32 %v5695_v23, %v1487_v60  ;;  %v5702_v60 = vld [vmem:[#allocation54_spill] sm:$0xff]  ;;  %v5261_v23 = vld [vmem:[#allocation4 + $0x28] sm:$0x3f]  ;;  %s5719_s10 = sld [smem:[#allocation22_spill]] }
 0x28e   : > { %v2389_v6 = vmul.f32 %v5261_v23, %v5111_v54 }
 0x28f   : > { %v1527_v17 = vadd.f32 %v1523_v8, %v1507_v25  ;;  %v1893_v24 = vpop.permute.xlu0 %1892  ;;  %v1655_v25 = vsel %vm203_vm0, %v1652_v49, %v1654_v31 }
 0x290   : > { %v1898_v21 = vadd.f32 %v1893_v24, %v1878_v63  ;;  %v1675_v15 = vpop.permute.xlu1 %1674  ;;  %v2396_v57 = vrot.slane %v2389_v6, 6 }
 0x291   : > { %2300 = vrot.lane.b32.xlu1 %v2297_v53, %s5502_s2  ;;  %v1547_v52 = vadd.f32 %v5697_v7, %v1527_v17  ;;  %v2429_v53 = vmul.f32 %v5261_v23, %v5155_v51 }
 0x292   : > { %v1915_v18 = vadd.f32 %v5699_v1, %v1898_v21  ;;  %v2397_v49 = vsel %vm2180_vm9, %v2394_v27, %v2396_v57 }
 0x293   : > { %v1567_v8 = vadd.f32 %v1563_v16, %v1547_v52  ;;  %v1946_v43 = vpop.permute.xlu0 %1945  ;;  %v2337_v16 = vsel %vm2180_vm9, %v2334_v5, %v2336_v22  ;;  %v2376_v5 = vrot.slane %v2369_v33, 6  ;;  %v2436_v37 = vrot.slane %v2429_v53, 6  ;;  %p5721_p4 = scmp.ne.s32.totalorder %s5719_s10, 0 }
 0x294   : > { %v1931_v20 = vadd.f32 %v5701_v35, %v1915_v18  ;;  %v1695_v11 = vpop.permute.xlu1 %1694 }
 0x295   : > { %2320 = vrot.lane.b32.xlu1 %v2317_v62, %s5502_s2  ;;  %v1587_v32 = vadd.f32 %v5700_v39, %v1567_v8  ;;  %v2377_v41 = vsel %vm2180_vm9, %v2374_v0, %v2376_v5  ;;  %v2437_v51 = vsel %vm2180_vm9, %v2434_v9, %v2436_v37  ;;  %v5703_v39 = vld [vmem:[#allocation37_spill] sm:$0xff]  ;;  %s2688_s2 = sshll.u32 %s5718_s1, 8 }
 0x296   : > { %v1951_v7 = vadd.f32 %v1946_v43, %v1931_v20  ;;  %v1903_v9 = vmul.f32 %v4827_v46, %v5703_v39  ;;  %v5704_v20 = vld [vmem:[#allocation38_spill] sm:$0xff]  ;;  %s5317_s18 = scalar_lea.hbm %s5720_s30, %s2688_s2 }
 0x297   : > { %v1607_v59 = vadd.f32 %v1603_v28, %v1587_v32  ;;  %v1966_v42 = vpop.permute.xlu0 %1965  ;;  %v2409_v28 = vmul.f32 %v4827_v46, %v5134_v34 }
 0x298   : > { %v1715_v44 = vpop.permute.xlu1 %1714  ;;  %v1971_v58 = vadd.f32 %v1966_v42, %v1951_v7  ;;  %v1911_v10 = vrot.slane %v1903_v9, 5 }
 0x299   : > { %2340 = vrot.lane.b32.xlu1 %v2337_v16, %s5493_s7  ;;  %v1627_v40 = vadd.f32 %v5702_v60, %v1607_v59  ;;  %v2416_v47 = vrot.slane %v2409_v28, 6  ;;  %v5709_v28 = vld [vmem:[#allocation33_spill] sm:$0xff] }
 0x29b   : > { %v1643_v29 = vadd.f32 %v1639_v36, %v1627_v40  ;;  %v1986_v55 = vpop.permute.xlu0 %1985  ;;  %v2417_v34 = vsel %vm2180_vm9, %v2414_v50, %v2416_v47 }
 0x29c   : > { %v1735_v14 = vpop.permute.xlu1 %1734  ;;  %v1991_v3 = vadd.f32 %v1986_v55, %v1971_v58  ;;  %v5707_v55 = vld [vmem:[#allocation42_spill] sm:$0xff] }
 0x29d   : > { %2360 = vrot.lane.b32.xlu1 %v2357_v4, %s5493_s7  ;;  %v1659_v12 = vadd.f32 %v1655_v25, %v1643_v29  ;;  %v5705_v29 = vld [vmem:[#allocation41_spill] sm:$0xff] }
 0x29e   : > { %v5706_v4 = vrot.slane %v5705_v29, 5 }
 0x29f   : > { %v1679_v38 = vadd.f32 %v1675_v15, %v1659_v12  ;;  %v2006_v2 = vpop.permute.xlu0 %2005 }
 0x2a0   : > { %v1755_v17 = vpop.permute.xlu1 %1754  ;;  %v2011_v8 = vadd.f32 %v2006_v2, %v1991_v3  ;;  %v1912_v5 = vsel %vm1907_vm8, %v5706_v4, %v1911_v10  ;;  %v5712_v10 = vld [vmem:[#allocation40_spill] sm:$0xff] }
 0x2a1   : > { %2380 = vrot.lane.b32.xlu1 %v2377_v41, %s5494_s16  ;;  %v1699_v54 = vadd.f32 %v1695_v11, %v1679_v38  ;;  %v1920_v11 = vmul.f32 %v5261_v23, %v5704_v20 }
 0x2a3   : > { %v1719_v19 = vadd.f32 %v1715_v44, %v1699_v54  ;;  %v2026_v0 = vpop.permute.xlu0 %2025  ;;  %v1927_v42 = vrot.slane %v1920_v11, 5 }
 0x2a4   : > { %v1775_v61 = vpop.permute.xlu1 %1774  ;;  %v2031_v62 = vadd.f32 %v2026_v0, %v2011_v8 }
 0x2a5   : > { %2400 = vrot.lane.b32.xlu1 %v2397_v49, %s5494_s16  ;;  %v1739_v63 = vadd.f32 %v1735_v14, %v1719_v19  ;;  %v5708_v14 = vrot.slane %v5707_v55, 5 }
 0x2a7   : > { %v2046_v48 = vpop.permute.xlu0 %2045  ;;  %v1759_v52 = vadd.f32 %v1755_v17, %v1739_v63  ;;  %v1928_v38 = vsel %vm1907_vm8, %v5708_v14, %v1927_v42  ;;  %v5710_v17 = vld [vmem:[#allocation28_spill] sm:$0xff] }
 0x2a8   : > { %v1795_v27 = vpop.permute.xlu1 %1794  ;;  %v2051_v56 = vadd.f32 %v2046_v48, %v2031_v62 }
 0x2a9   : > { %2420 = vrot.lane.b32.xlu1 %v2417_v34, %s5495_s0  ;;  %v1779_v15 = vadd.f32 %v1775_v61, %v1759_v52 }
 0x2ab   : > { %v2066_v24 = vpop.permute.xlu0 %2065  ;;  %v1799_v22 = vadd.f32 %v1795_v27, %v1779_v15 }
 0x2ac   : > { %v1815_v21 = vpop.permute.xlu1 %1814  ;;  %v2071_v45 = vadd.f32 %v2066_v24, %v2051_v56 }
 0x2ad   : > { %2440 = vrot.lane.b32.xlu1 %v2437_v51, %s5495_s0  ;;  %v1819_v18 = vadd.f32 %v1815_v21, %v1799_v22  ;;  %s5717_s0 = sld [smem:[#allocation24_spill]] }
 0x2af   : > { %v2086_v50 = vpop.permute.xlu0 %2085 }
 0x2b0   : > { %v1835_v30 = vpop.permute.xlu1 %1834  ;;  %v2091_v26 = vadd.f32 %v2086_v50, %v2071_v45 }
 0x2b1   : > { %v1839_v32 = vadd.f32 %v1835_v30, %v1819_v18 }
 0x2b3   : > { %v2106_v13 = vpop.permute.xlu0 %2105  ;;  %s2582_s7 = sshll.u32 %s5717_s0, 4  ;;  %s2462_s9 = scalar_lea.sflag [#allocation7], %s5717_s0 }
 0x2b4   : > { %v1855_v1 = vpop.permute.xlu1 %1854  ;;  %v2111_v16 = vadd.f32 %v2106_v13, %v2091_v26  ;;  %v5711_v26 = vld [vmem:[#allocation39_spill] sm:$0xff]  ;;  %s187_s16 = scalar_lea.vmem [#allocation10], %s2582_s7 }
 0x2b5   : > { %v1859_v59 = vadd.f32 %v1855_v1, %v1839_v32  ;;  %s2475_s23 = sshll.u32 %s187_s16, 4  ;;  %s5319_s23 = int_to_ptr.vmem [resolvable:$true] %s2475_s23 }
 0x2b6   : > { %s2846_s11 = scalar_lea.vmem %s5319_s23, 256  ;;  %p2853_p9 = scmp.lt.s32.totalorder %s5319_s23, %s2851_s13 }
 0x2b7   : > { %v2126_v43 = vpop.permute.xlu0 %2125  ;;  %p2847_p1 = scmp.ne.s32.totalorder %s5319_s23, %s2846_s11  ;;  %p2854_p3 = scmp.lt.s32.totalorder %s2852_s14, %s2846_s11 }
 0x2b8   : > { %v1875_v35 = vpop.permute.xlu1 %1874  ;;  %v2131_v60 = vadd.f32 %v2126_v43, %v2111_v16 }
 0x2b9   : > { %v1879_v33 = vadd.f32 %v1875_v35, %v1859_v59  ;;  %v2176_v35 = vmul.f32 %v4827_v46, %v5711_v26  ;;  %p2848_p6 = pnand %p2847_p1, %p5721_p4  ;;  %p2855_p5 = por %p2854_p3, %p2853_p9 }
 0x2bb   : > { %p2849_p8 = pneg %p2848_p6 }
 0x2bc   : > { %v2146_v31 = vpop.permute.xlu0 %2145  ;;  %v1895_v40 = vpop.permute.xlu1 %1894 }
 0x2bd   : > { %v1899_v36 = vadd.f32 %v1895_v40, %v1879_v33  ;;  %v2151_v44 = vadd.f32 %v2146_v31, %v2131_v60  ;;  %v2193_v33 = vmul.f32 %v5261_v23, %v5712_v10  ;;  %v2184_v40 = vrot.slane %v2176_v35, 6  ;;  %p2856_p7 = pnand %p2855_p5, %p2849_p8 }
 0x2bf   : > { %v1916_v6 = vadd.f32 %v1912_v5, %v1899_v36  ;;  %v2200_v4 = vrot.slane %v2193_v33, 6 }
 0x2c0   : > { %v2166_v25 = vpop.permute.xlu0 %2165  ;;  %v1948_v41 = vpop.permute.xlu1 %1947 }
 0x2c1   : > { %v2171_v12 = vadd.f32 %v2166_v25, %v2151_v44  ;;  %v1932_v57 = vadd.f32 %v1928_v38, %v1916_v6  ;;  %v5713_v25 = vld [vmem:[#allocation44_spill] sm:$0xff] }
 0x2c3   : > { %v2188_v54 = vadd.f32 %v5709_v28, %v2171_v12  ;;  %v1952_v7 = vadd.f32 %v1948_v41, %v1932_v57  ;;  %v5714_v12 = vrot.slane %v5713_v25, 6  ;;  %v5715_v41 = vld [vmem:[#allocation45_spill] sm:$0xff] }
 0x2c4   : > { %v2219_v2 = vpop.permute.xlu0 %2218  ;;  %v5716_v57 = vrot.slane %v5715_v41, 6 }
 0x2c5   : > { %v2204_v49 = vadd.f32 %v5710_v17, %v2188_v54  ;;  %v1968_v47 = vpop.permute.xlu1 %1967  ;;  %v2185_v46 = vsel %vm2180_vm9, %v5714_v12, %v2184_v40 }
 0x2c6   : > { %v1972_v24 = vadd.f32 %v1968_v47, %v1952_v7  ;;  %v2201_v23 = vsel %vm2180_vm9, %v5716_v57, %v2200_v4 }
 0x2c7   : > { %v2224_v51 = vadd.f32 %v2219_v2, %v2204_v49 }
 0x2c8   : > { %v2239_v53 = vpop.permute.xlu0 %2238 }
 0x2c9   : > { %v1988_v19 = vpop.permute.xlu1 %1987  ;;  %v2244_v3 = vadd.f32 %v2239_v53, %v2224_v51 }
 0x2ca   : > { %v1992_v58 = vadd.f32 %v1988_v19, %v1972_v24 }
 0x2cc   : > { %v2259_v0 = vpop.permute.xlu0 %2258 }
 0x2cd   : > { %v2008_v61 = vpop.permute.xlu1 %2007  ;;  %v2264_v8 = vadd.f32 %v2259_v0, %v2244_v3 }
 0x2ce   : > { %v2012_v50 = vadd.f32 %v2008_v61, %v1992_v58 }
 0x2d0   : > { %v2279_v34 = vpop.permute.xlu0 %2278 }
 0x2d1   : > { %v2028_v37 = vpop.permute.xlu1 %2027  ;;  %v2284_v22 = vadd.f32 %v2279_v34, %v2264_v8 }
 0x2d2   : > { %v2032_v30 = vadd.f32 %v2028_v37, %v2012_v50 }
 0x2d5   : > { %v2299_v63 = vpop.permute.xlu0 %2298 }
 0x2d6   : > { %v2048_v48 = vpop.permute.xlu1 %2047  ;;  %v2304_v1 = vadd.f32 %v2299_v63, %v2284_v22 }
 0x2d7   : > { %v2052_v56 = vadd.f32 %v2048_v48, %v2032_v30 }
 0x2d9   : > { %v2319_v27 = vpop.permute.xlu0 %2318 }
 0x2da   : > { %v2324_v39 = vadd.f32 %v2319_v27, %v2304_v1 }
 0x2db   : > { %v2068_v52 = vpop.permute.xlu1 %2067 }
 0x2dc   : > { %v2072_v18 = vadd.f32 %v2068_v52, %v2052_v56 }
 0x2dd   : > { %v2339_v21 = vpop.permute.xlu0 %2338 }
 0x2de   : > { %v2344_v43 = vadd.f32 %v2339_v21, %v2324_v39 }
 0x2df   : > { %v2088_v15 = vpop.permute.xlu1 %2087 }
 0x2e0   : > { %v2092_v32 = vadd.f32 %v2088_v15, %v2072_v18 }
 0x2e1   : > { %v2359_v62 = vpop.permute.xlu0 %2358 }
 0x2e2   : > { %v2364_v59 = vadd.f32 %v2359_v62, %v2344_v43 }
 0x2e3   : > { %v2108_v13 = vpop.permute.xlu1 %2107 }
 0x2e4   : > { %v2112_v20 = vadd.f32 %v2108_v13, %v2092_v32 }
 0x2e5   : > { %v2379_v45 = vpop.permute.xlu0 %2378 }
 0x2e6   : > { %v2384_v60 = vadd.f32 %v2379_v45, %v2364_v59 }
 0x2e7   : > { %v2128_v9 = vpop.permute.xlu1 %2127 }
 0x2e8   : > { %v2132_v31 = vadd.f32 %v2128_v9, %v2112_v20 }
 0x2e9   : > { %v2399_v11 = vpop.permute.xlu0 %2398 }
 0x2ea   : > { %v2404_v44 = vadd.f32 %v2399_v11, %v2384_v60 }
 0x2eb   : > { %v2148_v16 = vpop.permute.xlu1 %2147 }
 0x2ec   : > { %v2152_v42 = vadd.f32 %v2148_v16, %v2132_v31 }
 0x2ed   : > { %v2419_v36 = vpop.permute.xlu0 %2418 }
 0x2ee   : > { %v2424_v6 = vadd.f32 %v2419_v36, %v2404_v44 }
 0x2ef   : > { %v2168_v29 = vpop.permute.xlu1 %2167 }
 0x2f0   : > { %v2172_v5 = vadd.f32 %v2168_v29, %v2152_v42 }
 0x2f1   : > { %v2439_v14 = vpop.permute.xlu0 %2438 }
 0x2f2   : > { %v2189_v55 = vadd.f32 %v2185_v46, %v2172_v5  ;;  %v2444_v38 = vadd.f32 %v2439_v14, %v2424_v6 }
 0x2f3   : > { %v2221_v28 = vpop.permute.xlu1 %2220 }
 0x2f4   : > { %v2205_v54 = vadd.f32 %v2201_v23, %v2189_v55  ;;  %v2680_v2 = vmul.f32 -1.442695, %v2444_v38 }
 0x2f6   : > { %2789 = vpow2.f32 %v2680_v2  ;;  %v2225_v34 = vadd.f32 %v2221_v28, %v2205_v54 }
 0x2f7   : > { %v2241_v17 = vpop.permute.xlu1 %2240 }
 0x2f8   : > { %v2245_v63 = vadd.f32 %v2241_v17, %v2225_v34 }
 0x2fb   : > { %v2261_v49 = vpop.permute.xlu1 %2260 }
 0x2fc   : > { %v2265_v48 = vadd.f32 %v2261_v49, %v2245_v63 }
 0x2ff   : > { %v2281_v47 = vpop.permute.xlu1 %2280 }
 0x300   : > { %v2285_v27 = vadd.f32 %v2281_v47, %v2265_v48 }
 0x303   : > { %v2301_v53 = vpop.permute.xlu1 %2300  ;;  %v2790_v19 = vpop.eup %2789 }
 0x304   : > { %v2452_v0 = vadd.f32 1.0, %v2790_v19  ;;  %v2305_v51 = vadd.f32 %v2301_v53, %v2285_v27 }
 0x306   : > { %2791 = vrcp.f32 %v2452_v0 }
 0x307   : > { %v2321_v61 = vpop.permute.xlu1 %2320 }
 0x308   : > { %v2325_v58 = vadd.f32 %v2321_v61, %v2305_v51 }
 0x30b   : > { %v2341_v37 = vpop.permute.xlu1 %2340 }
 0x30c   : > { %v2345_v21 = vadd.f32 %v2341_v37, %v2325_v58 }
 0x30f   : > { %v2361_v7 = vpop.permute.xlu1 %2360 }
 0x310   : > { %v2365_v15 = vadd.f32 %v2361_v7, %v2345_v21 }
 0x313   : > { %v2381_v52 = vpop.permute.xlu1 %2380  ;;  %v2792_v24 = vpop.eup %2791 }
 0x314   : > { %2459 = vst.msk [vmem:[%s187_s16] sm:$0xff] %vm2458_vm10, %v2792_v24  ;;  %v2385_v50 = vadd.f32 %v2381_v52, %v2365_v15 }
 0x317   : > { %v2401_v3 = vpop.permute.xlu1 %2400 }
 0x318   : > { %v2405_v30 = vadd.f32 %v2401_v3, %v2385_v50 }
 0x31b   : > { %v2421_v8 = vpop.permute.xlu1 %2420 }
 0x31c   : > { %v2425_v62 = vadd.f32 %v2421_v8, %v2405_v30 }
 0x31f   : > { %v2441_v22 = vpop.permute.xlu1 %2440 }
 0x320   : > { %v2445_v13 = vadd.f32 %v2441_v22, %v2425_v62 }
 0x322   : > { %v2681_v56 = vmul.f32 -1.442695, %v2445_v13 }
 0x324   : > { %2793 = vpow2.f32 %v2681_v56 }
 0x331   : > { %v2794_v1 = vpop.eup %2793 }
 0x332   : > { %v2453_v18 = vadd.f32 1.0, %v2794_v1 }
 0x334   : > { %2795 = vrcp.f32 %v2453_v18 }
 0x341   : > { %v2796_v45 = vpop.eup %2795 }
 0x342   : > { %2460 = vst.msk [vmem:[%s187_s16 + $0x8] sm:$0xff] %vm2458_vm10, %v2796_v45 }
 0x343   : > { %2859 = shalt.err (!%p2856_p7)
}
 0x344   : > { %s2860_s20 = scalar_lea.hbm %s5317_s18, 256  ;;  %s2864_s4 = scalar_lea.hbm %s5720_s30, 512 }
 0x345   : > { %p2861_p2 = scmp.ne.s32.totalorder %s5317_s18, %s2860_s20  ;;  %p2865_p13 = scmp.lt.s32.totalorder %s5317_s18, %s5720_s30 }
 0x346   : > { %p2866_p0 = scmp.lt.s32.totalorder %s2864_s4, %s2860_s20 }
 0x347   : > { %p2862_p11 = pnand %p2861_p2, %p5721_p4 }
 0x348   : > { %p2867_p10 = por %p2866_p0, %p2865_p13 }
 0x349   : > { %p2863_p12 = pneg %p2862_p11 }
 0x34b   : > { %p2868_p1 = pnand %p2867_p10, %p2863_p12 }
 0x34d   : > { %2871 = shalt.err (!%p2868_p1)
}
 0x34e   : > { %s2959_s17 = smov 128   ;;  %s2960_s19 = smov 8  }
 0x34f   : > { %2695 = dma.vmem_to_hbm [thread:$0]  (%p5721_p4), %s5319_s23, 256, %s5317_s18, %s2462_s9, %s2959_s17, %s2959_s17, %s2960_s19  }
 0x350 PF: > { %s5722_s21 = sld [smem:[#allocation14_spill]] }
 0x351   : > { %s5723_s6 = sld [smem:[#allocation20_spill]] }
 0x352   : > { %s5724_s3 = sld [smem:[#allocation19_spill]] }
 0x356   : > { %s2490_s15 = sand.u32 1, %s5722_s21  }
 0x357   : > { %p5725_p6 = scmp.ne.s32.totalorder %s5723_s6, 0  ;;  %s2491_s8 = scalar_lea.sflag [#allocation7], %s2490_s15 }
 0x358   : > { %p5726_p8 = scmp.ge.s32.totalorder %s5724_s3, 2 }
 0x35a   : > { %p2706_p9 = pnand %p5726_p8, %p5725_p6 }
 0x35c   : > { %p2707_p3 = pneg %p2706_p9 }
 0x35e   : > { %2905 = dma.done.wait (%p2707_p3), %s2491_s8, 256  }
 0x35f   : > { %2907 = vsyncadd (%p2707_p3), %s2491_s8, 4294967040  ;;  %s19_s14 = sadd.s32 1, %s5724_s3   ;;  %s5727_s9 = sld [smem:[#allocation15_spill]] }
 0x360   : > { %p16_p5 = scmp.ge.s32.totalorder %s19_s14, 4   ;;  %s5728_s10 = sld [smem:[#allocation16_spill]] }
 0x361   : > { %s5729_s11 = sld [smem:[#allocation23_spill]] }
 0x362   : > { %s5730_s12 = sld [smem:[#allocation18_spill]]  ;;  %18 = sbr.rel (!%p16_p5) target bundleno = 11 (0xb), region = 87 }
 0x363   : > { %s5731_s13 = sld [smem:[#allocation21_spill]] }
 0x367   :  { %2496 = vsyncpa [#allocation6], 1 }
 0x368   :  { %2498 = vsyncpa [#allocation6 + $0x1], 1 }
 0x369   :  { %2499 = vsyncpa [#allocation7], 1 }
 0x36a   :  { %2501 = vsyncpa [#allocation7 + $0x1], 1 }
 0x36b   :  { %2502 = vsyncpa [#allocation8], 1 }
 0x36c   :  { %2504 = vsyncpa [#allocation8 + $0x1], 1 }

</bundles_post_ra>
